<compile_context>
chip_gen: v7x
topology: tpu7x:2x2x1
jax: 0.10.0
libtpu: 0.0.40
codegen_flags: <defaults>
</compile_context>

<pallas_src>
import math
from functools import partial

import jax
import jax.numpy as jnp
from jax import lax
from jax.experimental import pallas as pl
from jax.experimental.pallas import tpu as pltpu

IGNORE_LABEL = 255
MAX_N_RATIO = 1.0 / 100.0
LABEL_SMOOTH = 0.2
MAX_CLIP_DIST = 20.0
MAX_DIS = 100000.0
BIG = 1e9          # "no boundary here" penalty for the squared distance transform
EPS0 = 1e-5        # starting eps of the reference 1.2-ladder
NUM_EPS_STEPS = 128  # covers kl up to ~1e-5 * 1.2**128 ~ 1.3e5

# neighbour order (matches the reference):
#   | 4| 0| 5|
#   | 2| 8| 3|
#   | 6| 1| 7|
X_RANGE = (1, -1, 0, 0, -1, 1, -1, 1, 0)
Y_RANGE = (0, 0, -1, 1, 1, 1, -1, -1, 0)


def _log_softmax_c(x):
    """log_softmax over the leading (channel) axis of a (C, H, W) block."""
    m = jnp.max(x, axis=0, keepdims=True)
    s = x - m
    return s - jnp.log(jnp.sum(jnp.exp(s), axis=0, keepdims=True))


def _pick_vmem_limit_bytes():
    """Generation-dependent scoped-VMEM limit (v5e/v6e: 128 MiB, v7x: 64 MiB)."""
    cap = 64 * 1024 * 1024
    try:
        cap = int(getattr(pltpu.get_tpu_info(), "vmem_capacity_bytes", cap))
    except Exception:
        pass
    return int(min(cap * 3 // 4, 100 * 1024 * 1024))


# ---------------------------------------------------------------------------
# Kernel 1: gt -> boundary + exact Euclidean distance transform (separable),
#           with the column loop processed in chunks of `chunk` columns.
# ---------------------------------------------------------------------------
def _dist_map_kernel(tgt_ref, tgtT_ref, dist_ref, penT_ref, *, chunk):
    # tgt_ref : (1, H+1, W+1) target, edge padded by 1 at bottom/right
    # tgtT_ref: (1, W+1, H+1) transposed target, edge padded by 1 at bottom/right
    H = dist_ref.shape[1]
    W = dist_ref.shape[2]

    # gt2boundary in the output (H, W) orientation (for the final combine)
    tp = tgt_ref[0]
    t = tp[:H, :W]
    bnd = (tp[1:H + 1, :W] != t) | (tp[:H, 1:W + 1] != t) | (t == float(IGNORE_LABEL))

    # same boundary in transposed orientation -> penalty map with rows = original columns
    tpT = tgtT_ref[0]
    tT = tpT[:W, :H]
    bndT = ((tpT[:W, 1:H + 1] != tT) | (tpT[1:W + 1, :H] != tT)
            | (tT == float(IGNORE_LABEL)))
    penT_ref[...] = jnp.where(bndT, 0.0, BIG)            # (W, H): pen[c, r]

    # exact squared EDT, separable:
    #   d2[i,j] = min_c ( (j-c)^2 + min_r ( (i-r)^2 + pen[r,c] ) )
    ii = lax.broadcasted_iota(jnp.int32, (H, H), 0).astype(jnp.float32)
    rr = lax.broadcasted_iota(jnp.int32, (H, H), 1).astype(jnp.float32)
    d2_ir = (ii - rr) * (ii - rr)                         # (H, H): (i - r)^2
    jj = lax.broadcasted_iota(jnp.int32, (1, W), 1).astype(jnp.float32)

    dist_ref[0] = jnp.full((H, W), BIG, jnp.float32)

    n_chunks = W // chunk                                 # wrapper picks chunk | W

    @pl.loop(0, n_chunks)
    def _(cb):
        c0 = pl.multiple_of(cb * chunk, chunk)
        penT_c = penT_ref[pl.ds(c0, chunk), :]            # (chunk, H): pen[r, c0+k]
        c0f = (cb * chunk).astype(jnp.float32)
        acc = dist_ref[0]                                 # single (H, W) RMW per chunk
        for k in range(chunk):                            # static unroll inside the chunk
            pen_c = penT_c[k:k + 1, :]                    # (1, H)
            g = jnp.min(d2_ir + pen_c, axis=1, keepdims=True)   # (H, 1): min_r
            cf = c0f + float(k)
            coef = (jj - cf) * (jj - cf)                  # (1, W): (j - c)^2
            acc = jnp.minimum(acc, g + coef)
        dist_ref[0] = acc

    d = jnp.sqrt(dist_ref[0])
    # one_hot2dist + get_dist_maps: 0 on boundary pixels, max(dist - 1, 0) elsewhere.
    # TODO(synk): scipy's EDT is ill-defined when an image has no boundary pixel;
    # we zero the distance map in that degenerate case (documented divergence).
    has_bnd = (jnp.sum(bnd.astype(jnp.float32)) > 0.0).astype(jnp.float32)
    out = jnp.where(bnd, 0.0, jnp.maximum(d - 1.0, 0.0))
    dist_ref[0] = out * has_bnd


# ---------------------------------------------------------------------------
# Fused kernel 2+3: neighbour-KL boundary score + fused 3x3 dilation,
#                   direction gt (argmin of 9 dists), 8-way neighbour-KL
#                   "logits", online label-smoothed softmax CE, distance
#                   weighting, validity indicator (pred_boundary mask applied
#                   later in the wrapper).
# ---------------------------------------------------------------------------
def _fused_logits_kernel(lgp_ref, dpad_ref, kl_ref, klmax_ref, wl_ref, valid_ref):
    H = kl_ref.shape[1]
    W = kl_ref.shape[2]

    x = lgp_ref[0].astype(jnp.float32)         # (C, H+3, W+3) edge padded (1 top/left, 2 bot/right)
    ls = _log_softmax_c(x)                     # log_softmax ONCE for both halves of the kernel
    p = jnp.exp(ls[:, :H + 2, :W + 2])         # softmax only on the region actually used

    # ---- logits2boundary: kl(center||down) + kl(center||right) on the (H+2, W+2)
    #      halo domain, so the reference zero-padded 3x3 dilation can be fused as a
    #      separable max (every halo-ring value is dominated by an interior value). ----
    lsc_a = ls[:, :H + 2, :W + 2]
    lsd = ls[:, 1:H + 3, :W + 2]
    lsr = ls[:, :H + 2, 1:W + 3]
    klp = jnp.sum(p * (2.0 * lsc_a - lsd - lsr), axis=0)        # (H+2, W+2), >= 0
    kl_ref[0] = klp[1:H + 1, 1:W + 1]                           # exact reference kl_combine
    vmax = jnp.maximum(jnp.maximum(klp[0:H, :], klp[1:H + 1, :]), klp[2:H + 2, :])
    klmax_ref[0] = jnp.maximum(jnp.maximum(vmax[:, 0:W], vmax[:, 1:W + 1]),
                               vmax[:, 2:W + 2])

    # ---- pass 1: direction gt = argmin over the 9 shifted distance maps ----
    dpad = dpad_ref[0]                          # (H+2, W+2) dist padded with MAX_DIS
    dist = dpad[1:H + 1, 1:W + 1]
    best = dpad[2:2 + H, 1:1 + W]               # idx 0: (dx, dy) = (1, 0)
    best_idx = jnp.zeros((H, W), jnp.int32)
    for idx in range(1, 9):
        dx, dy = X_RANGE[idx], Y_RANGE[idx]
        dnow = dpad[1 + dx:1 + dx + H, 1 + dy:1 + dy + W]
        take = dnow < best                      # strict <: first minimum wins (torch.argmin)
        best = jnp.where(take, dnow, best)
        best_idx = jnp.where(take, idx, best_idx)

    # ---- pass 2: 8-way neighbour KL "logits" + online label-smoothed softmax CE ----
    q = jnp.sum(p * lsc_a, axis=0)              # (H+2, W+2): sum_c softmax*log_softmax
    lsc = ls[:, 1:H + 1, 1:W + 1]               # (C, H, W) centre log-softmax
    m = sexp = skl = None
    kl_gt = jnp.zeros((H, W), jnp.float32)
    for idx in range(8):
        dx, dy = X_RANGE[idx], Y_RANGE[idx]
        # kl_div(center, neighbour) summed over channels:
        #   sum_c softmax(nb)*(ls(nb) - ls(center)) = q_nb - sum_c p_nb * ls_center
        pn = p[:, 1 + dx:1 + dx + H, 1 + dy:1 + dy + W]
        qn = q[1 + dx:1 + dx + H, 1 + dy:1 + dy + W]
        kl_now = qn - jnp.sum(pn * lsc, axis=0)
        if idx == 0:
            m = kl_now
            sexp = jnp.ones_like(kl_now)
            skl = kl_now
        else:
            m_new = jnp.maximum(m, kl_now)
            sexp = sexp * jnp.exp(m - m_new) + jnp.exp(kl_now - m_new)
            m = m_new
            skl = skl + kl_now
        kl_gt = jnp.where(best_idx == idx, kl_now, kl_gt)

    # label-smoothed softmax cross entropy over the 8 direction "logits"
    num_cls = 8
    logz = m + jnp.log(sexp)
    lb_pos = 1.0 - LABEL_SMOOTH
    lb_neg = LABEL_SMOOTH / num_cls
    loss = -(lb_neg * (skl - num_cls * logz) + (lb_pos - lb_neg) * (kl_gt - logz))

    weight_ce = jnp.minimum(dist, MAX_CLIP_DIST) * (1.0 / MAX_CLIP_DIST)
    indicator = (best_idx != num_cls).astype(jnp.float32)   # direction_gt != 8
    wl_ref[0] = loss * weight_ce * indicator                # pred_boundary mask applied later
    valid_ref[0] = indicator


# ---------------------------------------------------------------------------
# Wrapper (layout glue, eps selection, final reduction)
# ---------------------------------------------------------------------------
def abl_forward(logits_nchw, target):
    B, C, H, W = logits_nchw.shape
    assert target.shape == (B, H, W)
    # TODO(synk): bilinear upsampling path (logits spatial size != target) not implemented.

    tgt = target.astype(jnp.float32)

    cparams = pltpu.CompilerParams(
        dimension_semantics=("parallel",),              # shard batch across TensorCores
        vmem_limit_bytes=_pick_vmem_limit_bytes(),      # generation-dependent cap
    )

    # --- kernel 1: gt boundary + exact Euclidean distance transform ---
    edt_chunk = max(k for k in (16, 8, 4, 2, 1) if W % k == 0)
    tgt_pad = jnp.pad(tgt, ((0, 0), (0, 1), (0, 1)), mode="edge")
    tgt_padT = jnp.pad(jnp.transpose(tgt, (0, 2, 1)), ((0, 0), (0, 1), (0, 1)), mode="edge")
    dist_maps = pl.pallas_call(
        partial(_dist_map_kernel, chunk=edt_chunk),
        out_shape=jax.ShapeDtypeStruct((B, H, W), jnp.float32),
        grid=(B,),
        in_specs=[pl.BlockSpec((1, H + 1, W + 1), lambda b: (b, 0, 0)),
                  pl.BlockSpec((1, W + 1, H + 1), lambda b: (b, 0, 0))],
        out_specs=pl.BlockSpec((1, H, W), lambda b: (b, 0, 0)),
        scratch_shapes=[pltpu.VMEM((W, H), jnp.float32)],
        compiler_params=cparams,
        cost_estimate=pl.CostEstimate(
            flops=int(3 * B * H * W * (H + W)),
            transcendentals=int(B * H * W),
            bytes_accessed=int(B * (2 * (H + 1) * (W + 1) + H * W) * 4)),
    )(tgt_pad, tgt_padT)

    # --- fused kernel 2+3: logits are read from HBM and log-softmaxed ONCE ---
    # TODO(synk): in-kernel edge replication would remove this materialized pad.
    lg_pad = jnp.pad(logits_nchw, ((0, 0), (0, 0), (1, 2), (1, 2)), mode="edge")
    dist_pad = jnp.pad(dist_maps, ((0, 0), (1, 1), (1, 1)), constant_values=MAX_DIS)
    itemsize = int(jnp.dtype(logits_nchw.dtype).itemsize)
    hw2 = (H + 2) * (W + 2)
    kl_combine, kl_max, wl_u, valid_u = pl.pallas_call(
        _fused_logits_kernel,
        out_shape=(jax.ShapeDtypeStruct((B, H, W), jnp.float32),
                   jax.ShapeDtypeStruct((B, H, W), jnp.float32),
                   jax.ShapeDtypeStruct((B, H, W), jnp.float32),
                   jax.ShapeDtypeStruct((B, H, W), jnp.float32)),
        grid=(B,),
        in_specs=[pl.BlockSpec((1, C, H + 3, W + 3), lambda b: (b, 0, 0, 0)),
                  pl.BlockSpec((1, H + 2, W + 2), lambda b: (b, 0, 0))],
        out_specs=(pl.BlockSpec((1, H, W), lambda b: (b, 0, 0)),
                   pl.BlockSpec((1, H, W), lambda b: (b, 0, 0)),
                   pl.BlockSpec((1, H, W), lambda b: (b, 0, 0)),
                   pl.BlockSpec((1, H, W), lambda b: (b, 0, 0))),
        compiler_params=cparams,
        cost_estimate=pl.CostEstimate(
            flops=int(B * (40 * C * hw2 + 120 * H * W)),
            transcendentals=int(3 * B * C * hw2),
            bytes_accessed=int(B * (C * (H + 3) * (W + 3) * itemsize
                                    + hw2 * 4 + 4 * H * W * 4))),
    )(lg_pad, dist_pad)

    # --- adaptive eps: 1.2-ladder survival counts instead of a sort-like top_k.
    #     steps(kl) = #{k >= 0 : kl > 1e-5 * 1.2**k}; count_k = #{steps > k} is the
    #     reference's per-step count (batch-global count vs per-image max_N quirk
    #     preserved); eps = 1e-5 * 1.2**k* for the first k with count_k <= max_N.
    #     (Exact ladder-boundary ties may differ from the reference by one step.) ---
    max_N = H * W * MAX_N_RATIO
    ratio = jnp.maximum(kl_combine, 0.0) * jnp.float32(1.0 / EPS0)
    inv_log12 = jnp.float32(1.0 / math.log(1.2))
    steps = jnp.where(ratio > 1.0,
                      jnp.ceil(jnp.log(jnp.maximum(ratio, 1.0)) * inv_log12),
                      0.0)
    steps = jnp.clip(steps, 0.0, float(NUM_EPS_STEPS))
    ks = jnp.arange(NUM_EPS_STEPS, dtype=jnp.float32)
    counts = jnp.sum(steps.reshape(-1, 1) > ks[None, :], axis=0)   # fused compare+reduce
    ok = counts.astype(jnp.float32) <= jnp.float32(max_N)
    k_star = jnp.where(jnp.any(ok), jnp.argmax(ok), NUM_EPS_STEPS).astype(jnp.float32)
    eps = jnp.float32(EPS0) * jnp.exp(k_star * jnp.float32(math.log(1.2)))
    pred_boundary = (kl_max > eps).astype(jnp.float32)

    # --- apply the pred_boundary mask (was kernel 3's `pb` input) and reduce ---
    num = jnp.sum(wl_u * pred_boundary)
    den = jnp.sum(valid_u * pred_boundary)
    # TODO(synk): reference returns None when pred_boundary.sum() < 1; under jit we
    # return 0.0 for that degenerate case instead of NaN.
    return jnp.where(den > 0.0, num / den, jnp.float32(0.0))


class ABL:
    """Thin stateless wrapper mirroring losses.losses.ABL.forward (default args)."""

    def __call__(self, logits, target):
        return abl_forward(logits, target)


if __name__ == "__main__":
    B, C, H, W = 2, 4, 16, 16
    key = jax.random.PRNGKey(0)
    k1, k2 = jax.random.split(key)
    logits = jax.random.normal(k1, (B, C, H, W), dtype=jnp.float32)
    # piecewise-constant label map (quadrant-style regions) -> real gt boundaries
    coarse = jax.random.randint(k2, (B, 2, 2), 0, C)
    target = jnp.repeat(jnp.repeat(coarse, H // 2, axis=1), W // 2, axis=2).astype(jnp.int32)

    loss = jax.jit(abl_forward)(logits, target)
    jax.block_until_ready(loss)
    print("KERNEL_OK")
</pallas_src>

<mosaic_0001>
module attributes {stable_mosaic.version = 11 : i64} {
  func.func @_dist_map_kernel(%arg0: i32, %arg1: memref<1x17x17xf32, #tpu.memory_space<vmem>>, %arg2: memref<1x17x17xf32, #tpu.memory_space<vmem>>, %arg3: memref<1x16x16xf32, #tpu.memory_space<vmem>>, %arg4: memref<16x16xf32, #tpu.memory_space<vmem>>) attributes {dimension_semantics = [#tpu.dimension_semantics<parallel>], iteration_bounds = array<i64: 2>, scalar_prefetch = 0 : i64, scratch_operands = 1 : i64, tpu.core_type = #tpu.core_type<tc>, window_params = [{transform_indices = @transform_0, window_bounds = array<i64: 1, 17, 17>}, {transform_indices = @transform_1, window_bounds = array<i64: 1, 17, 17>}, {transform_indices = @transform_2, window_bounds = array<i64: 1, 16, 16>}]} {
    %c0 = arith.constant 0 : index
    %c0_0 = arith.constant 0 : index
    %c0_1 = arith.constant 0 : index
    %0 = vector.load %arg1[%c0, %c0_0, %c0_1] : memref<1x17x17xf32, #tpu.memory_space<vmem>>, vector<1x17x17xf32>
    %1 = vector.shape_cast %0 : vector<1x17x17xf32> to vector<17x17xf32>
    %2 = vector.extract_strided_slice %1 {offsets = [0, 0], sizes = [16, 16], strides = [1, 1]} : vector<17x17xf32> to vector<16x16xf32>
    %3 = vector.extract_strided_slice %1 {offsets = [1, 0], sizes = [16, 16], strides = [1, 1]} : vector<17x17xf32> to vector<16x16xf32>
    %4 = arith.cmpf one, %3, %2 : vector<16x16xf32>
    %5 = vector.extract_strided_slice %1 {offsets = [0, 1], sizes = [16, 16], strides = [1, 1]} : vector<17x17xf32> to vector<16x16xf32>
    %6 = arith.cmpf one, %5, %2 : vector<16x16xf32>
    %7 = arith.ori %4, %6 : vector<16x16xi1>
    %cst = arith.constant 2.550000e+02 : f32
    %8 = vector.broadcast %cst : f32 to vector<16x16xf32>
    %9 = arith.cmpf oeq, %2, %8 : vector<16x16xf32>
    %10 = arith.ori %7, %9 : vector<16x16xi1>
    %c0_2 = arith.constant 0 : index
    %c0_3 = arith.constant 0 : index
    %c0_4 = arith.constant 0 : index
    %11 = vector.load %arg2[%c0_2, %c0_3, %c0_4] : memref<1x17x17xf32, #tpu.memory_space<vmem>>, vector<1x17x17xf32>
    %12 = vector.shape_cast %11 : vector<1x17x17xf32> to vector<17x17xf32>
    %13 = vector.extract_strided_slice %12 {offsets = [0, 0], sizes = [16, 16], strides = [1, 1]} : vector<17x17xf32> to vector<16x16xf32>
    %14 = vector.extract_strided_slice %12 {offsets = [0, 1], sizes = [16, 16], strides = [1, 1]} : vector<17x17xf32> to vector<16x16xf32>
    %15 = arith.cmpf one, %14, %13 : vector<16x16xf32>
    %16 = vector.extract_strided_slice %12 {offsets = [1, 0], sizes = [16, 16], strides = [1, 1]} : vector<17x17xf32> to vector<16x16xf32>
    %17 = arith.cmpf one, %16, %13 : vector<16x16xf32>
    %18 = arith.ori %15, %17 : vector<16x16xi1>
    %cst_5 = arith.constant 2.550000e+02 : f32
    %19 = vector.broadcast %cst_5 : f32 to vector<16x16xf32>
    %20 = arith.cmpf oeq, %13, %19 : vector<16x16xf32>
    %21 = arith.ori %18, %20 : vector<16x16xi1>
    %cst_6 = arith.constant 0.000000e+00 : f32
    %cst_7 = arith.constant 1.000000e+09 : f32
    %22 = vector.broadcast %cst_6 : f32 to vector<16x16xf32>
    %23 = vector.broadcast %cst_7 : f32 to vector<16x16xf32>
    %24 = arith.select %21, %22, %23 : vector<16x16xi1>, vector<16x16xf32>
    %c0_8 = arith.constant 0 : index
    %c0_9 = arith.constant 0 : index
    %25 = vector.load %arg4[%c0_8, %c0_9] : memref<16x16xf32, #tpu.memory_space<vmem>>, vector<16x16xf32>
    tpu.vector_store %arg4[%c0_8, %c0_9], %24 {strides = array<i32>} : memref<16x16xf32, #tpu.memory_space<vmem>>, vector<16x16xf32>,
    %26 = tpu.iota {dimensions = array<i32: 0>} : vector<16x16xi32>
    %27 = arith.sitofp %26 : vector<16x16xi32> to vector<16x16xf32>
    %28 = tpu.iota {dimensions = array<i32: 1>} : vector<16x16xi32>
    %29 = arith.sitofp %28 : vector<16x16xi32> to vector<16x16xf32>
    %30 = arith.subf %27, %29 : vector<16x16xf32>
    %31 = arith.subf %27, %29 : vector<16x16xf32>
    %32 = arith.mulf %30, %31 : vector<16x16xf32>
    %33 = tpu.iota {dimensions = array<i32: 1>} : vector<1x16xi32>
    %34 = arith.sitofp %33 : vector<1x16xi32> to vector<1x16xf32>
    %cst_10 = arith.constant 1.000000e+09 : f32
    %35 = vector.broadcast %cst_10 : f32 to vector<16x16xf32>
    %c0_11 = arith.constant 0 : index
    %c0_12 = arith.constant 0 : index
    %c0_13 = arith.constant 0 : index
    %36 = vector.load %arg3[%c0_11, %c0_12, %c0_13] : memref<1x16x16xf32, #tpu.memory_space<vmem>>, vector<1x16x16xf32>
    %37 = vector.shape_cast %36 : vector<1x16x16xf32> to vector<16x16xf32>
    %38 = vector.shape_cast %35 : vector<16x16xf32> to vector<1x16x16xf32>
    tpu.vector_store %arg3[%c0_11, %c0_12, %c0_13], %38 {strides = array<i32>} : memref<1x16x16xf32, #tpu.memory_space<vmem>>, vector<1x16x16xf32>,
    %c0_i32 = arith.constant 0 : i32
    %c1_i32 = arith.constant 1 : i32
    %39 = arith.muli %c0_i32, %c1_i32 : i32
    %c0_i32_14 = arith.constant 0 : i32
    %40 = arith.addi %c0_i32_14, %39 : i32
    %c16_i32 = arith.constant 16 : i32
    %41 = arith.muli %40, %c16_i32 : i32
    %42 = tpu.assume_multiple %41, 16 : i32
    %43 = arith.index_cast %42 : i32 to index
    %c0_15 = arith.constant 0 : index
    %44 = vector.load %arg4[%43, %c0_15] : memref<16x16xf32, #tpu.memory_space<vmem>>, vector<16x16xf32>
    %c16_i32_16 = arith.constant 16 : i32
    %45 = arith.muli %40, %c16_i32_16 : i32
    %46 = arith.sitofp %45 : i32 to f32
    %c0_17 = arith.constant 0 : index
    %c0_18 = arith.constant 0 : index
    %c0_19 = arith.constant 0 : index
    %47 = vector.load %arg3[%c0_17, %c0_18, %c0_19] : memref<1x16x16xf32, #tpu.memory_space<vmem>>, vector<1x16x16xf32>
    %48 = vector.shape_cast %47 : vector<1x16x16xf32> to vector<16x16xf32>
    %49 = vector.extract_strided_slice %44 {offsets = [0, 0], sizes = [1, 16], strides = [1, 1]} : vector<16x16xf32> to vector<1x16xf32>
    %50 = vector.broadcast %49 : vector<1x16xf32> to vector<16x16xf32>
    %51 = arith.addf %32, %50 : vector<16x16xf32>
    %cst_20 = arith.constant dense<0x7F800000> : vector<16xf32>
    %52 = vector.multi_reduction <minimumf>, %51, %cst_20 [1] : vector<16x16xf32> to vector<16xf32>
    %53 = vector.shape_cast %52 : vector<16xf32> to vector<16x1xf32>
    %cst_21 = arith.constant 0.000000e+00 : f32
    %54 = arith.addf %46, %cst_21 : f32
    %55 = vector.broadcast %54 : f32 to vector<1x16xf32>
    %56 = arith.subf %34, %55 : vector<1x16xf32>
    %57 = vector.broadcast %54 : f32 to vector<1x16xf32>
    %58 = arith.subf %34, %57 : vector<1x16xf32>
    %59 = arith.mulf %56, %58 : vector<1x16xf32>
    %60 = vector.broadcast %53 : vector<16x1xf32> to vector<16x16xf32>
    %61 = vector.broadcast %59 : vector<1x16xf32> to vector<16x16xf32>
    %62 = arith.addf %60, %61 : vector<16x16xf32>
    %63 = arith.minimumf %48, %62 : vector<16x16xf32>
    %64 = vector.extract_strided_slice %44 {offsets = [1, 0], sizes = [1, 16], strides = [1, 1]} : vector<16x16xf32> to vector<1x16xf32>
    %65 = vector.broadcast %64 : vector<1x16xf32> to vector<16x16xf32>
    %66 = arith.addf %32, %65 : vector<16x16xf32>
    %cst_22 = arith.constant dense<0x7F800000> : vector<16xf32>
    %67 = vector.multi_reduction <minimumf>, %66, %cst_22 [1] : vector<16x16xf32> to vector<16xf32>
    %68 = vector.shape_cast %67 : vector<16xf32> to vector<16x1xf32>
    %cst_23 = arith.constant 1.000000e+00 : f32
    %69 = arith.addf %46, %cst_23 : f32
    %70 = vector.broadcast %69 : f32 to vector<1x16xf32>
    %71 = arith.subf %34, %70 : vector<1x16xf32>
    %72 = vector.broadcast %69 : f32 to vector<1x16xf32>
    %73 = arith.subf %34, %72 : vector<1x16xf32>
    %74 = arith.mulf %71, %73 : vector<1x16xf32>
    %75 = vector.broadcast %68 : vector<16x1xf32> to vector<16x16xf32>
    %76 = vector.broadcast %74 : vector<1x16xf32> to vector<16x16xf32>
    %77 = arith.addf %75, %76 : vector<16x16xf32>
    %78 = arith.minimumf %63, %77 : vector<16x16xf32>
    %79 = vector.extract_strided_slice %44 {offsets = [2, 0], sizes = [1, 16], strides = [1, 1]} : vector<16x16xf32> to vector<1x16xf32>
    %80 = vector.broadcast %79 : vector<1x16xf32> to vector<16x16xf32>
    %81 = arith.addf %32, %80 : vector<16x16xf32>
    %cst_24 = arith.constant dense<0x7F800000> : vector<16xf32>
    %82 = vector.multi_reduction <minimumf>, %81, %cst_24 [1] : vector<16x16xf32> to vector<16xf32>
    %83 = vector.shape_cast %82 : vector<16xf32> to vector<16x1xf32>
    %cst_25 = arith.constant 2.000000e+00 : f32
    %84 = arith.addf %46, %cst_25 : f32
    %85 = vector.broadcast %84 : f32 to vector<1x16xf32>
    %86 = arith.subf %34, %85 : vector<1x16xf32>
    %87 = vector.broadcast %84 : f32 to vector<1x16xf32>
    %88 = arith.subf %34, %87 : vector<1x16xf32>
    %89 = arith.mulf %86, %88 : vector<1x16xf32>
    %90 = vector.broadcast %83 : vector<16x1xf32> to vector<16x16xf32>
    %91 = vector.broadcast %89 : vector<1x16xf32> to vector<16x16xf32>
    %92 = arith.addf %90, %91 : vector<16x16xf32>
    %93 = arith.minimumf %78, %92 : vector<16x16xf32>
    %94 = vector.extract_strided_slice %44 {offsets = [3, 0], sizes = [1, 16], strides = [1, 1]} : vector<16x16xf32> to vector<1x16xf32>
    %95 = vector.broadcast %94 : vector<1x16xf32> to vector<16x16xf32>
    %96 = arith.addf %32, %95 : vector<16x16xf32>
    %cst_26 = arith.constant dense<0x7F800000> : vector<16xf32>
    %97 = vector.multi_reduction <minimumf>, %96, %cst_26 [1] : vector<16x16xf32> to vector<16xf32>
    %98 = vector.shape_cast %97 : vector<16xf32> to vector<16x1xf32>
    %cst_27 = arith.constant 3.000000e+00 : f32
    %99 = arith.addf %46, %cst_27 : f32
    %100 = vector.broadcast %99 : f32 to vector<1x16xf32>
    %101 = arith.subf %34, %100 : vector<1x16xf32>
    %102 = vector.broadcast %99 : f32 to vector<1x16xf32>
    %103 = arith.subf %34, %102 : vector<1x16xf32>
    %104 = arith.mulf %101, %103 : vector<1x16xf32>
    %105 = vector.broadcast %98 : vector<16x1xf32> to vector<16x16xf32>
    %106 = vector.broadcast %104 : vector<1x16xf32> to vector<16x16xf32>
    %107 = arith.addf %105, %106 : vector<16x16xf32>
    %108 = arith.minimumf %93, %107 : vector<16x16xf32>
    %109 = vector.extract_strided_slice %44 {offsets = [4, 0], sizes = [1, 16], strides = [1, 1]} : vector<16x16xf32> to vector<1x16xf32>
    %110 = vector.broadcast %109 : vector<1x16xf32> to vector<16x16xf32>
    %111 = arith.addf %32, %110 : vector<16x16xf32>
    %cst_28 = arith.constant dense<0x7F800000> : vector<16xf32>
    %112 = vector.multi_reduction <minimumf>, %111, %cst_28 [1] : vector<16x16xf32> to vector<16xf32>
    %113 = vector.shape_cast %112 : vector<16xf32> to vector<16x1xf32>
    %cst_29 = arith.constant 4.000000e+00 : f32
    %114 = arith.addf %46, %cst_29 : f32
    %115 = vector.broadcast %114 : f32 to vector<1x16xf32>
    %116 = arith.subf %34, %115 : vector<1x16xf32>
    %117 = vector.broadcast %114 : f32 to vector<1x16xf32>
    %118 = arith.subf %34, %117 : vector<1x16xf32>
    %119 = arith.mulf %116, %118 : vector<1x16xf32>
    %120 = vector.broadcast %113 : vector<16x1xf32> to vector<16x16xf32>
    %121 = vector.broadcast %119 : vector<1x16xf32> to vector<16x16xf32>
    %122 = arith.addf %120, %121 : vector<16x16xf32>
    %123 = arith.minimumf %108, %122 : vector<16x16xf32>
    %124 = vector.extract_strided_slice %44 {offsets = [5, 0], sizes = [1, 16], strides = [1, 1]} : vector<16x16xf32> to vector<1x16xf32>
    %125 = vector.broadcast %124 : vector<1x16xf32> to vector<16x16xf32>
    %126 = arith.addf %32, %125 : vector<16x16xf32>
    %cst_30 = arith.constant dense<0x7F800000> : vector<16xf32>
    %127 = vector.multi_reduction <minimumf>, %126, %cst_30 [1] : vector<16x16xf32> to vector<16xf32>
    %128 = vector.shape_cast %127 : vector<16xf32> to vector<16x1xf32>
    %cst_31 = arith.constant 5.000000e+00 : f32
    %129 = arith.addf %46, %cst_31 : f32
    %130 = vector.broadcast %129 : f32 to vector<1x16xf32>
    %131 = arith.subf %34, %130 : vector<1x16xf32>
    %132 = vector.broadcast %129 : f32 to vector<1x16xf32>
    %133 = arith.subf %34, %132 : vector<1x16xf32>
    %134 = arith.mulf %131, %133 : vector<1x16xf32>
    %135 = vector.broadcast %128 : vector<16x1xf32> to vector<16x16xf32>
    %136 = vector.broadcast %134 : vector<1x16xf32> to vector<16x16xf32>
    %137 = arith.addf %135, %136 : vector<16x16xf32>
    %138 = arith.minimumf %123, %137 : vector<16x16xf32>
    %139 = vector.extract_strided_slice %44 {offsets = [6, 0], sizes = [1, 16], strides = [1, 1]} : vector<16x16xf32> to vector<1x16xf32>
    %140 = vector.broadcast %139 : vector<1x16xf32> to vector<16x16xf32>
    %141 = arith.addf %32, %140 : vector<16x16xf32>
    %cst_32 = arith.constant dense<0x7F800000> : vector<16xf32>
    %142 = vector.multi_reduction <minimumf>, %141, %cst_32 [1] : vector<16x16xf32> to vector<16xf32>
    %143 = vector.shape_cast %142 : vector<16xf32> to vector<16x1xf32>
    %cst_33 = arith.constant 6.000000e+00 : f32
    %144 = arith.addf %46, %cst_33 : f32
    %145 = vector.broadcast %144 : f32 to vector<1x16xf32>
    %146 = arith.subf %34, %145 : vector<1x16xf32>
    %147 = vector.broadcast %144 : f32 to vector<1x16xf32>
    %148 = arith.subf %34, %147 : vector<1x16xf32>
    %149 = arith.mulf %146, %148 : vector<1x16xf32>
    %150 = vector.broadcast %143 : vector<16x1xf32> to vector<16x16xf32>
    %151 = vector.broadcast %149 : vector<1x16xf32> to vector<16x16xf32>
    %152 = arith.addf %150, %151 : vector<16x16xf32>
    %153 = arith.minimumf %138, %152 : vector<16x16xf32>
    %154 = vector.extract_strided_slice %44 {offsets = [7, 0], sizes = [1, 16], strides = [1, 1]} : vector<16x16xf32> to vector<1x16xf32>
    %155 = vector.broadcast %154 : vector<1x16xf32> to vector<16x16xf32>
    %156 = arith.addf %32, %155 : vector<16x16xf32>
    %cst_34 = arith.constant dense<0x7F800000> : vector<16xf32>
    %157 = vector.multi_reduction <minimumf>, %156, %cst_34 [1] : vector<16x16xf32> to vector<16xf32>
    %158 = vector.shape_cast %157 : vector<16xf32> to vector<16x1xf32>
    %cst_35 = arith.constant 7.000000e+00 : f32
    %159 = arith.addf %46, %cst_35 : f32
    %160 = vector.broadcast %159 : f32 to vector<1x16xf32>
    %161 = arith.subf %34, %160 : vector<1x16xf32>
    %162 = vector.broadcast %159 : f32 to vector<1x16xf32>
    %163 = arith.subf %34, %162 : vector<1x16xf32>
    %164 = arith.mulf %161, %163 : vector<1x16xf32>
    %165 = vector.broadcast %158 : vector<16x1xf32> to vector<16x16xf32>
    %166 = vector.broadcast %164 : vector<1x16xf32> to vector<16x16xf32>
    %167 = arith.addf %165, %166 : vector<16x16xf32>
    %168 = arith.minimumf %153, %167 : vector<16x16xf32>
    %169 = vector.extract_strided_slice %44 {offsets = [8, 0], sizes = [1, 16], strides = [1, 1]} : vector<16x16xf32> to vector<1x16xf32>
    %170 = vector.broadcast %169 : vector<1x16xf32> to vector<16x16xf32>
    %171 = arith.addf %32, %170 : vector<16x16xf32>
    %cst_36 = arith.constant dense<0x7F800000> : vector<16xf32>
    %172 = vector.multi_reduction <minimumf>, %171, %cst_36 [1] : vector<16x16xf32> to vector<16xf32>
    %173 = vector.shape_cast %172 : vector<16xf32> to vector<16x1xf32>
    %cst_37 = arith.constant 8.000000e+00 : f32
    %174 = arith.addf %46, %cst_37 : f32
    %175 = vector.broadcast %174 : f32 to vector<1x16xf32>
    %176 = arith.subf %34, %175 : vector<1x16xf32>
    %177 = vector.broadcast %174 : f32 to vector<1x16xf32>
    %178 = arith.subf %34, %177 : vector<1x16xf32>
    %179 = arith.mulf %176, %178 : vector<1x16xf32>
    %180 = vector.broadcast %173 : vector<16x1xf32> to vector<16x16xf32>
    %181 = vector.broadcast %179 : vector<1x16xf32> to vector<16x16xf32>
    %182 = arith.addf %180, %181 : vector<16x16xf32>
    %183 = arith.minimumf %168, %182 : vector<16x16xf32>
    %184 = vector.extract_strided_slice %44 {offsets = [9, 0], sizes = [1, 16], strides = [1, 1]} : vector<16x16xf32> to vector<1x16xf32>
    %185 = vector.broadcast %184 : vector<1x16xf32> to vector<16x16xf32>
    %186 = arith.addf %32, %185 : vector<16x16xf32>
    %cst_38 = arith.constant dense<0x7F800000> : vector<16xf32>
    %187 = vector.multi_reduction <minimumf>, %186, %cst_38 [1] : vector<16x16xf32> to vector<16xf32>
    %188 = vector.shape_cast %187 : vector<16xf32> to vector<16x1xf32>
    %cst_39 = arith.constant 9.000000e+00 : f32
    %189 = arith.addf %46, %cst_39 : f32
    %190 = vector.broadcast %189 : f32 to vector<1x16xf32>
    %191 = arith.subf %34, %190 : vector<1x16xf32>
    %192 = vector.broadcast %189 : f32 to vector<1x16xf32>
    %193 = arith.subf %34, %192 : vector<1x16xf32>
    %194 = arith.mulf %191, %193 : vector<1x16xf32>
    %195 = vector.broadcast %188 : vector<16x1xf32> to vector<16x16xf32>
    %196 = vector.broadcast %194 : vector<1x16xf32> to vector<16x16xf32>
    %197 = arith.addf %195, %196 : vector<16x16xf32>
    %198 = arith.minimumf %183, %197 : vector<16x16xf32>
    %199 = vector.extract_strided_slice %44 {offsets = [10, 0], sizes = [1, 16], strides = [1, 1]} : vector<16x16xf32> to vector<1x16xf32>
    %200 = vector.broadcast %199 : vector<1x16xf32> to vector<16x16xf32>
    %201 = arith.addf %32, %200 : vector<16x16xf32>
    %cst_40 = arith.constant dense<0x7F800000> : vector<16xf32>
    %202 = vector.multi_reduction <minimumf>, %201, %cst_40 [1] : vector<16x16xf32> to vector<16xf32>
    %203 = vector.shape_cast %202 : vector<16xf32> to vector<16x1xf32>
    %cst_41 = arith.constant 1.000000e+01 : f32
    %204 = arith.addf %46, %cst_41 : f32
    %205 = vector.broadcast %204 : f32 to vector<1x16xf32>
    %206 = arith.subf %34, %205 : vector<1x16xf32>
    %207 = vector.broadcast %204 : f32 to vector<1x16xf32>
    %208 = arith.subf %34, %207 : vector<1x16xf32>
    %209 = arith.mulf %206, %208 : vector<1x16xf32>
    %210 = vector.broadcast %203 : vector<16x1xf32> to vector<16x16xf32>
    %211 = vector.broadcast %209 : vector<1x16xf32> to vector<16x16xf32>
    %212 = arith.addf %210, %211 : vector<16x16xf32>
    %213 = arith.minimumf %198, %212 : vector<16x16xf32>
    %214 = vector.extract_strided_slice %44 {offsets = [11, 0], sizes = [1, 16], strides = [1, 1]} : vector<16x16xf32> to vector<1x16xf32>
    %215 = vector.broadcast %214 : vector<1x16xf32> to vector<16x16xf32>
    %216 = arith.addf %32, %215 : vector<16x16xf32>
    %cst_42 = arith.constant dense<0x7F800000> : vector<16xf32>
    %217 = vector.multi_reduction <minimumf>, %216, %cst_42 [1] : vector<16x16xf32> to vector<16xf32>
    %218 = vector.shape_cast %217 : vector<16xf32> to vector<16x1xf32>
    %cst_43 = arith.constant 1.100000e+01 : f32
    %219 = arith.addf %46, %cst_43 : f32
    %220 = vector.broadcast %219 : f32 to vector<1x16xf32>
    %221 = arith.subf %34, %220 : vector<1x16xf32>
    %222 = vector.broadcast %219 : f32 to vector<1x16xf32>
    %223 = arith.subf %34, %222 : vector<1x16xf32>
    %224 = arith.mulf %221, %223 : vector<1x16xf32>
    %225 = vector.broadcast %218 : vector<16x1xf32> to vector<16x16xf32>
    %226 = vector.broadcast %224 : vector<1x16xf32> to vector<16x16xf32>
    %227 = arith.addf %225, %226 : vector<16x16xf32>
    %228 = arith.minimumf %213, %227 : vector<16x16xf32>
    %229 = vector.extract_strided_slice %44 {offsets = [12, 0], sizes = [1, 16], strides = [1, 1]} : vector<16x16xf32> to vector<1x16xf32>
    %230 = vector.broadcast %229 : vector<1x16xf32> to vector<16x16xf32>
    %231 = arith.addf %32, %230 : vector<16x16xf32>
    %cst_44 = arith.constant dense<0x7F800000> : vector<16xf32>
    %232 = vector.multi_reduction <minimumf>, %231, %cst_44 [1] : vector<16x16xf32> to vector<16xf32>
    %233 = vector.shape_cast %232 : vector<16xf32> to vector<16x1xf32>
    %cst_45 = arith.constant 1.200000e+01 : f32
    %234 = arith.addf %46, %cst_45 : f32
    %235 = vector.broadcast %234 : f32 to vector<1x16xf32>
    %236 = arith.subf %34, %235 : vector<1x16xf32>
    %237 = vector.broadcast %234 : f32 to vector<1x16xf32>
    %238 = arith.subf %34, %237 : vector<1x16xf32>
    %239 = arith.mulf %236, %238 : vector<1x16xf32>
    %240 = vector.broadcast %233 : vector<16x1xf32> to vector<16x16xf32>
    %241 = vector.broadcast %239 : vector<1x16xf32> to vector<16x16xf32>
    %242 = arith.addf %240, %241 : vector<16x16xf32>
    %243 = arith.minimumf %228, %242 : vector<16x16xf32>
    %244 = vector.extract_strided_slice %44 {offsets = [13, 0], sizes = [1, 16], strides = [1, 1]} : vector<16x16xf32> to vector<1x16xf32>
    %245 = vector.broadcast %244 : vector<1x16xf32> to vector<16x16xf32>
    %246 = arith.addf %32, %245 : vector<16x16xf32>
    %cst_46 = arith.constant dense<0x7F800000> : vector<16xf32>
    %247 = vector.multi_reduction <minimumf>, %246, %cst_46 [1] : vector<16x16xf32> to vector<16xf32>
    %248 = vector.shape_cast %247 : vector<16xf32> to vector<16x1xf32>
    %cst_47 = arith.constant 1.300000e+01 : f32
    %249 = arith.addf %46, %cst_47 : f32
    %250 = vector.broadcast %249 : f32 to vector<1x16xf32>
    %251 = arith.subf %34, %250 : vector<1x16xf32>
    %252 = vector.broadcast %249 : f32 to vector<1x16xf32>
    %253 = arith.subf %34, %252 : vector<1x16xf32>
    %254 = arith.mulf %251, %253 : vector<1x16xf32>
    %255 = vector.broadcast %248 : vector<16x1xf32> to vector<16x16xf32>
    %256 = vector.broadcast %254 : vector<1x16xf32> to vector<16x16xf32>
    %257 = arith.addf %255, %256 : vector<16x16xf32>
    %258 = arith.minimumf %243, %257 : vector<16x16xf32>
    %259 = vector.extract_strided_slice %44 {offsets = [14, 0], sizes = [1, 16], strides = [1, 1]} : vector<16x16xf32> to vector<1x16xf32>
    %260 = vector.broadcast %259 : vector<1x16xf32> to vector<16x16xf32>
    %261 = arith.addf %32, %260 : vector<16x16xf32>
    %cst_48 = arith.constant dense<0x7F800000> : vector<16xf32>
    %262 = vector.multi_reduction <minimumf>, %261, %cst_48 [1] : vector<16x16xf32> to vector<16xf32>
    %263 = vector.shape_cast %262 : vector<16xf32> to vector<16x1xf32>
    %cst_49 = arith.constant 1.400000e+01 : f32
    %264 = arith.addf %46, %cst_49 : f32
    %265 = vector.broadcast %264 : f32 to vector<1x16xf32>
    %266 = arith.subf %34, %265 : vector<1x16xf32>
    %267 = vector.broadcast %264 : f32 to vector<1x16xf32>
    %268 = arith.subf %34, %267 : vector<1x16xf32>
    %269 = arith.mulf %266, %268 : vector<1x16xf32>
    %270 = vector.broadcast %263 : vector<16x1xf32> to vector<16x16xf32>
    %271 = vector.broadcast %269 : vector<1x16xf32> to vector<16x16xf32>
    %272 = arith.addf %270, %271 : vector<16x16xf32>
    %273 = arith.minimumf %258, %272 : vector<16x16xf32>
    %274 = vector.extract_strided_slice %44 {offsets = [15, 0], sizes = [1, 16], strides = [1, 1]} : vector<16x16xf32> to vector<1x16xf32>
    %275 = vector.broadcast %274 : vector<1x16xf32> to vector<16x16xf32>
    %276 = arith.addf %32, %275 : vector<16x16xf32>
    %cst_50 = arith.constant dense<0x7F800000> : vector<16xf32>
    %277 = vector.multi_reduction <minimumf>, %276, %cst_50 [1] : vector<16x16xf32> to vector<16xf32>
    %278 = vector.shape_cast %277 : vector<16xf32> to vector<16x1xf32>
    %cst_51 = arith.constant 1.500000e+01 : f32
    %279 = arith.addf %46, %cst_51 : f32
    %280 = vector.broadcast %279 : f32 to vector<1x16xf32>
    %281 = arith.subf %34, %280 : vector<1x16xf32>
    %282 = vector.broadcast %279 : f32 to vector<1x16xf32>
    %283 = arith.subf %34, %282 : vector<1x16xf32>
    %284 = arith.mulf %281, %283 : vector<1x16xf32>
    %285 = vector.broadcast %278 : vector<16x1xf32> to vector<16x16xf32>
    %286 = vector.broadcast %284 : vector<1x16xf32> to vector<16x16xf32>
    %287 = arith.addf %285, %286 : vector<16x16xf32>
    %288 = arith.minimumf %273, %287 : vector<16x16xf32>
    %c0_52 = arith.constant 0 : index
    %c0_53 = arith.constant 0 : index
    %c0_54 = arith.constant 0 : index
    %289 = vector.load %arg3[%c0_52, %c0_53, %c0_54] : memref<1x16x16xf32, #tpu.memory_space<vmem>>, vector<1x16x16xf32>
    %290 = vector.shape_cast %289 : vector<1x16x16xf32> to vector<16x16xf32>
    %291 = vector.shape_cast %288 : vector<16x16xf32> to vector<1x16x16xf32>
    tpu.vector_store %arg3[%c0_52, %c0_53, %c0_54], %291 {strides = array<i32>} : memref<1x16x16xf32, #tpu.memory_space<vmem>>, vector<1x16x16xf32>,
    %c1_i32_55 = arith.constant 1 : i32
    %c0_56 = arith.constant 0 : index
    %c0_57 = arith.constant 0 : index
    %c0_58 = arith.constant 0 : index
    %292 = vector.load %arg3[%c0_56, %c0_57, %c0_58] : memref<1x16x16xf32, #tpu.memory_space<vmem>>, vector<1x16x16xf32>
    %293 = vector.shape_cast %292 : vector<1x16x16xf32> to vector<16x16xf32>
    %294 = math.sqrt %293 : vector<16x16xf32>
    %295 = arith.extui %10 : vector<16x16xi1> to vector<16x16xi32>
    %296 = arith.sitofp %295 : vector<16x16xi32> to vector<16x16xf32>
    %297 = vector.shape_cast %296 : vector<16x16xf32> to vector<1x16x16xf32>
    %cst_59 = arith.constant dense<0.000000e+00> : vector<1xf32>
    %298 = vector.multi_reduction <add>, %297, %cst_59 [1, 2] : vector<1x16x16xf32> to vector<1xf32>
    %299 = vector.shape_cast %298 : vector<1xf32> to vector<1x1x1xf32>
    %300 = vector.extract %299[0, 0, 0] : f32 from vector<1x1x1xf32>
    %cst_60 = arith.constant 0.000000e+00 : f32
    %301 = arith.cmpf ogt, %300, %cst_60 : f32
    %302 = arith.extui %301 : i1 to i32
    %303 = arith.sitofp %302 : i32 to f32
    %cst_61 = arith.constant 1.000000e+00 : f32
    %304 = vector.broadcast %cst_61 : f32 to vector<16x16xf32>
    %305 = arith.subf %294, %304 : vector<16x16xf32>
    %cst_62 = arith.constant 0.000000e+00 : f32
    %306 = vector.broadcast %cst_62 : f32 to vector<16x16xf32>
    %307 = arith.maximumf %305, %306 : vector<16x16xf32>
    %cst_63 = arith.constant 0.000000e+00 : f32
    %308 = vector.broadcast %cst_63 : f32 to vector<16x16xf32>
    %309 = arith.select %10, %308, %307 : vector<16x16xi1>, vector<16x16xf32>
    %310 = vector.broadcast %303 : f32 to vector<16x16xf32>
    %311 = arith.mulf %309, %310 : vector<16x16xf32>
    %c0_64 = arith.constant 0 : index
    %c0_65 = arith.constant 0 : index
    %c0_66 = arith.constant 0 : index
    %312 = vector.load %arg3[%c0_64, %c0_65, %c0_66] : memref<1x16x16xf32, #tpu.memory_space<vmem>>, vector<1x16x16xf32>
    %313 = vector.shape_cast %312 : vector<1x16x16xf32> to vector<16x16xf32>
    %314 = vector.shape_cast %311 : vector<16x16xf32> to vector<1x16x16xf32>
    tpu.vector_store %arg3[%c0_64, %c0_65, %c0_66], %314 {strides = array<i32>} : memref<1x16x16xf32, #tpu.memory_space<vmem>>, vector<1x16x16xf32>,
    return
  }
  func.func @transform_0(%arg0: i32) -> (i32, i32, i32) {
    %c0_i32 = arith.constant 0 : i32
    %c0_i32_0 = arith.constant 0 : i32
    %c0_i32_1 = arith.constant 0 : i32
    return %arg0, %c0_i32, %c0_i32_0 : i32, i32, i32
  }
  func.func @transform_1(%arg0: i32) -> (i32, i32, i32) {
    %c0_i32 = arith.constant 0 : i32
    %c0_i32_0 = arith.constant 0 : i32
    %c0_i32_1 = arith.constant 0 : i32
    return %arg0, %c0_i32, %c0_i32_0 : i32, i32, i32
  }
  func.func @transform_2(%arg0: i32) -> (i32, i32, i32) {
    %c0_i32 = arith.constant 0 : i32
    %c0_i32_0 = arith.constant 0 : i32
    %c0_i32_1 = arith.constant 0 : i32
    return %arg0, %c0_i32, %c0_i32_0 : i32, i32, i32
  }
}

module attributes {stable_mosaic.version = 11 : i64} {
  func.func @_fused_logits_kernel(%arg0: i32, %arg1: memref<1x4x19x19xf32, #tpu.memory_space<vmem>>, %arg2: memref<1x18x18xf32, #tpu.memory_space<vmem>>, %arg3: memref<1x16x16xf32, #tpu.memory_space<vmem>>, %arg4: memref<1x16x16xf32, #tpu.memory_space<vmem>>, %arg5: memref<1x16x16xf32, #tpu.memory_space<vmem>>, %arg6: memref<1x16x16xf32, #tpu.memory_space<vmem>>) attributes {dimension_semantics = [#tpu.dimension_semantics<parallel>], iteration_bounds = array<i64: 2>, scalar_prefetch = 0 : i64, scratch_operands = 0 : i64, tpu.core_type = #tpu.core_type<tc>, window_params = [{transform_indices = @transform_0, window_bounds = array<i64: 1, 4, 19, 19>}, {transform_indices = @transform_1, window_bounds = array<i64: 1, 18, 18>}, {transform_indices = @transform_2, window_bounds = array<i64: 1, 16, 16>}, {transform_indices = @transform_3, window_bounds = array<i64: 1, 16, 16>}, {transform_indices = @transform_4, window_bounds = array<i64: 1, 16, 16>}, {transform_indices = @transform_5, window_bounds = array<i64: 1, 16, 16>}]} {
    %c0 = arith.constant 0 : index
    %c0_0 = arith.constant 0 : index
    %c0_1 = arith.constant 0 : index
    %c0_2 = arith.constant 0 : index
    %0 = vector.load %arg1[%c0, %c0_0, %c0_1, %c0_2] : memref<1x4x19x19xf32, #tpu.memory_space<vmem>>, vector<1x4x19x19xf32>
    %1 = vector.shape_cast %0 : vector<1x4x19x19xf32> to vector<4x19x19xf32>
    %cst = arith.constant dense<0xFF800000> : vector<19x19xf32>
    %2 = vector.multi_reduction <maximumf>, %1, %cst [0] : vector<4x19x19xf32> to vector<19x19xf32>
    %3 = vector.shape_cast %2 : vector<19x19xf32> to vector<1x19x19xf32>
    %4 = vector.broadcast %3 : vector<1x19x19xf32> to vector<4x19x19xf32>
    %5 = arith.subf %1, %4 : vector<4x19x19xf32>
    %6 = math.exp %5 : vector<4x19x19xf32>
    %cst_3 = arith.constant dense<0.000000e+00> : vector<19x19xf32>
    %7 = vector.multi_reduction <add>, %6, %cst_3 [0] : vector<4x19x19xf32> to vector<19x19xf32>
    %8 = vector.shape_cast %7 : vector<19x19xf32> to vector<1x19x19xf32>
    %9 = math.log %8 : vector<1x19x19xf32>
    %10 = vector.broadcast %9 : vector<1x19x19xf32> to vector<4x19x19xf32>
    %11 = arith.subf %5, %10 : vector<4x19x19xf32>
    %12 = vector.extract_strided_slice %11 {offsets = [0, 0, 0], sizes = [4, 18, 18], strides = [1, 1, 1]} : vector<4x19x19xf32> to vector<4x18x18xf32>
    %13 = math.exp %12 : vector<4x18x18xf32>
    %14 = vector.extract_strided_slice %11 {offsets = [0, 0, 0], sizes = [4, 18, 18], strides = [1, 1, 1]} : vector<4x19x19xf32> to vector<4x18x18xf32>
    %15 = vector.extract_strided_slice %11 {offsets = [0, 1, 0], sizes = [4, 18, 18], strides = [1, 1, 1]} : vector<4x19x19xf32> to vector<4x18x18xf32>
    %16 = vector.extract_strided_slice %11 {offsets = [0, 0, 1], sizes = [4, 18, 18], strides = [1, 1, 1]} : vector<4x19x19xf32> to vector<4x18x18xf32>
    %cst_4 = arith.constant 2.000000e+00 : f32
    %17 = vector.broadcast %cst_4 : f32 to vector<4x18x18xf32>
    %18 = arith.mulf %17, %14 : vector<4x18x18xf32>
    %19 = arith.subf %18, %15 : vector<4x18x18xf32>
    %20 = arith.subf %19, %16 : vector<4x18x18xf32>
    %21 = arith.mulf %13, %20 : vector<4x18x18xf32>
    %cst_5 = arith.constant dense<0.000000e+00> : vector<18x18xf32>
    %22 = vector.multi_reduction <add>, %21, %cst_5 [0] : vector<4x18x18xf32> to vector<18x18xf32>
    %23 = vector.extract_strided_slice %22 {offsets = [1, 1], sizes = [16, 16], strides = [1, 1]} : vector<18x18xf32> to vector<16x16xf32>
    %c0_6 = arith.constant 0 : index
    %c0_7 = arith.constant 0 : index
    %c0_8 = arith.constant 0 : index
    %24 = vector.load %arg3[%c0_6, %c0_7, %c0_8] : memref<1x16x16xf32, #tpu.memory_space<vmem>>, vector<1x16x16xf32>
    %25 = vector.shape_cast %24 : vector<1x16x16xf32> to vector<16x16xf32>
    %26 = vector.shape_cast %23 : vector<16x16xf32> to vector<1x16x16xf32>
    tpu.vector_store %arg3[%c0_6, %c0_7, %c0_8], %26 {strides = array<i32>} : memref<1x16x16xf32, #tpu.memory_space<vmem>>, vector<1x16x16xf32>,
    %27 = vector.extract_strided_slice %22 {offsets = [0, 0], sizes = [16, 18], strides = [1, 1]} : vector<18x18xf32> to vector<16x18xf32>
    %28 = vector.extract_strided_slice %22 {offsets = [1, 0], sizes = [16, 18], strides = [1, 1]} : vector<18x18xf32> to vector<16x18xf32>
    %29 = arith.maximumf %27, %28 : vector<16x18xf32>
    %30 = vector.extract_strided_slice %22 {offsets = [2, 0], sizes = [16, 18], strides = [1, 1]} : vector<18x18xf32> to vector<16x18xf32>
    %31 = arith.maximumf %29, %30 : vector<16x18xf32>
    %32 = vector.extract_strided_slice %31 {offsets = [0, 0], sizes = [16, 16], strides = [1, 1]} : vector<16x18xf32> to vector<16x16xf32>
    %33 = vector.extract_strided_slice %31 {offsets = [0, 1], sizes = [16, 16], strides = [1, 1]} : vector<16x18xf32> to vector<16x16xf32>
    %34 = arith.maximumf %32, %33 : vector<16x16xf32>
    %35 = vector.extract_strided_slice %31 {offsets = [0, 2], sizes = [16, 16], strides = [1, 1]} : vector<16x18xf32> to vector<16x16xf32>
    %36 = arith.maximumf %34, %35 : vector<16x16xf32>
    %c0_9 = arith.constant 0 : index
    %c0_10 = arith.constant 0 : index
    %c0_11 = arith.constant 0 : index
    %37 = vector.load %arg4[%c0_9, %c0_10, %c0_11] : memref<1x16x16xf32, #tpu.memory_space<vmem>>, vector<1x16x16xf32>
    %38 = vector.shape_cast %37 : vector<1x16x16xf32> to vector<16x16xf32>
    %39 = vector.shape_cast %36 : vector<16x16xf32> to vector<1x16x16xf32>
    tpu.vector_store %arg4[%c0_9, %c0_10, %c0_11], %39 {strides = array<i32>} : memref<1x16x16xf32, #tpu.memory_space<vmem>>, vector<1x16x16xf32>,
    %c0_12 = arith.constant 0 : index
    %c0_13 = arith.constant 0 : index
    %c0_14 = arith.constant 0 : index
    %40 = vector.load %arg2[%c0_12, %c0_13, %c0_14] : memref<1x18x18xf32, #tpu.memory_space<vmem>>, vector<1x18x18xf32>
    %41 = vector.shape_cast %40 : vector<1x18x18xf32> to vector<18x18xf32>
    %42 = vector.extract_strided_slice %41 {offsets = [1, 1], sizes = [16, 16], strides = [1, 1]} : vector<18x18xf32> to vector<16x16xf32>
    %43 = vector.extract_strided_slice %41 {offsets = [2, 1], sizes = [16, 16], strides = [1, 1]} : vector<18x18xf32> to vector<16x16xf32>
    %c0_i32 = arith.constant 0 : i32
    %44 = vector.broadcast %c0_i32 : i32 to vector<16x16xi32>
    %45 = vector.extract_strided_slice %41 {offsets = [0, 1], sizes = [16, 16], strides = [1, 1]} : vector<18x18xf32> to vector<16x16xf32>
    %46 = arith.cmpf olt, %45, %43 : vector<16x16xf32>
    %47 = arith.select %46, %45, %43 : vector<16x16xi1>, vector<16x16xf32>
    %c1_i32 = arith.constant 1 : i32
    %48 = vector.broadcast %c1_i32 : i32 to vector<16x16xi32>
    %49 = arith.select %46, %48, %44 : vector<16x16xi1>, vector<16x16xi32>
    %50 = vector.extract_strided_slice %41 {offsets = [1, 0], sizes = [16, 16], strides = [1, 1]} : vector<18x18xf32> to vector<16x16xf32>
    %51 = arith.cmpf olt, %50, %47 : vector<16x16xf32>
    %52 = arith.select %51, %50, %47 : vector<16x16xi1>, vector<16x16xf32>
    %c2_i32 = arith.constant 2 : i32
    %53 = vector.broadcast %c2_i32 : i32 to vector<16x16xi32>
    %54 = arith.select %51, %53, %49 : vector<16x16xi1>, vector<16x16xi32>
    %55 = vector.extract_strided_slice %41 {offsets = [1, 2], sizes = [16, 16], strides = [1, 1]} : vector<18x18xf32> to vector<16x16xf32>
    %56 = arith.cmpf olt, %55, %52 : vector<16x16xf32>
    %57 = arith.select %56, %55, %52 : vector<16x16xi1>, vector<16x16xf32>
    %c3_i32 = arith.constant 3 : i32
    %58 = vector.broadcast %c3_i32 : i32 to vector<16x16xi32>
    %59 = arith.select %56, %58, %54 : vector<16x16xi1>, vector<16x16xi32>
    %60 = vector.extract_strided_slice %41 {offsets = [0, 2], sizes = [16, 16], strides = [1, 1]} : vector<18x18xf32> to vector<16x16xf32>
    %61 = arith.cmpf olt, %60, %57 : vector<16x16xf32>
    %62 = arith.select %61, %60, %57 : vector<16x16xi1>, vector<16x16xf32>
    %c4_i32 = arith.constant 4 : i32
    %63 = vector.broadcast %c4_i32 : i32 to vector<16x16xi32>
    %64 = arith.select %61, %63, %59 : vector<16x16xi1>, vector<16x16xi32>
    %65 = vector.extract_strided_slice %41 {offsets = [2, 2], sizes = [16, 16], strides = [1, 1]} : vector<18x18xf32> to vector<16x16xf32>
    %66 = arith.cmpf olt, %65, %62 : vector<16x16xf32>
    %67 = arith.select %66, %65, %62 : vector<16x16xi1>, vector<16x16xf32>
    %c5_i32 = arith.constant 5 : i32
    %68 = vector.broadcast %c5_i32 : i32 to vector<16x16xi32>
    %69 = arith.select %66, %68, %64 : vector<16x16xi1>, vector<16x16xi32>
    %70 = vector.extract_strided_slice %41 {offsets = [0, 0], sizes = [16, 16], strides = [1, 1]} : vector<18x18xf32> to vector<16x16xf32>
    %71 = arith.cmpf olt, %70, %67 : vector<16x16xf32>
    %72 = arith.select %71, %70, %67 : vector<16x16xi1>, vector<16x16xf32>
    %c6_i32 = arith.constant 6 : i32
    %73 = vector.broadcast %c6_i32 : i32 to vector<16x16xi32>
    %74 = arith.select %71, %73, %69 : vector<16x16xi1>, vector<16x16xi32>
    %75 = vector.extract_strided_slice %41 {offsets = [2, 0], sizes = [16, 16], strides = [1, 1]} : vector<18x18xf32> to vector<16x16xf32>
    %76 = arith.cmpf olt, %75, %72 : vector<16x16xf32>
    %77 = arith.select %76, %75, %72 : vector<16x16xi1>, vector<16x16xf32>
    %c7_i32 = arith.constant 7 : i32
    %78 = vector.broadcast %c7_i32 : i32 to vector<16x16xi32>
    %79 = arith.select %76, %78, %74 : vector<16x16xi1>, vector<16x16xi32>
    %80 = vector.extract_strided_slice %41 {offsets = [1, 1], sizes = [16, 16], strides = [1, 1]} : vector<18x18xf32> to vector<16x16xf32>
    %81 = arith.cmpf olt, %80, %77 : vector<16x16xf32>
    %c8_i32 = arith.constant 8 : i32
    %82 = vector.broadcast %c8_i32 : i32 to vector<16x16xi32>
    %83 = arith.select %81, %82, %79 : vector<16x16xi1>, vector<16x16xi32>
    %84 = arith.mulf %13, %14 : vector<4x18x18xf32>
    %cst_15 = arith.constant dense<0.000000e+00> : vector<18x18xf32>
    %85 = vector.multi_reduction <add>, %84, %cst_15 [0] : vector<4x18x18xf32> to vector<18x18xf32>
    %86 = vector.extract_strided_slice %11 {offsets = [0, 1, 1], sizes = [4, 16, 16], strides = [1, 1, 1]} : vector<4x19x19xf32> to vector<4x16x16xf32>
    %cst_16 = arith.constant 0.000000e+00 : f32
    %87 = vector.broadcast %cst_16 : f32 to vector<16x16xf32>
    %88 = vector.extract_strided_slice %13 {offsets = [0, 2, 1], sizes = [4, 16, 16], strides = [1, 1, 1]} : vector<4x18x18xf32> to vector<4x16x16xf32>
    %89 = vector.extract_strided_slice %85 {offsets = [2, 1], sizes = [16, 16], strides = [1, 1]} : vector<18x18xf32> to vector<16x16xf32>
    %90 = arith.mulf %88, %86 : vector<4x16x16xf32>
    %cst_17 = arith.constant dense<0.000000e+00> : vector<16x16xf32>
    %91 = vector.multi_reduction <add>, %90, %cst_17 [0] : vector<4x16x16xf32> to vector<16x16xf32>
    %92 = arith.subf %89, %91 : vector<16x16xf32>
    %cst_18 = arith.constant 1.000000e+00 : f32
    %93 = vector.broadcast %cst_18 : f32 to vector<16x16xf32>
    %c0_i32_19 = arith.constant 0 : i32
    %94 = vector.broadcast %c0_i32_19 : i32 to vector<16x16xi32>
    %95 = arith.cmpi eq, %83, %94 : vector<16x16xi32>
    %96 = arith.select %95, %92, %87 : vector<16x16xi1>, vector<16x16xf32>
    %97 = vector.extract_strided_slice %13 {offsets = [0, 0, 1], sizes = [4, 16, 16], strides = [1, 1, 1]} : vector<4x18x18xf32> to vector<4x16x16xf32>
    %98 = vector.extract_strided_slice %85 {offsets = [0, 1], sizes = [16, 16], strides = [1, 1]} : vector<18x18xf32> to vector<16x16xf32>
    %99 = arith.mulf %97, %86 : vector<4x16x16xf32>
    %cst_20 = arith.constant dense<0.000000e+00> : vector<16x16xf32>
    %100 = vector.multi_reduction <add>, %99, %cst_20 [0] : vector<4x16x16xf32> to vector<16x16xf32>
    %101 = arith.subf %98, %100 : vector<16x16xf32>
    %102 = arith.maximumf %92, %101 : vector<16x16xf32>
    %103 = arith.subf %92, %102 : vector<16x16xf32>
    %104 = math.exp %103 : vector<16x16xf32>
    %105 = arith.mulf %93, %104 : vector<16x16xf32>
    %106 = arith.subf %101, %102 : vector<16x16xf32>
    %107 = math.exp %106 : vector<16x16xf32>
    %108 = arith.addf %105, %107 : vector<16x16xf32>
    %109 = arith.addf %92, %101 : vector<16x16xf32>
    %c1_i32_21 = arith.constant 1 : i32
    %110 = vector.broadcast %c1_i32_21 : i32 to vector<16x16xi32>
    %111 = arith.cmpi eq, %83, %110 : vector<16x16xi32>
    %112 = arith.select %111, %101, %96 : vector<16x16xi1>, vector<16x16xf32>
    %113 = vector.extract_strided_slice %13 {offsets = [0, 1, 0], sizes = [4, 16, 16], strides = [1, 1, 1]} : vector<4x18x18xf32> to vector<4x16x16xf32>
    %114 = vector.extract_strided_slice %85 {offsets = [1, 0], sizes = [16, 16], strides = [1, 1]} : vector<18x18xf32> to vector<16x16xf32>
    %115 = arith.mulf %113, %86 : vector<4x16x16xf32>
    %cst_22 = arith.constant dense<0.000000e+00> : vector<16x16xf32>
    %116 = vector.multi_reduction <add>, %115, %cst_22 [0] : vector<4x16x16xf32> to vector<16x16xf32>
    %117 = arith.subf %114, %116 : vector<16x16xf32>
    %118 = arith.maximumf %102, %117 : vector<16x16xf32>
    %119 = arith.subf %102, %118 : vector<16x16xf32>
    %120 = math.exp %119 : vector<16x16xf32>
    %121 = arith.mulf %108, %120 : vector<16x16xf32>
    %122 = arith.subf %117, %118 : vector<16x16xf32>
    %123 = math.exp %122 : vector<16x16xf32>
    %124 = arith.addf %121, %123 : vector<16x16xf32>
    %125 = arith.addf %109, %117 : vector<16x16xf32>
    %c2_i32_23 = arith.constant 2 : i32
    %126 = vector.broadcast %c2_i32_23 : i32 to vector<16x16xi32>
    %127 = arith.cmpi eq, %83, %126 : vector<16x16xi32>
    %128 = arith.select %127, %117, %112 : vector<16x16xi1>, vector<16x16xf32>
    %129 = vector.extract_strided_slice %13 {offsets = [0, 1, 2], sizes = [4, 16, 16], strides = [1, 1, 1]} : vector<4x18x18xf32> to vector<4x16x16xf32>
    %130 = vector.extract_strided_slice %85 {offsets = [1, 2], sizes = [16, 16], strides = [1, 1]} : vector<18x18xf32> to vector<16x16xf32>
    %131 = arith.mulf %129, %86 : vector<4x16x16xf32>
    %cst_24 = arith.constant dense<0.000000e+00> : vector<16x16xf32>
    %132 = vector.multi_reduction <add>, %131, %cst_24 [0] : vector<4x16x16xf32> to vector<16x16xf32>
    %133 = arith.subf %130, %132 : vector<16x16xf32>
    %134 = arith.maximumf %118, %133 : vector<16x16xf32>
    %135 = arith.subf %118, %134 : vector<16x16xf32>
    %136 = math.exp %135 : vector<16x16xf32>
    %137 = arith.mulf %124, %136 : vector<16x16xf32>
    %138 = arith.subf %133, %134 : vector<16x16xf32>
    %139 = math.exp %138 : vector<16x16xf32>
    %140 = arith.addf %137, %139 : vector<16x16xf32>
    %141 = arith.addf %125, %133 : vector<16x16xf32>
    %c3_i32_25 = arith.constant 3 : i32
    %142 = vector.broadcast %c3_i32_25 : i32 to vector<16x16xi32>
    %143 = arith.cmpi eq, %83, %142 : vector<16x16xi32>
    %144 = arith.select %143, %133, %128 : vector<16x16xi1>, vector<16x16xf32>
    %145 = vector.extract_strided_slice %13 {offsets = [0, 0, 2], sizes = [4, 16, 16], strides = [1, 1, 1]} : vector<4x18x18xf32> to vector<4x16x16xf32>
    %146 = vector.extract_strided_slice %85 {offsets = [0, 2], sizes = [16, 16], strides = [1, 1]} : vector<18x18xf32> to vector<16x16xf32>
    %147 = arith.mulf %145, %86 : vector<4x16x16xf32>
    %cst_26 = arith.constant dense<0.000000e+00> : vector<16x16xf32>
    %148 = vector.multi_reduction <add>, %147, %cst_26 [0] : vector<4x16x16xf32> to vector<16x16xf32>
    %149 = arith.subf %146, %148 : vector<16x16xf32>
    %150 = arith.maximumf %134, %149 : vector<16x16xf32>
    %151 = arith.subf %134, %150 : vector<16x16xf32>
    %152 = math.exp %151 : vector<16x16xf32>
    %153 = arith.mulf %140, %152 : vector<16x16xf32>
    %154 = arith.subf %149, %150 : vector<16x16xf32>
    %155 = math.exp %154 : vector<16x16xf32>
    %156 = arith.addf %153, %155 : vector<16x16xf32>
    %157 = arith.addf %141, %149 : vector<16x16xf32>
    %c4_i32_27 = arith.constant 4 : i32
    %158 = vector.broadcast %c4_i32_27 : i32 to vector<16x16xi32>
    %159 = arith.cmpi eq, %83, %158 : vector<16x16xi32>
    %160 = arith.select %159, %149, %144 : vector<16x16xi1>, vector<16x16xf32>
    %161 = vector.extract_strided_slice %13 {offsets = [0, 2, 2], sizes = [4, 16, 16], strides = [1, 1, 1]} : vector<4x18x18xf32> to vector<4x16x16xf32>
    %162 = vector.extract_strided_slice %85 {offsets = [2, 2], sizes = [16, 16], strides = [1, 1]} : vector<18x18xf32> to vector<16x16xf32>
    %163 = arith.mulf %161, %86 : vector<4x16x16xf32>
    %cst_28 = arith.constant dense<0.000000e+00> : vector<16x16xf32>
    %164 = vector.multi_reduction <add>, %163, %cst_28 [0] : vector<4x16x16xf32> to vector<16x16xf32>
    %165 = arith.subf %162, %164 : vector<16x16xf32>
    %166 = arith.maximumf %150, %165 : vector<16x16xf32>
    %167 = arith.subf %150, %166 : vector<16x16xf32>
    %168 = math.exp %167 : vector<16x16xf32>
    %169 = arith.mulf %156, %168 : vector<16x16xf32>
    %170 = arith.subf %165, %166 : vector<16x16xf32>
    %171 = math.exp %170 : vector<16x16xf32>
    %172 = arith.addf %169, %171 : vector<16x16xf32>
    %173 = arith.addf %157, %165 : vector<16x16xf32>
    %c5_i32_29 = arith.constant 5 : i32
    %174 = vector.broadcast %c5_i32_29 : i32 to vector<16x16xi32>
    %175 = arith.cmpi eq, %83, %174 : vector<16x16xi32>
    %176 = arith.select %175, %165, %160 : vector<16x16xi1>, vector<16x16xf32>
    %177 = vector.extract_strided_slice %13 {offsets = [0, 0, 0], sizes = [4, 16, 16], strides = [1, 1, 1]} : vector<4x18x18xf32> to vector<4x16x16xf32>
    %178 = vector.extract_strided_slice %85 {offsets = [0, 0], sizes = [16, 16], strides = [1, 1]} : vector<18x18xf32> to vector<16x16xf32>
    %179 = arith.mulf %177, %86 : vector<4x16x16xf32>
    %cst_30 = arith.constant dense<0.000000e+00> : vector<16x16xf32>
    %180 = vector.multi_reduction <add>, %179, %cst_30 [0] : vector<4x16x16xf32> to vector<16x16xf32>
    %181 = arith.subf %178, %180 : vector<16x16xf32>
    %182 = arith.maximumf %166, %181 : vector<16x16xf32>
    %183 = arith.subf %166, %182 : vector<16x16xf32>
    %184 = math.exp %183 : vector<16x16xf32>
    %185 = arith.mulf %172, %184 : vector<16x16xf32>
    %186 = arith.subf %181, %182 : vector<16x16xf32>
    %187 = math.exp %186 : vector<16x16xf32>
    %188 = arith.addf %185, %187 : vector<16x16xf32>
    %189 = arith.addf %173, %181 : vector<16x16xf32>
    %c6_i32_31 = arith.constant 6 : i32
    %190 = vector.broadcast %c6_i32_31 : i32 to vector<16x16xi32>
    %191 = arith.cmpi eq, %83, %190 : vector<16x16xi32>
    %192 = arith.select %191, %181, %176 : vector<16x16xi1>, vector<16x16xf32>
    %193 = vector.extract_strided_slice %13 {offsets = [0, 2, 0], sizes = [4, 16, 16], strides = [1, 1, 1]} : vector<4x18x18xf32> to vector<4x16x16xf32>
    %194 = vector.extract_strided_slice %85 {offsets = [2, 0], sizes = [16, 16], strides = [1, 1]} : vector<18x18xf32> to vector<16x16xf32>
    %195 = arith.mulf %193, %86 : vector<4x16x16xf32>
    %cst_32 = arith.constant dense<0.000000e+00> : vector<16x16xf32>
    %196 = vector.multi_reduction <add>, %195, %cst_32 [0] : vector<4x16x16xf32> to vector<16x16xf32>
    %197 = arith.subf %194, %196 : vector<16x16xf32>
    %198 = arith.maximumf %182, %197 : vector<16x16xf32>
    %199 = arith.subf %182, %198 : vector<16x16xf32>
    %200 = math.exp %199 : vector<16x16xf32>
    %201 = arith.mulf %188, %200 : vector<16x16xf32>
    %202 = arith.subf %197, %198 : vector<16x16xf32>
    %203 = math.exp %202 : vector<16x16xf32>
    %204 = arith.addf %201, %203 : vector<16x16xf32>
    %205 = arith.addf %189, %197 : vector<16x16xf32>
    %c7_i32_33 = arith.constant 7 : i32
    %206 = vector.broadcast %c7_i32_33 : i32 to vector<16x16xi32>
    %207 = arith.cmpi eq, %83, %206 : vector<16x16xi32>
    %208 = arith.select %207, %197, %192 : vector<16x16xi1>, vector<16x16xf32>
    %209 = math.log %204 : vector<16x16xf32>
    %210 = arith.addf %198, %209 : vector<16x16xf32>
    %cst_34 = arith.constant 8.000000e+00 : f32
    %211 = vector.broadcast %cst_34 : f32 to vector<16x16xf32>
    %212 = arith.mulf %211, %210 : vector<16x16xf32>
    %213 = arith.subf %205, %212 : vector<16x16xf32>
    %cst_35 = arith.constant 2.500000e-02 : f32
    %214 = vector.broadcast %cst_35 : f32 to vector<16x16xf32>
    %215 = arith.mulf %214, %213 : vector<16x16xf32>
    %216 = arith.subf %208, %210 : vector<16x16xf32>
    %cst_36 = arith.constant 0.774999976 : f32
    %217 = vector.broadcast %cst_36 : f32 to vector<16x16xf32>
    %218 = arith.mulf %217, %216 : vector<16x16xf32>
    %219 = arith.addf %215, %218 : vector<16x16xf32>
    %cst_37 = arith.constant 0.000000e+00 : f32
    %220 = vector.broadcast %cst_37 : f32 to vector<16x16xf32>
    %221 = arith.subf %220, %219 : vector<16x16xf32>
    %cst_38 = arith.constant 2.000000e+01 : f32
    %222 = vector.broadcast %cst_38 : f32 to vector<16x16xf32>
    %223 = arith.minimumf %42, %222 : vector<16x16xf32>
    %cst_39 = arith.constant 5.000000e-02 : f32
    %224 = vector.broadcast %cst_39 : f32 to vector<16x16xf32>
    %225 = arith.mulf %223, %224 : vector<16x16xf32>
    %c8_i32_40 = arith.constant 8 : i32
    %226 = vector.broadcast %c8_i32_40 : i32 to vector<16x16xi32>
    %227 = arith.cmpi ne, %83, %226 : vector<16x16xi32>
    %228 = arith.extui %227 : vector<16x16xi1> to vector<16x16xi32>
    %229 = arith.sitofp %228 : vector<16x16xi32> to vector<16x16xf32>
    %230 = arith.mulf %221, %225 : vector<16x16xf32>
    %231 = arith.mulf %230, %229 : vector<16x16xf32>
    %c0_41 = arith.constant 0 : index
    %c0_42 = arith.constant 0 : index
    %c0_43 = arith.constant 0 : index
    %232 = vector.load %arg5[%c0_41, %c0_42, %c0_43] : memref<1x16x16xf32, #tpu.memory_space<vmem>>, vector<1x16x16xf32>
    %233 = vector.shape_cast %232 : vector<1x16x16xf32> to vector<16x16xf32>
    %234 = vector.shape_cast %231 : vector<16x16xf32> to vector<1x16x16xf32>
    tpu.vector_store %arg5[%c0_41, %c0_42, %c0_43], %234 {strides = array<i32>} : memref<1x16x16xf32, #tpu.memory_space<vmem>>, vector<1x16x16xf32>,
    %c0_44 = arith.constant 0 : index
    %c0_45 = arith.constant 0 : index
    %c0_46 = arith.constant 0 : index
    %235 = vector.load %arg6[%c0_44, %c0_45, %c0_46] : memref<1x16x16xf32, #tpu.memory_space<vmem>>, vector<1x16x16xf32>
    %236 = vector.shape_cast %235 : vector<1x16x16xf32> to vector<16x16xf32>
    %237 = vector.shape_cast %229 : vector<16x16xf32> to vector<1x16x16xf32>
    tpu.vector_store %arg6[%c0_44, %c0_45, %c0_46], %237 {strides = array<i32>} : memref<1x16x16xf32, #tpu.memory_space<vmem>>, vector<1x16x16xf32>,
    return
  }
  func.func @transform_0(%arg0: i32) -> (i32, i32, i32, i32) {
    %c0_i32 = arith.constant 0 : i32
    %c0_i32_0 = arith.constant 0 : i32
    %c0_i32_1 = arith.constant 0 : i32
    %c0_i32_2 = arith.constant 0 : i32
    return %arg0, %c0_i32, %c0_i32_0, %c0_i32_1 : i32, i32, i32, i32
  }
  func.func @transform_1(%arg0: i32) -> (i32, i32, i32) {
    %c0_i32 = arith.constant 0 : i32
    %c0_i32_0 = arith.constant 0 : i32
    %c0_i32_1 = arith.constant 0 : i32
    return %arg0, %c0_i32, %c0_i32_0 : i32, i32, i32
  }
  func.func @transform_2(%arg0: i32) -> (i32, i32, i32) {
    %c0_i32 = arith.constant 0 : i32
    %c0_i32_0 = arith.constant 0 : i32
    %c0_i32_1 = arith.constant 0 : i32
    return %arg0, %c0_i32, %c0_i32_0 : i32, i32, i32
  }
  func.func @transform_3(%arg0: i32) -> (i32, i32, i32) {
    %c0_i32 = arith.constant 0 : i32
    %c0_i32_0 = arith.constant 0 : i32
    %c0_i32_1 = arith.constant 0 : i32
    return %arg0, %c0_i32, %c0_i32_0 : i32, i32, i32
  }
  func.func @transform_4(%arg0: i32) -> (i32, i32, i32) {
    %c0_i32 = arith.constant 0 : i32
    %c0_i32_0 = arith.constant 0 : i32
    %c0_i32_1 = arith.constant 0 : i32
    return %arg0, %c0_i32, %c0_i32_0 : i32, i32, i32
  }
  func.func @transform_5(%arg0: i32) -> (i32, i32, i32) {
    %c0_i32 = arith.constant 0 : i32
    %c0_i32_0 = arith.constant 0 : i32
    %c0_i32_1 = arith.constant 0 : i32
    return %arg0, %c0_i32, %c0_i32_0 : i32, i32, i32
  }
}

</mosaic_0001>

<bundles_post_ra>
// kernel: gt.15
= control target key start
LH: loop header
LB: loop body
LE: loop exit
PB: predicated region body
PF: predicated region fallthrough
CT: control target
= control target key end

     0   :  { %s67_s8 = smov 112   ;;  %s68_s11 = smov 80   ;;  %vm3_vm0 = vcmask 130048   ;;  %vm9_vm1 = vcmask 1048448   ;;  %vm15_vm2 = vcmask 917248   ;;  %vm21_vm3 = vcmask 786048   ;;  %s111_s0 = inlined_call_operand.vmem [shape: f32[2,16,16], index: 0, kind: input, shape index: {}]   ;;  %s112_s1 = inlined_call_operand.vmem [shape: f32[512], index: 1, kind: output, shape index: {}]  }
   0x1   :  { %v53_v0 = vld [vmem:[%s111_s0 + $0x7] ss:$8 sm:$0xf]   ;;  %v55_v1 = vld [vmem:[%s111_s0 + $0x5] ss:$8 sm:$0xf]  }
   0x2   :  { %7 = vrot.lane.b32.xlu0 %v53_v0, %s67_s8  ;;  %19 = vrot.lane.b32.xlu1 %v55_v1, %s68_s11  ;;  %v54_v2 = vld [vmem:[%s111_s0 + $0x6] ss:$8 sm:$0xf]   ;;  %v56_v3 = vld [vmem:[%s111_s0 + $0x4] ss:$8 sm:$0xf]  }
   0x3   :  { %s69_s16 = smov 96   ;;  %v2_v4 = vld [vmem:[%s111_s0] ss:$8 sm:$0xf]   ;;  %s70_s19 = smov 64   ;;  %vm27_vm4 = vcmask 654848  }
   0x4   :  { %v57_v5 = vld [vmem:[%s111_s0 + $0x3] ss:$8 sm:$0xf]   ;;  %4 = vst.msk [vmem:[#allocation0] sm:$0xf] %vm3_vm0, %v2_v4   ;;  %s71_s24 = smov 48  }
   0x5   :  { %v58_v6 = vld [vmem:[%s111_s0 + $0x2] ss:$8 sm:$0xf]   ;;  %s72_s25 = smov 32   ;;  %vm33_vm5 = vcmask 523648   ;;  %vm39_vm6 = vcmask 392448  }
   0x6   :  { %13 = vrot.lane.b32.xlu0 %v54_v2, %s69_s16  ;;  %25 = vrot.lane.b32.xlu1 %v56_v3, %s70_s19  ;;  %v59_v7 = vld [vmem:[%s111_s0 + $0x1] ss:$8 sm:$0xf]   ;;  %s73_s0 = smov 16   ;;  %vm45_vm7 = vcmask 261248  }
   0xa   :  { %31 = vrot.lane.b32.xlu0 %v57_v5, %s71_s24  ;;  %37 = vrot.lane.b32.xlu1 %v58_v6, %s72_s25 }
   0xe   :  { %43 = vrot.lane.b32.xlu0 %v59_v7, %s73_s0 }
  0x74   :  { %v8_v8 = vpop.permute.xlu0 %7   ;;  %v20_v9 = vpop.permute.xlu1 %19  }
  0x75   :  { %10 = vst.msk [vmem:[#allocation0] sm:$0xf] %vm9_vm1, %v8_v8  }
  0x78   :  { %v14_v10 = vpop.permute.xlu0 %13   ;;  %v26_v11 = vpop.permute.xlu1 %25  }
  0x79   :  { %16 = vst.msk [vmem:[#allocation0] sm:$0xf] %vm15_vm2, %v14_v10  }
  0x7a   :  { %22 = vst.msk [vmem:[#allocation0] sm:$0xf] %vm21_vm3, %v20_v9  }
  0x7b   :  { %28 = vst.msk [vmem:[#allocation0] sm:$0xf] %vm27_vm4, %v26_v11  }
  0x7c   :  { %v32_v12 = vpop.permute.xlu0 %31   ;;  %v38_v13 = vpop.permute.xlu1 %37  }
  0x7d   :  { %34 = vst.msk [vmem:[#allocation0] sm:$0xf] %vm33_vm5, %v32_v12  }
  0x7e   :  { %40 = vst.msk [vmem:[#allocation0] sm:$0xf] %vm39_vm6, %v38_v13  }
  0x80   :  { %v44_v14 = vpop.permute.xlu0 %43  }
  0x81   :  { %46 = vst.msk [vmem:[#allocation0] sm:$0xf] %vm45_vm7, %v44_v14  }
  0x88   :  { %v50_v15 = vld [vmem:[#allocation0] sm:$0xf] }
  0x89   :  { %52 = vst [vmem:[%s112_s1] sm:$0xf] %v50_v15 }

// kernel: abl_forward.2
= control target key start
LH: loop header
LB: loop body
LE: loop exit
PB: predicated region body
PF: predicated region fallthrough
CT: control target
= control target key end

     0   :  { %s806_s9 = smov 0   ;;  %s1068_s0 = inlined_call_operand.vmem [shape: f32[2,17,17], index: 0, kind: input, shape index: {}]   ;;  %s1069_s1 = inlined_call_operand.vmem [shape: f32[2,17,17], index: 1, kind: input, shape index: {}]   ;;  %s1070_s2 = inlined_call_operand.vmem [shape: f32[2,16,16], index: 2, kind: output, shape index: {}]  }
   0x1 LB: > { %s726_s10 = sadd.s32 4294967295, %s784_s9   ;;  %p730_p0 = scmp.ge.s32.totalorder %s784_s9, 1  ;;  %s784_s9 = sphi %s806_s9, %s12_s9  }
   0x2   : > { %p122_p1 = scmp.lt.s32.totalorder %s784_s9, 3 }
   0x4   : > { %p123_p2 = pnand %p730_p0, %p122_p1 }
   0x5   : > { %p149_p3 = scmp.lt.s32.totalorder (!%p123_p2), %s726_s10, 1  ;;  %vm169_vm0 = vcmask (!%p123_p2), 1040384   ;;  %s786_s18 = smov (!%p123_p2), 1   ;;  %v787_v8 = vmov (!%p123_p2), 0   ;;  %vm242_vm5 = vcmask (!%p123_p2), 1046528   ;;  %vm278_vm8 = vcmask (!%p123_p2), 130048  }
   0x6   : > { %126 = sbr.rel (%p123_p2) target bundleno = 518 (0x206), region = 28  ;;  %v788_v22 = vmov (!%p123_p2), 1e+09   ;;  %s789_s23 = smov (!%p123_p2), 127   ;;  %v281_v38 = vlaneseq (!%p123_p2)  ;;  %v790_v55 = vmov (!%p123_p2), 0.0  }
   0x8   : > { %v862_v44 = vshrl.u32 (!%p123_p2), %v281_v38, 7  ;;  %v287_v51 = vand.u32 (!%p123_p2), 127, %v281_v38 }
   0xa   : > { %v283_v53 = vadd.s32 (!%p123_p2), 8, %v862_v44  ;;  %v284_v58 = vcvt.s32.f32 (!%p123_p2), %v862_v44  ;;  %v903_v59 = vcvt.s32.f32 (!%p123_p2), %v287_v51 }
   0xc   : > { %v285_v63 = vcvt.s32.f32 (!%p123_p2), %v283_v53 }
   0xd   : > { %s1082_s10 = smov (!%p149_p3, %s726_s10), 1 }
   0xe   : > { %s758_s11 = smul.u32 24, %s1082_s10  ;;  %s757_s19 = sshll.u32 %s1082_s10, 4 }
   0xf   : > { %s846_s22 = scalar_lea.vmem %s1070_s2, %s757_s19 }
  0x10   : > { %s820_s14 = scalar_lea.vmem %s1068_s0, %s758_s11  ;;  %s158_s17 = scalar_lea.vmem %s1069_s1, %s758_s11  ;;  %293 = vst.msk [vmem:[%s846_s22] sm:$0xff] %vm278_vm8, %v788_v22  ;;  %294 = vst.msk [vmem:[%s846_s22 + $0x8] sm:$0xff] %vm278_vm8, %v788_v22 }
  0x11   : > { %v826_v0 = vld [vmem:[%s820_s14] sm:$0xff]  ;;  %v828_v2 = vld [vmem:[%s158_s17 + $0x8] sm:$0xff]  ;;  %v219_v5 = vld [vmem:[%s158_s17 + $0x10] sm:$0x1] }
  0x12   : > { %v217_v1 = vld [vmem:[%s158_s17] sm:$0xff]  ;;  %179 = vrot.lane.b32.xlu0 %v826_v0, %s786_s18  ;;  %v231_v4 = vrot.slane %v828_v2, 7  ;;  %v833_v6 = vld [vmem:[%s820_s14 + $0x8] sm:$0xff]  ;;  %vm257_vm6 = vcmp.eq.f32.partialorder %v828_v2, 255.0  ;;  %v170_v35 = vrot.slane %v826_v0, 7 }
  0x13   : > { %222 = vrot.lane.b32.xlu1 %v217_v1, %s786_s18  ;;  %v230_v3 = vrot.slane %v217_v1, 7  ;;  %vm256_vm2 = vcmp.eq.f32.partialorder %v217_v1, 255.0  ;;  %v259_v18 = vsel %vm257_vm6, 1, %v787_v8  ;;  %vm204_vm6 = vcmp.eq.f32.partialorder %v826_v0, 255.0  ;;  %v166_v43 = vld [vmem:[%s820_s14 + $0x10] sm:$0x1] }
  0x14   : > { %vm238_vm3 = vcmp.ne.f32.partialorder %v219_v5, %v231_v4  ;;  %v258_v14 = vsel %vm256_vm2, 1, %v787_v8  ;;  %v206_v36 = vsel %vm204_vm6, 1, %v787_v8  ;;  %v171_v40 = vrot.slane %v833_v6, 7 }
  0x15   : > { %v232_v7 = vsel %vm169_vm0, %v230_v3, %v231_v4  ;;  %vm236_vm1 = vcmp.ne.f32.partialorder %v217_v1, %v230_v3  ;;  %v241_v10 = vsel %vm238_vm3, 1, %v787_v8  ;;  %v208_v39 = vrot.slane %v206_v36, 7 }
  0x16   : > { %vm237_vm4 = vcmp.ne.f32.partialorder %v828_v2, %v232_v7  ;;  %v239_v9 = vsel %vm236_vm1, 1, %v787_v8  ;;  %181 = vrot.lane.b32.xlu0 %v833_v6, %s786_s18  ;;  %v246_v15 = vrot.slane %v241_v10, 1  ;;  %v172_v47 = vsel %vm169_vm0, %v170_v35, %v171_v40 }
  0x17   : > { %v240_v11 = vsel %vm237_vm4, 1, %v787_v8  ;;  %v243_v12 = vrot.slane %v239_v9, 1  ;;  %v289_v3 = vsub.f32 %v284_v58, %v903_v59  ;;  %v301_v7 = vsub.s32 0, %v862_v44 }
  0x18   : > { %v244_v13 = vrot.slane %v240_v11, 1  ;;  %v318_v10 = vsub.s32 1, %v862_v44  ;;  %v336_v11 = vsub.s32 2, %v862_v44  ;;  %v408_v36 = vsub.s32 6, %v862_v44 }
  0x1a   : > { %v245_v16 = vsel %vm242_vm5, %v243_v12, %v244_v13  ;;  %260 = vrot.lane.b32.xlu0 %v258_v14, %s786_s18  ;;  %v247_v17 = vsel %vm242_vm5, %v244_v13, %v246_v15  ;;  %v921_v14 = vmul.f32 %v289_v3, %v289_v3 }
  0x1b   : > { %248 = vrot.lane.b32.xlu1 %v245_v16, %s786_s18  ;;  %v354_v16 = vsub.s32 3, %v862_v44 }
  0x1e   : > { %250 = vrot.lane.b32.xlu0 %v247_v17, %s786_s18 }
  0x1f   : > { %224 = vrot.lane.b32.xlu1 %v828_v2, %s786_s18 }
  0x23   : > { %262 = vrot.lane.b32.xlu1 %v259_v18, %s786_s18 }
  0x84   : > { %v180_v19 = vpop.permute.xlu0 %179 }
  0x85   : > { %vm185_vm7 = vcmp.ne.f32.partialorder %v826_v0, %v180_v19  ;;  %v223_v21 = vpop.permute.xlu1 %222 }
  0x86   : > { %v187_v20 = vsel %vm185_vm7, 1, %v787_v8  ;;  %vm228_vm10 = vcmp.ne.f32.partialorder %v217_v1, %v223_v21  ;;  %vm205_vm7 = vcmp.eq.f32.partialorder %v833_v6, 255.0 }
  0x87   : > { %v189_v23 = vrot.slane %v187_v20, 7  ;;  %v207_v37 = vsel %vm205_vm7, 1, %v787_v8 }
  0x88   : > { %v182_v24 = vpop.permute.xlu0 %181  ;;  %v209_v41 = vrot.slane %v207_v37, 7 }
  0x89   : > { %vm186_vm9 = vcmp.ne.f32.partialorder %v833_v6, %v182_v24  ;;  %192 = vrot.lane.b32.xlu0 %v189_v23, %s789_s23  ;;  %v372_v24 = vsub.s32 4, %v862_v44 }
  0x8a   : > { %v188_v25 = vsel %vm186_vm9, 1, %v787_v8  ;;  %vm176_vm9 = vcmp.ne.f32.partialorder %v826_v0, %v170_v35  ;;  %v210_v48 = vsel %vm169_vm0, %v208_v39, %v209_v41 }
  0x8b   : > { %v190_v26 = vrot.slane %v188_v25, 7  ;;  %vm212_vm6 = vcmp.ne.s32.totalorder %v210_v48, 0 }
  0x8c   : > { %v261_v28 = vpop.permute.xlu0 %260 }
  0x8d   : > { %v249_v27 = vpop.permute.xlu1 %248  ;;  %196 = vrot.lane.b32.xlu0 %v190_v26, %s789_s23  ;;  %vm264_vm12 = vcmp.ne.s32.totalorder %v261_v28, 0  ;;  %v191_v29 = vsel %vm169_vm0, %v189_v23, %v190_v26 }
  0x8e   : > { %vm252_vm11 = vcmp.ne.s32.totalorder %v249_v27, 0  ;;  %194 = vrot.lane.b32.xlu1 %v191_v29, %s789_s23 }
  0x8f   : > { %vm254_vm13 = vmor %vm228_vm10, %vm252_vm11 }
  0x90   : > { %vm266_vm14 = vmor %vm254_vm13, %vm264_vm12  ;;  %v251_v32 = vpop.permute.xlu0 %250  ;;  %vm868_vm12 = vcmp.ne.s32.totalorder %v208_v39, 0  ;;  %vm178_vm13 = vcmp.ne.f32.partialorder %v166_v43, %v171_v40 }
  0x91   : > { %v268_v30 = vsel %vm266_vm14, 0.0, %v788_v22  ;;  %v225_v31 = vpop.permute.xlu1 %224  ;;  %vm253_vm1 = vcmp.ne.s32.totalorder %v251_v32, 0  ;;  %vm874_vm14 = vcmp.ne.s32.totalorder %v209_v41, 0 }
  0x92   : > { %vm229_vm15 = vcmp.ne.f32.partialorder %v828_v2, %v225_v31  ;;  %272 = vrot.lane.b32.xlu1 %v268_v30, %s789_s23  ;;  %v390_v30 = vsub.s32 5, %v862_v44 }
  0x93   : > { %vm255_vm2 = vmor %vm229_vm15, %vm253_vm1 }
  0x95   : > { %v263_v33 = vpop.permute.xlu1 %262 }
  0x96   : > { %vm265_vm3 = vcmp.ne.s32.totalorder %v263_v33, 0 }
  0x97   : > { %vm267_vm4 = vmor %vm255_vm2, %vm265_vm3  ;;  %vm177_vm2 = vcmp.ne.f32.partialorder %v833_v6, %v172_v47  ;;  %v290_v6 = vsub.f32 %v285_v63, %v903_v59 }
  0x98   : > { %v269_v34 = vsel %vm267_vm4, 0.0, %v788_v22 }
  0x99   : > { %274 = vrot.lane.b32.xlu0 %v269_v34, %s789_s23  ;;  %v925_v17 = vmul.f32 %v290_v6, %v290_v6 }
  0xfb   : > { %v193_v42 = vpop.permute.xlu0 %192 }
  0xfc   : > { %vm198_vm10 = vcmp.ne.s32.totalorder %v193_v42, 0  ;;  %v426_v42 = vsub.s32 7, %v862_v44 }
  0xfd   : > { %vm864_vm11 = vmor %vm176_vm9, %vm198_vm10 }
  0xfe   : > { %vm214_vm15 = vmor %vm864_vm11, %vm868_vm12 }
  0xff   : > { %v197_v50 = vpop.permute.xlu0 %196  ;;  %v750_v56 = vsel %vm214_vm15, 1.0, %v790_v55 }
 0x100   : > { %vm200_vm1 = vcmp.ne.s32.totalorder %v197_v50, 0  ;;  %v195_v52 = vpop.permute.xlu1 %194  ;;  %v613_v1 = vrot.slane %v750_v56, 1 }
 0x101   : > { %vm884_vm3 = vmor %vm178_vm13, %vm200_vm1  ;;  %vm199_vm4 = vcmp.ne.s32.totalorder %v195_v52, 0  ;;  %vm654_vm1 = vcmask 130049  }
 0x102   : > { %vm216_vm7 = vmor %vm884_vm3, %vm874_vm14 }
 0x103   : > { %v752_v57 = vsel %vm216_vm7, 1.0, %v790_v55  ;;  %vm202_vm9 = vmor %vm177_vm2, %vm199_vm4 }
 0x104   : > { %v616_v60 = vrot.slane %v752_v57, 1  ;;  %vm905_vm10 = vmor %vm202_vm9, %vm212_vm6  ;;  %v273_v62 = vpop.permute.xlu1 %272  ;;  %vm657_vm6 = vcmask 122880  }
 0x105   : > { %v751_v0 = vsel %vm905_vm10, 1.0, %v790_v55  ;;  %279 = vst.msk [vmem:[#allocation2] sm:$0xff] %vm278_vm8, %v273_v62 }
 0x106   : > { %v614_v2 = vrot.slane %v751_v0, 1 }
 0x108   : > { %v615_v4 = vsel %vm242_vm5, %v613_v1, %v614_v2  ;;  %v617_v5 = vsel %vm242_vm5, %v614_v2, %v616_v60 }
 0x109   : > { %v620_v8 = vsel %vm278_vm8, %v615_v4, 0.0  ;;  %v621_v9 = vsel %vm278_vm8, %v617_v5, 0.0 }
 0x10a   : > { %v622_v12 = vadd.f32 %v621_v9, %v620_v8 }
 0x10b   : > { %v275_v13 = vpop.permute.xlu0 %274 }
 0x10c   : > { %280 = vst.msk [vmem:[#allocation2 + $0x8] sm:$0xff] %vm278_vm8, %v275_v13  ;;  %623 = vadd.xlane.f32.xlu1 %v622_v12  ;;  %v295_v15 = vld [vmem:[#allocation2] sm:$0xff] }
 0x10d   : > { %v302_v18 = vrot.slane %v295_v15, %v301_v7  ;;  %v319_v19 = vrot.slane %v295_v15, %v318_v10  ;;  %v337_v20 = vrot.slane %v295_v15, %v336_v11  ;;  %v355_v23 = vrot.slane %v295_v15, %v354_v16 }
 0x10e   : > { %v373_v29 = vrot.slane %v295_v15, %v372_v24  ;;  %v391_v35 = vrot.slane %v295_v15, %v390_v30  ;;  %v409_v41 = vrot.slane %v295_v15, %v408_v36  ;;  %v427_v51 = vrot.slane %v295_v15, %v426_v42 }
 0x10f   : > { %v303_v21 = vadd.f32 %v302_v18, %v921_v14  ;;  %v320_v22 = vadd.f32 %v319_v19, %v921_v14  ;;  %v304_v27 = vadd.f32 %v302_v18, %v925_v17  ;;  %v338_v28 = vadd.f32 %v337_v20, %v921_v14 }
 0x110   : > { %v321_v33 = vadd.f32 %v319_v19, %v925_v17  ;;  %v356_v34 = vadd.f32 %v355_v23, %v921_v14  ;;  %v339_v39 = vadd.f32 %v337_v20, %v925_v17  ;;  %v374_v40 = vadd.f32 %v373_v29, %v921_v14 }
 0x111   : > { %v305_v25 = vsel %vm278_vm8, %v303_v21, inf  ;;  %v322_v26 = vsel %vm278_vm8, %v320_v22, inf  ;;  %v308_v31 = vsel %vm278_vm8, %v304_v27, inf  ;;  %v340_v32 = vsel %vm278_vm8, %v338_v28, inf }
 0x112   : > { %306 = vmin.xlane.f32.xlu0 %v305_v25  ;;  %323 = vmin.xlane.f32.xlu1 %v322_v26  ;;  %v325_v37 = vsel %vm278_vm8, %v321_v33, inf  ;;  %v358_v38 = vsel %vm278_vm8, %v356_v34, inf  ;;  %v343_v43 = vsel %vm278_vm8, %v339_v39, inf  ;;  %v376_v47 = vsel %vm278_vm8, %v374_v40, inf }
 0x113   : > { %v357_v48 = vadd.f32 %v355_v23, %v925_v17  ;;  %v392_v50 = vadd.f32 %v391_v35, %v921_v14  ;;  %v296_v52 = vld [vmem:[#allocation2 + $0x8] sm:$0xff]  ;;  %v375_v56 = vadd.f32 %v373_v29, %v925_v17  ;;  %v410_v57 = vadd.f32 %v409_v41, %v921_v14 }
 0x114   : > { %v445_v58 = vrot.slane %v296_v52, %v301_v7  ;;  %v393_v63 = vadd.f32 %v391_v35, %v925_v17  ;;  %v428_v0 = vadd.f32 %v427_v51, %v921_v14  ;;  %v463_v2 = vrot.slane %v296_v52, %v318_v10 }
 0x115   : > { %v361_v53 = vsel %vm278_vm8, %v357_v48, inf  ;;  %v394_v55 = vsel %vm278_vm8, %v392_v50, inf  ;;  %v379_v60 = vsel %vm278_vm8, %v375_v56, inf  ;;  %v412_v62 = vsel %vm278_vm8, %v410_v57, inf }
 0x116   : > { %309 = vmin.xlane.f32.xlu0 %v308_v31  ;;  %341 = vmin.xlane.f32.xlu1 %v340_v32  ;;  %v446_v1 = vadd.f32 %v445_v58, %v921_v14  ;;  %v397_v3 = vsel %vm278_vm8, %v393_v63, inf  ;;  %v430_v4 = vsel %vm278_vm8, %v428_v0, inf  ;;  %v411_v5 = vadd.f32 %v409_v41, %v925_v17 }
 0x117   : > { %v464_v7 = vadd.f32 %v463_v2, %v921_v14  ;;  %v429_v9 = vadd.f32 %v427_v51, %v925_v17  ;;  %v481_v12 = vrot.slane %v296_v52, %v336_v11  ;;  %v447_v15 = vadd.f32 %v445_v58, %v925_v17 }
 0x118   : > { %v448_v6 = vsel %vm278_vm8, %v446_v1, inf  ;;  %v415_v8 = vsel %vm278_vm8, %v411_v5, inf  ;;  %v499_v19 = vrot.slane %v296_v52, %v354_v16  ;;  %v517_v20 = vrot.slane %v296_v52, %v372_v24 }
 0x119   : > { %v466_v10 = vsel %vm278_vm8, %v464_v7, inf  ;;  %v433_v13 = vsel %vm278_vm8, %v429_v9, inf  ;;  %v482_v18 = vadd.f32 %v481_v12, %v921_v14  ;;  %v451_v11 = vsel %vm278_vm8, %v447_v15, inf }
 0x11a   : > { %326 = vmin.xlane.f32.xlu0 %v325_v37  ;;  %359 = vmin.xlane.f32.xlu1 %v358_v38  ;;  %v465_v22 = vadd.f32 %v463_v2, %v925_v17  ;;  %v500_v23 = vadd.f32 %v499_v19, %v921_v14  ;;  %v535_v25 = vrot.slane %v296_v52, %v390_v30  ;;  %v737_v15 = vadd.f32 -3.0, %v903_v59 }
 0x11b   : > { %v484_v21 = vsel %vm278_vm8, %v482_v18, inf  ;;  %v483_v27 = vadd.f32 %v481_v12, %v925_v17  ;;  %v518_v24 = vadd.f32 %v517_v20, %v921_v14  ;;  %v501_v28 = vadd.f32 %v499_v19, %v925_v17 }
 0x11c   : > { %v469_v16 = vsel %vm278_vm8, %v465_v22, inf  ;;  %v502_v26 = vsel %vm278_vm8, %v500_v23, inf  ;;  %v536_v32 = vadd.f32 %v535_v25, %v921_v14  ;;  %v553_v30 = vrot.slane %v296_v52, %v408_v36 }
 0x11d   : > { %v487_v29 = vsel %vm278_vm8, %v483_v27, inf  ;;  %v520_v31 = vsel %vm278_vm8, %v518_v24, inf  ;;  %v505_v33 = vsel %vm278_vm8, %v501_v28, inf  ;;  %v519_v35 = vadd.f32 %v517_v20, %v925_v17 }
 0x11e   : > { %344 = vmin.xlane.f32.xlu0 %v343_v43  ;;  %377 = vmin.xlane.f32.xlu1 %v376_v47  ;;  %v538_v34 = vsel %vm278_vm8, %v536_v32, inf  ;;  %v554_v37 = vadd.f32 %v553_v30, %v921_v14  ;;  %v571_v38 = vrot.slane %v296_v52, %v426_v42  ;;  %v537_v36 = vadd.f32 %v535_v25, %v925_v17 }
 0x11f   : > { %v523_v39 = vsel %vm278_vm8, %v519_v35, inf  ;;  %v555_v48 = vadd.f32 %v553_v30, %v925_v17  ;;  %v311_v5 = vmul.f32 %v903_v59, %v903_v59  ;;  %v736_v12 = vadd.f32 -2.0, %v903_v59 }
 0x120   : > { %v556_v40 = vsel %vm278_vm8, %v554_v37, inf  ;;  %v572_v41 = vadd.f32 %v571_v38, %v921_v14  ;;  %v541_v43 = vsel %vm278_vm8, %v537_v36, inf  ;;  %v573_v42 = vadd.f32 %v571_v38, %v925_v17  ;;  %v298_v36 = vld [vmem:[%s846_s22 + $0x8] sm:$0xff] }
 0x121   : > { %v559_v44 = vsel %vm278_vm8, %v555_v48, inf  ;;  %v365_v23 = vmul.f32 %v737_v15, %v737_v15  ;;  %v739_v25 = vadd.f32 -5.0, %v903_v59  ;;  %v741_v30 = vadd.f32 -7.0, %v903_v59 }
 0x122   : > { %362 = vmin.xlane.f32.xlu0 %v361_v53  ;;  %395 = vmin.xlane.f32.xlu1 %v394_v55  ;;  %v574_v47 = vsel %vm278_vm8, %v572_v41, inf  ;;  %v577_v50 = vsel %vm278_vm8, %v573_v42, inf  ;;  %v743_v41 = vadd.f32 -9.0, %v903_v59 }
 0x123   : > { %v401_v32 = vmul.f32 %v739_v25, %v739_v25 }
 0x126   : > { %380 = vmin.xlane.f32.xlu0 %v379_v60  ;;  %413 = vmin.xlane.f32.xlu1 %v412_v62 }
 0x12a   : > { %398 = vmin.xlane.f32.xlu0 %v397_v3  ;;  %431 = vmin.xlane.f32.xlu1 %v430_v4 }
 0x12e   : > { %416 = vmin.xlane.f32.xlu0 %v415_v8  ;;  %449 = vmin.xlane.f32.xlu1 %v448_v6  ;;  %v735_v6 = vadd.f32 -1.0, %v903_v59 }
 0x132   : > { %434 = vmin.xlane.f32.xlu0 %v433_v13  ;;  %467 = vmin.xlane.f32.xlu1 %v466_v10  ;;  %v297_v10 = vld [vmem:[%s846_s22] sm:$0xff]  ;;  %v329_v13 = vmul.f32 %v735_v6, %v735_v6 }
 0x136   : > { %452 = vmin.xlane.f32.xlu0 %v451_v11  ;;  %485 = vmin.xlane.f32.xlu1 %v484_v21  ;;  %v347_v11 = vmul.f32 %v736_v12, %v736_v12  ;;  %v738_v21 = vadd.f32 -4.0, %v903_v59 }
 0x138   : > { %v383_v28 = vmul.f32 %v738_v21, %v738_v21 }
 0x13a   : > { %470 = vmin.xlane.f32.xlu0 %v469_v16  ;;  %503 = vmin.xlane.f32.xlu1 %v502_v26 }
 0x13e   : > { %488 = vmin.xlane.f32.xlu0 %v487_v29  ;;  %521 = vmin.xlane.f32.xlu1 %v520_v31  ;;  %v740_v29 = vadd.f32 -6.0, %v903_v59 }
 0x142   : > { %506 = vmin.xlane.f32.xlu0 %v505_v33  ;;  %539 = vmin.xlane.f32.xlu1 %v538_v34  ;;  %v742_v33 = vadd.f32 -8.0, %v903_v59 }
 0x144   : > { %v455_v42 = vmul.f32 %v742_v33, %v742_v33 }
 0x146   : > { %524 = vmin.xlane.f32.xlu0 %v523_v39  ;;  %557 = vmin.xlane.f32.xlu1 %v556_v40  ;;  %v419_v40 = vmul.f32 %v740_v29, %v740_v29 }
 0x14a   : > { %542 = vmin.xlane.f32.xlu0 %v541_v43  ;;  %575 = vmin.xlane.f32.xlu1 %v574_v47 }
 0x14e   : > { %560 = vmin.xlane.f32.xlu0 %v559_v44  ;;  %v437_v44 = vmul.f32 %v741_v30, %v741_v30 }
 0x152   : > { %578 = vmin.xlane.f32.xlu0 %v577_v50 }
 0x199   : > { %v624_v51 = vpop.xlane.xlu1 %623 }
 0x19a   : > { %v625_v14 = vrot.slane %v624_v51, 4 }
 0x19c   : > { %v626_v52 = vadd.f32 %v625_v14, %v624_v51  ;;  %v744_v51 = vadd.f32 -10.0, %v903_v59 }
 0x19e   : > { %v627_v53 = vrot.slane %v626_v52, 2 }
 0x19f   : > { %v307_v55 = vpop.xlane.xlu0 %306  ;;  %v324_v56 = vpop.xlane.xlu1 %323 }
 0x1a0   : > { %v628_v57 = vadd.f32 %v627_v53, %v626_v52  ;;  %v312_v9 = vadd.f32 %v311_v5, %v307_v55  ;;  %v330_v22 = vadd.f32 %v329_v13, %v324_v56 }
 0x1a2   : > { %v629_v58 = vrot.slane %v628_v57, 1  ;;  %v314_v20 = vmin.f32 %v297_v10, %v312_v9 }
 0x1a3   : > { %v310_v60 = vpop.xlane.xlu0 %309  ;;  %v342_v62 = vpop.xlane.xlu1 %341 }
 0x1a4   : > { %v630_v63 = vadd.f32 %v629_v58, %v628_v57  ;;  %v332_v27 = vmin.f32 %v314_v20, %v330_v22  ;;  %v348_v24 = vadd.f32 %v347_v11, %v342_v62  ;;  %v313_v37 = vadd.f32 %v311_v5, %v310_v60 }
 0x1a5   : > { %v473_v57 = vmul.f32 %v743_v41, %v743_v41  ;;  %v745_v58 = vadd.f32 -11.0, %v903_v59  ;;  %v746_v5 = vadd.f32 -12.0, %v903_v59 }
 0x1a6   : > { %759 = vpush %v630_v63  ;;  %v350_v38 = vmin.f32 %v332_v27, %v348_v24  ;;  %v315_v52 = vmin.f32 %v298_v36, %v313_v37 }
 0x1a7   : > { %v327_v0 = vpop.xlane.xlu0 %326  ;;  %v360_v1 = vpop.xlane.xlu1 %359 }
 0x1a8   : > { %v366_v31 = vadd.f32 %v365_v23, %v360_v1  ;;  %v331_v43 = vadd.f32 %v329_v13, %v327_v0  ;;  %v491_v0 = vmul.f32 %v744_v51, %v744_v51  ;;  %v509_v13 = vmul.f32 %v745_v58, %v745_v58 }
 0x1aa   : > { %v368_v47 = vmin.f32 %v350_v38, %v366_v31  ;;  %v333_v60 = vmin.f32 %v315_v52, %v331_v43 }
 0x1ab   : > { %v345_v17 = vpop.xlane.xlu0 %344  ;;  %v378_v2 = vpop.xlane.xlu1 %377 }
 0x1ac   : > { %v384_v39 = vadd.f32 %v383_v28, %v378_v2  ;;  %v349_v53 = vadd.f32 %v347_v11, %v345_v17  ;;  %v747_v17 = vadd.f32 -13.0, %v903_v59 }
 0x1ae   : > { %v386_v55 = vmin.f32 %v368_v47, %v384_v39  ;;  %v351_v6 = vmin.f32 %v333_v60, %v349_v53  ;;  %v545_v29 = vmul.f32 %v747_v17, %v747_v17 }
 0x1af   : > { %v363_v3 = vpop.xlane.xlu0 %362  ;;  %v396_v4 = vpop.xlane.xlu1 %395 }
 0x1b0   : > { %v402_v48 = vadd.f32 %v401_v32, %v396_v4  ;;  %v367_v62 = vadd.f32 %v365_v23, %v363_v3  ;;  %v527_v3 = vmul.f32 %v746_v5, %v746_v5 }
 0x1b2   : > { %v404_v63 = vmin.f32 %v386_v55, %v402_v48 }
 0x1b3   : > { %v381_v7 = vpop.xlane.xlu0 %380  ;;  %v414_v8 = vpop.xlane.xlu1 %413 }
 0x1b4   : > { %v420_v56 = vadd.f32 %v419_v40, %v414_v8  ;;  %v385_v9 = vadd.f32 %v383_v28, %v381_v7  ;;  %v369_v8 = vmin.f32 %v351_v6, %v367_v62 }
 0x1b6   : > { %v422_v12 = vmin.f32 %v404_v63, %v420_v56  ;;  %v387_v23 = vmin.f32 %v369_v8, %v385_v9 }
 0x1b7   : > { %v399_v18 = vpop.xlane.xlu0 %398  ;;  %v432_v19 = vpop.xlane.xlu1 %431 }
 0x1b8   : > { %v438_v1 = vadd.f32 %v437_v44, %v432_v19  ;;  %v403_v15 = vadd.f32 %v401_v32, %v399_v18  ;;  %v748_v19 = vadd.f32 -14.0, %v903_v59  ;;  %v749_v18 = vadd.f32 -15.0, %v903_v59 }
 0x1ba   : > { %v440_v20 = vmin.f32 %v422_v12, %v438_v1  ;;  %v405_v7 = vmin.f32 %v387_v23, %v403_v15  ;;  %v563_v37 = vmul.f32 %v748_v19, %v748_v19  ;;  %v581_v48 = vmul.f32 %v749_v18, %v749_v18 }
 0x1bb   : > { %v417_v16 = vpop.xlane.xlu0 %416  ;;  %v450_v26 = vpop.xlane.xlu1 %449 }
 0x1bc   : > { %v456_v10 = vadd.f32 %v455_v42, %v450_v26  ;;  %v421_v25 = vadd.f32 %v419_v40, %v417_v16 }
 0x1be   : > { %v458_v27 = vmin.f32 %v440_v20, %v456_v10  ;;  %v423_v32 = vmin.f32 %v405_v7, %v421_v25 }
 0x1bf   : > { %v435_v34 = vpop.xlane.xlu0 %434  ;;  %v468_v35 = vpop.xlane.xlu1 %467 }
 0x1c0   : > { %v474_v11 = vadd.f32 %v473_v57, %v468_v35  ;;  %v439_v28 = vadd.f32 %v437_v44, %v435_v34 }
 0x1c2   : > { %v476_v26 = vmin.f32 %v458_v27, %v474_v11  ;;  %v441_v36 = vmin.f32 %v423_v32, %v439_v28 }
 0x1c3   : > { %v453_v50 = vpop.xlane.xlu0 %452  ;;  %v486_v14 = vpop.xlane.xlu1 %485 }
 0x1c4   : > { %v492_v24 = vadd.f32 %v491_v0, %v486_v14  ;;  %v457_v35 = vadd.f32 %v455_v42, %v453_v50 }
 0x1c6   : > { %v494_v38 = vmin.f32 %v476_v26, %v492_v24  ;;  %v459_v51 = vmin.f32 %v441_v36, %v457_v35 }
 0x1c7   : > { %v471_v2 = vpop.xlane.xlu0 %470  ;;  %v504_v4 = vpop.xlane.xlu1 %503 }
 0x1c8   : > { %v510_v31 = vadd.f32 %v509_v13, %v504_v4  ;;  %v475_v41 = vadd.f32 %v473_v57, %v471_v2 }
 0x1ca   : > { %v512_v43 = vmin.f32 %v494_v38, %v510_v31  ;;  %v477_v52 = vmin.f32 %v459_v51, %v475_v41 }
 0x1cb   : > { %v489_v21 = vpop.xlane.xlu0 %488  ;;  %v522_v22 = vpop.xlane.xlu1 %521 }
 0x1cc   : > { %v528_v39 = vadd.f32 %v527_v3, %v522_v22  ;;  %v493_v34 = vadd.f32 %v491_v0, %v489_v21 }
 0x1ce   : > { %v530_v44 = vmin.f32 %v512_v43, %v528_v39  ;;  %v495_v42 = vmin.f32 %v477_v52, %v493_v34 }
 0x1cf   : > { %v507_v30 = vpop.xlane.xlu0 %506  ;;  %v540_v33 = vpop.xlane.xlu1 %539 }
 0x1d0   : > { %v546_v16 = vadd.f32 %v545_v29, %v540_v33  ;;  %v511_v53 = vadd.f32 %v509_v13, %v507_v30 }
 0x1d2   : > { %v548_v55 = vmin.f32 %v530_v44, %v546_v16  ;;  %v513_v60 = vmin.f32 %v495_v42, %v511_v53 }
 0x1d3   : > { %v525_v40 = vpop.xlane.xlu0 %524  ;;  %v558_v47 = vpop.xlane.xlu1 %557 }
 0x1d4   : > { %v564_v14 = vadd.f32 %v563_v37, %v558_v47  ;;  %v529_v50 = vadd.f32 %v527_v3, %v525_v40 }
 0x1d6   : > { %v566_v58 = vmin.f32 %v548_v55, %v564_v14  ;;  %v531_v0 = vmin.f32 %v513_v60, %v529_v50 }
 0x1d7   : > { %v543_v59 = vpop.xlane.xlu0 %542  ;;  %v576_v56 = vpop.xlane.xlu1 %575  ;;  %s760_s24 = spop %759 }
 0x1d8   : > { %v582_v57 = vadd.f32 %v581_v48, %v576_v56  ;;  %v547_v62 = vadd.f32 %v545_v29, %v543_v59  ;;  %p632_p4 = scmp.gt.f32.partialorder %s760_s24, 0.0 }
 0x1da   : > { %v584_v63 = vmin.f32 %v566_v58, %v582_v57  ;;  %v549_v4 = vmin.f32 %v531_v0, %v547_v62  ;;  %s633_s25 = scalar_select %p632_p4, 1, 0 }
 0x1db   : > { %v561_v1 = vpop.xlane.xlu0 %560 }
 0x1dc   : > { %586 = vst.msk [vmem:[%s846_s22] sm:$0xff] %vm278_vm8, %v584_v63  ;;  %v565_v2 = vadd.f32 %v563_v37, %v561_v1  ;;  %s634_s26 = scvt.s32.f32 %s633_s25 }
 0x1de   : > { %v567_v6 = vmin.f32 %v549_v4, %v565_v2  ;;  %v650_v27 = vstv %s634_s26 }
 0x1df   : > { %v579_v5 = vpop.xlane.xlu0 %578 }
 0x1e0   : > { %v583_v9 = vadd.f32 %v581_v48, %v579_v5 }
 0x1e2   : > { %v585_v12 = vmin.f32 %v567_v6, %v583_v9 }
 0x1e3   : > { %v588_v10 = vld [vmem:[%s846_s22] sm:$0xff] }
 0x1e4   : > { %774 = vrsqrt.f32 %v588_v10  ;;  %587 = vst.msk [vmem:[%s846_s22 + $0x8] sm:$0xff] %vm278_vm8, %v585_v12  ;;  %vm592_vm5 = vcmp.eq.f32.partialorder %v588_v10, inf  ;;  %v595_v15 = vand.u32 2147483648, %v588_v10  ;;  %vm594_vm13 = vcmp.eq.f32.partialorder %v588_v10, 0.0 }
 0x1eb   : > { %v589_v13 = vld [vmem:[%s846_s22 + $0x8] sm:$0xff] }
 0x1ec   : > { %776 = vrsqrt.f32 %v589_v13  ;;  %vm599_vm2 = vcmp.eq.f32.partialorder %v589_v13, inf  ;;  %v602_v25 = vand.u32 2147483648, %v589_v13  ;;  %vm601_vm4 = vcmp.eq.f32.partialorder %v589_v13, 0.0 }
 0x1ee   : > { %v775_v17 = vpop.eup %774 }
 0x1ef   : > { %v591_v8 = vmul.f32 %v775_v17, %v588_v10 }
 0x1f1   : > { %v593_v20 = vsel %vm592_vm5, %v588_v10, %v591_v8 }
 0x1f2   : > { %v596_v11 = vsel %vm594_vm13, %v595_v15, %v593_v20 }
 0x1f3   : > { %v753_v21 = vadd.f32 -1.0, %v596_v11 }
 0x1f5   : > { %v637_v3 = vmax.f32 %v753_v21, 0.0 }
 0x1f6   : > { %v777_v22 = vpop.eup %776 }
 0x1f7   : > { %v641_v19 = vrot.slane %v637_v3, 7  ;;  %v598_v23 = vmul.f32 %v777_v22, %v589_v13 }
 0x1f9   : > { %v647_v24 = vsel %vm214_vm15, 0.0, %v641_v19  ;;  %v600_v29 = vsel %vm599_vm2, %v589_v13, %v598_v23 }
 0x1fa   : > { %v651_v7 = vmul.f32 %v650_v27, %v647_v24  ;;  %v603_v28 = vsel %vm601_vm4, %v602_v25, %v600_v29 }
 0x1fb   : > { %v754_v26 = vadd.f32 -1.0, %v603_v28 }
 0x1fc   : > { %655 = vst.msk [vmem:[%s846_s22 - $0x1] sm:$0xfe] %vm654_vm1, %v651_v7 }
 0x1fd   : > { %v638_v31 = vmax.f32 %v754_v26, 0.0 }
 0x1ff   : > { %v642_v30 = vrot.slane %v638_v31, 7 }
 0x201   : > { %v643_v33 = vsel %vm169_vm0, %v641_v19, %v642_v30  ;;  %v649_v45 = vsel %vm216_vm7, 0.0, %v642_v30 }
 0x202   : > { %v648_v46 = vsel %vm905_vm10, 0.0, %v643_v33  ;;  %v653_v37 = vmul.f32 %v650_v27, %v649_v45 }
 0x203   : > { %v652_v18 = vmul.f32 %v650_v27, %v648_v46 }
 0x204   : > { %658 = vst.msk [vmem:[%s846_s22 + $0xf] sm:$0x1] %vm657_vm6, %v653_v37 }
 0x205   : > { %656 = vst.msk [vmem:[%s846_s22 + $0x7] sm:$0xff] %vm278_vm8, %v652_v18 }
 0x206 PF: > { %s12_s9 = sadd.s32 1, %s784_s9  }
 0x207   : > { %p9_p5 = scmp.ge.s32.totalorder %s12_s9, 4  }
 0x209   :  { %11 = sbr.rel (!%p9_p5) target bundleno = 1 (0x1), region = 61 }

// kernel: abl_forward.3
= control target key start
LH: loop header
LB: loop body
LE: loop exit
PB: predicated region body
PF: predicated region fallthrough
CT: control target
= control target key end

     0   :  { %s2447_s18 = smov 0   ;;  %s3983_s0 = inlined_call_operand.vmem [shape: f32[2,4,19,19], index: 0, kind: input, shape index: {}]   ;;  %s3984_s1 = inlined_call_operand.vmem [shape: f32[2,18,18], index: 1, kind: input, shape index: {}]   ;;  %s3985_s2 = inlined_call_operand.vmem [shape: f32[2,16,16], index: 2, kind: output, shape index: {0}]   ;;  %s3986_s3 = inlined_call_operand.vmem [shape: f32[2,16,16], index: 3, kind: output, shape index: {1}]   ;;  %s3987_s4 = inlined_call_operand.vmem [shape: f32[2,16,16], index: 4, kind: output, shape index: {2}]   ;;  %s3988_s5 = inlined_call_operand.vmem [shape: f32[2,16,16], index: 5, kind: output, shape index: {3}]  }
   0x1 LB: > { %s2217_s19 = sadd.s32 4294967295, %s2409_s18   ;;  %p2221_p0 = scmp.ge.s32.totalorder %s2409_s18, 1  ;;  %s2409_s18 = sphi %s2447_s18, %s16_s18  }
   0x2   : > { %p204_p1 = scmp.lt.s32.totalorder %s2409_s18, 3 }
   0x4   : > { %p205_p2 = pnand %p2221_p0, %p204_p1 }
   0x6   : > { %208 = sbr.rel (%p205_p2) target bundleno = 899 (0x383), region = 28 }
   0xd   : > { %p252_p3 = scmp.lt.s32.totalorder %s2217_s19, 1  ;;  %vm309_vm0 = vcmask 149504   ;;  %vm294_vm1 = vcmask 154624   ;;  %s2411_s24 = smov 127   ;;  %vm440_vm2 = vcmask 1046528   ;;  %vm914_vm3 = vcmask 138248  }
   0xe   : > { %vm545_vm4 = vcmask 146432   ;;  %vm646_vm5 = vcmask 1040384   ;;  %s2412_s25 = smov 1   ;;  %vm560_vm6 = vcmask 140288   ;;  %vm595_vm7 = vcmask 1045504   ;;  %s2414_s30 = smov 2  }
   0xf   : > { %s4109_s19 = smov (!%p252_p3, %s2217_s19), 1  ;;  %vm4029_vm10 = vcmask 122880   ;;  %vm580_vm11 = vcmask 130049   ;;  %vm582_vm12 = vcmask 130048   ;;  %vm1216_vm13 = vcmask 146449   ;;  %s2415_s6 = smov 126  }
  0x10   : > { %s2241_s20 = smul.u32 96, %s4109_s19  ;;  %vm1224_vm14 = vcmask 146448   ;;  %vm1232_vm15 = vcmask 139280   ;;  %s3922_s7 = sshll.u32 %s4109_s19, 4 }
  0x11   : > { %s2242_s26 = smul.u32 24, %s4109_s19  ;;  %s271_s10 = scalar_lea.vmem %s3986_s3, %s3922_s7 }
  0x12   : > { %s256_s23 = scalar_lea.vmem %s3983_s0, %s2241_s20  ;;  %s266_s13 = scalar_lea.vmem %s3985_s2, %s3922_s7 }
  0x13   : > { %v284_v0 = vld [vmem:[%s256_s23 + $0x10] sm:$0x7]  ;;  %v287_v1 = vld [vmem:[%s256_s23 + $0x28] sm:$0x7]  ;;  %v290_v2 = vld [vmem:[%s256_s23 + $0x40] sm:$0x7]  ;;  %s2915_s29 = scalar_lea.vmem %s3984_s1, %s2242_s26  ;;  %s276_s16 = scalar_lea.vmem %s3987_s4, %s3922_s7 }
  0x14   : > { %v293_v3 = vld [vmem:[%s256_s23 + $0x58] sm:$0x7]  ;;  %v310_v4 = vsel %vm309_vm0, %v284_v0, -inf  ;;  %v311_v5 = vsel %vm309_vm0, %v287_v1, -inf  ;;  %v312_v6 = vsel %vm309_vm0, %v290_v2, -inf  ;;  %v282_v9 = vld [vmem:[%s256_s23] sm:$0xff]  ;;  %s281_s20 = scalar_lea.vmem %s3988_s5, %s3922_s7 }
  0x15   : > { %v313_v7 = vmax.f32 %v310_v4, %v312_v6  ;;  %v314_v8 = vsel %vm309_vm0, %v293_v3, -inf  ;;  %v285_v10 = vld [vmem:[%s256_s23 + $0x18] sm:$0xff]  ;;  %v288_v12 = vld [vmem:[%s256_s23 + $0x30] sm:$0xff]  ;;  %v291_v13 = vld [vmem:[%s256_s23 + $0x48] sm:$0xff]  ;;  %v295_v14 = vsel %vm294_vm1, %v282_v9, -inf }
  0x16   : > { %v315_v11 = vmax.f32 %v311_v5, %v314_v8  ;;  %v296_v15 = vsel %vm294_vm1, %v285_v10, -inf  ;;  %v283_v16 = vld [vmem:[%s256_s23 + $0x8] sm:$0xff]  ;;  %v297_v17 = vsel %vm294_vm1, %v288_v12, -inf  ;;  %v299_v18 = vsel %vm294_vm1, %v291_v13, -inf  ;;  %v286_v19 = vld [vmem:[%s256_s23 + $0x20] sm:$0xff]  ;;  %v289_v20 = vld [vmem:[%s256_s23 + $0x38] sm:$0xff] }
  0x17   : > { %v292_v21 = vld [vmem:[%s256_s23 + $0x50] sm:$0xff]  ;;  %v302_v22 = vsel %vm294_vm1, %v283_v16, -inf  ;;  %v298_v24 = vmax.f32 %v295_v14, %v297_v17  ;;  %v300_v25 = vmax.f32 %v296_v15, %v299_v18  ;;  %v303_v26 = vsel %vm294_vm1, %v286_v19, -inf }
  0x18   : > { %v316_v23 = vmax.f32 %v313_v7, %v315_v11  ;;  %v304_v27 = vsel %vm294_vm1, %v289_v20, -inf  ;;  %v306_v28 = vsel %vm294_vm1, %v292_v21, -inf }
  0x19   : > { %v301_v33 = vmax.f32 %v298_v24, %v300_v25  ;;  %v305_v34 = vmax.f32 %v302_v22, %v304_v27  ;;  %v307_v35 = vmax.f32 %v303_v26, %v306_v28 }
  0x1a   : > { %v2473_v29 = vsub.f32 %v284_v0, %v316_v23  ;;  %v2475_v30 = vsub.f32 %v287_v1, %v316_v23  ;;  %v2477_v31 = vsub.f32 %v290_v2, %v316_v23  ;;  %v2479_v32 = vsub.f32 %v293_v3, %v316_v23 }
  0x1b   : > { %v2485_v40 = vsub.f32 %v282_v9, %v301_v33  ;;  %v2487_v41 = vsub.f32 %v285_v10, %v301_v33  ;;  %v2489_v42 = vsub.f32 %v288_v12, %v301_v33  ;;  %v2491_v43 = vsub.f32 %v291_v13, %v301_v33 }
  0x1c   : > { %v333_v36 = vmul.f32 1.442695, %v2473_v29  ;;  %v339_v37 = vmul.f32 1.442695, %v2475_v30  ;;  %v345_v38 = vmul.f32 1.442695, %v2477_v31  ;;  %v308_v44 = vmax.f32 %v305_v34, %v307_v35 }
  0x1d   : > { %v351_v39 = vmul.f32 1.442695, %v2479_v32  ;;  %v329_v45 = vmul.f32 1.442695, %v2485_v40  ;;  %v335_v46 = vmul.f32 1.442695, %v2487_v41 }
  0x1e   : > { %2262 = vpow2.f32 %v333_v36  ;;  %v341_v47 = vmul.f32 1.442695, %v2489_v42  ;;  %v2496_v48 = vsub.f32 %v283_v16, %v308_v44  ;;  %v2498_v49 = vsub.f32 %v286_v19, %v308_v44 }
  0x1f   : > { %2264 = vpow2.f32 %v339_v37  ;;  %v347_v50 = vmul.f32 1.442695, %v2491_v43  ;;  %v2501_v51 = vsub.f32 %v289_v20, %v308_v44  ;;  %v2503_v52 = vsub.f32 %v292_v21, %v308_v44 }
  0x20   : > { %2266 = vpow2.f32 %v345_v38  ;;  %v331_v53 = vmul.f32 1.442695, %v2496_v48  ;;  %v337_v54 = vmul.f32 1.442695, %v2498_v49 }
  0x21   : > { %2268 = vpow2.f32 %v351_v39  ;;  %v343_v55 = vmul.f32 1.442695, %v2501_v51  ;;  %v349_v56 = vmul.f32 1.442695, %v2503_v52 }
  0x22   : > { %2270 = vpow2.f32 %v329_v45 }
  0x23   : > { %2272 = vpow2.f32 %v335_v46 }
  0x24   : > { %2274 = vpow2.f32 %v341_v47 }
  0x25   : > { %2276 = vpow2.f32 %v347_v50 }
  0x26   : > { %2278 = vpow2.f32 %v331_v53 }
  0x27   : > { %2280 = vpow2.f32 %v337_v54 }
  0x28   : > { %v2263_v57 = vpop.eup %2262  ;;  %2282 = vpow2.f32 %v343_v55 }
  0x29   : > { %v2265_v58 = vpop.eup %2264  ;;  %v367_v59 = vsel %vm309_vm0, %v2263_v57, 0.0  ;;  %2284 = vpow2.f32 %v349_v56 }
  0x2a   : > { %v2267_v60 = vpop.eup %2266  ;;  %v368_v61 = vsel %vm309_vm0, %v2265_v58, 0.0 }
  0x2b   : > { %v2269_v62 = vpop.eup %2268  ;;  %v369_v63 = vadd.f32 %v368_v61, %v367_v59  ;;  %v370_v0 = vsel %vm309_vm0, %v2267_v60, 0.0 }
  0x2c   : > { %v2271_v1 = vpop.eup %2270  ;;  %v372_v2 = vsel %vm309_vm0, %v2269_v62, 0.0  ;;  %vm1522_vm0 = vcmask 146450  }
  0x2d   : > { %v2273_v3 = vpop.eup %2272  ;;  %v371_v4 = vadd.f32 %v370_v0, %v369_v63  ;;  %v353_v5 = vsel %vm294_vm1, %v2271_v1, 0.0 }
  0x2e   : > { %v2275_v6 = vpop.eup %2274  ;;  %v354_v7 = vsel %vm294_vm1, %v2273_v3, 0.0 }
  0x2f   : > { %v2277_v8 = vpop.eup %2276  ;;  %v373_v9 = vadd.f32 %v372_v2, %v371_v4  ;;  %v355_v10 = vadd.f32 %v354_v7, %v353_v5  ;;  %v356_v11 = vsel %vm294_vm1, %v2275_v6, 0.0 }
  0x30   : > { %v2279_v12 = vpop.eup %2278  ;;  %v358_v13 = vsel %vm294_vm1, %v2277_v8, 0.0 }
  0x31   : > { %v2281_v14 = vpop.eup %2280  ;;  %2286 = vlog2.f32 %v373_v9  ;;  %v357_v15 = vadd.f32 %v356_v11, %v355_v10  ;;  %v360_v16 = vsel %vm294_vm1, %v2279_v12, 0.0 }
  0x32   : > { %v2283_v17 = vpop.eup %2282  ;;  %v361_v18 = vsel %vm294_vm1, %v2281_v14, 0.0 }
  0x33   : > { %v2285_v19 = vpop.eup %2284  ;;  %v359_v20 = vadd.f32 %v358_v13, %v357_v15  ;;  %v362_v21 = vadd.f32 %v361_v18, %v360_v16  ;;  %v363_v22 = vsel %vm294_vm1, %v2283_v17, 0.0 }
  0x34   : > { %v365_v23 = vsel %vm294_vm1, %v2285_v19, 0.0  ;;  %vm1537_vm1 = vcmask 140304  }
  0x35   : > { %2288 = vlog2.f32 %v359_v20  ;;  %v364_v24 = vadd.f32 %v363_v22, %v362_v21 }
  0x37   : > { %v366_v25 = vadd.f32 %v365_v23, %v364_v24 }
  0x39   : > { %2290 = vlog2.f32 %v366_v25 }
  0x3b   : > { %v2287_v26 = vpop.eup %2286 }
  0x3c   : > { %v379_v27 = vmul.f32 0.6931472, %v2287_v26 }
  0x3e   : > { %v2522_v28 = vsub.f32 %v2473_v29, %v379_v27  ;;  %v2560_v53 = vsub.f32 %v2477_v31, %v379_v27  ;;  %v2573_v31 = vsub.f32 %v2479_v32, %v379_v27 }
  0x3f   : > { %v2289_v33 = vpop.eup %2288 }
  0x40   : > { %489 = vrot.lane.b32.xlu1 %v2522_v28, %s2411_s24  ;;  %v375_v34 = vmul.f32 0.6931472, %v2289_v33  ;;  %v396_v35 = vmul.f32 1.442695, %v2522_v28  ;;  %v408_v55 = vmul.f32 1.442695, %v2560_v53 }
  0x41   : > { %v414_v56 = vmul.f32 1.442695, %v2573_v31  ;;  %v444_v57 = vrot.slane %v2522_v28, 1  ;;  %v454_v63 = vrot.slane %v2560_v53, 1 }
  0x42   : > { %v2528_v36 = vsub.f32 %v2485_v40, %v375_v34  ;;  %v2531_v37 = vsub.f32 %v2487_v41, %v375_v34  ;;  %v2534_v39 = vsub.f32 %v2489_v42, %v375_v34  ;;  %v2537_v29 = vsub.f32 %v2491_v43, %v375_v34 }
  0x43   : > { %v2291_v38 = vpop.eup %2290  ;;  %v2546_v41 = vsub.f32 %v2475_v30, %v379_v27  ;;  %2292 = vpow2.f32 %v396_v35 }
  0x44   : > { %485 = vrot.lane.b32.xlu0 %v2528_v36, %s2411_s24  ;;  %v392_v44 = vmul.f32 1.442695, %v2528_v36  ;;  %491 = vrot.lane.b32.xlu1 %v2531_v37, %s2411_s24  ;;  %v398_v40 = vmul.f32 1.442695, %v2531_v37  ;;  %v377_v45 = vmul.f32 0.6931472, %v2291_v38 }
  0x45   : > { %v404_v42 = vmul.f32 1.442695, %v2534_v39  ;;  %v410_v43 = vmul.f32 1.442695, %v2537_v29  ;;  %v449_v58 = vrot.slane %v2546_v41, 1  ;;  %v441_v59 = vrot.slane %v2528_v36, 1 }
  0x46   : > { %2294 = vpow2.f32 %v392_v44  ;;  %v2551_v46 = vsub.f32 %v2496_v48, %v377_v45  ;;  %v2554_v47 = vsub.f32 %v2498_v49, %v377_v45  ;;  %v2557_v50 = vsub.f32 %v2501_v51, %v377_v45 }
  0x47   : > { %2296 = vpow2.f32 %v398_v40  ;;  %v2563_v30 = vsub.f32 %v2503_v52, %v377_v45  ;;  %v402_v52 = vmul.f32 1.442695, %v2546_v41  ;;  %v446_v61 = vrot.slane %v2531_v37, 1 }
  0x48   : > { %v394_v54 = vmul.f32 1.442695, %v2551_v46  ;;  %487 = vrot.lane.b32.xlu0 %v2551_v46, %s2411_s24  ;;  %495 = vrot.lane.b32.xlu1 %v2546_v41, %s2411_s24  ;;  %v400_v48 = vmul.f32 1.442695, %v2554_v47  ;;  %v406_v49 = vmul.f32 1.442695, %v2557_v50  ;;  %2298 = vpow2.f32 %v404_v42 }
  0x49   : > { %2300 = vpow2.f32 %v410_v43  ;;  %v412_v51 = vmul.f32 1.442695, %v2563_v30  ;;  %v442_v32 = vrot.slane %v2551_v46, 1  ;;  %v447_v60 = vrot.slane %v2554_v47, 1 }
  0x4a   : > { %2302 = vpow2.f32 %v394_v54  ;;  %v452_v62 = vrot.slane %v2557_v50, 1  ;;  %v451_v0 = vrot.slane %v2534_v39, 1  ;;  %v868_v1 = vrot.slane %v2554_v47, 7 }
  0x4b   : > { %2304 = vpow2.f32 %v400_v48  ;;  %v457_v3 = vrot.slane %v2563_v30, 1  ;;  %v456_v4 = vrot.slane %v2537_v29, 1  ;;  %v870_v5 = vrot.slane %v2546_v41, 7 }
  0x4c   : > { %493 = vrot.lane.b32.xlu0 %v2554_v47, %s2411_s24  ;;  %2306 = vpow2.f32 %v406_v49  ;;  %499 = vrot.lane.b32.xlu1 %v2557_v50, %s2411_s24  ;;  %v2607_v7 = vsel %vm440_vm2, %v442_v32, %v444_v57  ;;  %v2610_v8 = vsel %vm440_vm2, %v441_v59, %v442_v32  ;;  %v2615_v9 = vsel %vm440_vm2, %v447_v60, %v449_v58 }
  0x4d   : > { %2308 = vpow2.f32 %v412_v51  ;;  %v2593_v2 = vpop.eup %2292  ;;  %v2624_v13 = vsel %vm440_vm2, %v446_v61, %v447_v60  ;;  %v2629_v14 = vsel %vm440_vm2, %v452_v62, %v454_v63  ;;  %v2638_v18 = vsel %vm440_vm2, %v451_v0, %v452_v62 }
  0x4e   : > { %2310 = vpow2.f32 %v402_v52  ;;  %v2643_v19 = vsel %vm646_vm5, %v868_v1, %v870_v5  ;;  %v2655_v24 = vsel %vm440_vm2, %v456_v4, %v457_v3 }
  0x4f   : > { %2312 = vpow2.f32 %v408_v55 }
  0x50   : > { %v2598_v6 = vpop.eup %2294  ;;  %497 = vrot.lane.b32.xlu0 %v2534_v39, %s2411_s24  ;;  %503 = vrot.lane.b32.xlu1 %v2537_v29, %s2411_s24  ;;  %2314 = vpow2.f32 %v414_v56 }
  0x51   : > { %v2617_v10 = vpop.eup %2296  ;;  %v829_v11 = vmul.f32 %v2598_v6, %v2528_v36  ;;  %v950_v12 = vmul.f32 %v2598_v6, %v2610_v8 }
  0x52   : > { %v2631_v15 = vpop.eup %2298  ;;  %v832_v16 = vmul.f32 %v2617_v10, %v2531_v37  ;;  %v952_v17 = vmul.f32 %v2617_v10, %v2624_v13 }
  0x53   : > { %v2645_v20 = vpop.eup %2300  ;;  %v835_v21 = vmul.f32 %v2631_v15, %v2534_v39  ;;  %v958_v22 = vsel %vm914_vm3, %v950_v12, 0.0  ;;  %v954_v23 = vmul.f32 %v2631_v15, %v2638_v18  ;;  %v841_v34 = vsel %vm545_vm4, %v829_v11, 0.0 }
  0x54   : > { %v2657_v25 = vpop.eup %2302  ;;  %501 = vrot.lane.b32.xlu0 %v2560_v53, %s2411_s24  ;;  %507 = vrot.lane.b32.xlu1 %v2573_v31, %s2411_s24  ;;  %v959_v26 = vsel %vm914_vm3, %v952_v17, 0.0  ;;  %v838_v27 = vmul.f32 %v2645_v20, %v2537_v29  ;;  %v842_v33 = vsel %vm545_vm4, %v832_v16, 0.0  ;;  %v956_v49 = vmul.f32 %v2645_v20, %v2655_v24 }
  0x55   : > { %v2668_v35 = vpop.eup %2304  ;;  %v830_v38 = vmul.f32 %v2657_v25, %v2551_v46  ;;  %v951_v44 = vmul.f32 %v2657_v25, %v2607_v7  ;;  %v960_v40 = vadd.f32 %v959_v26, %v958_v22  ;;  %v961_v45 = vsel %vm914_vm3, %v954_v23, 0.0 }
  0x56   : > { %v2675_v42 = vpop.eup %2306  ;;  %v833_v43 = vmul.f32 %v2668_v35, %v2554_v47  ;;  %v953_v54 = vmul.f32 %v2668_v35, %v2615_v9  ;;  %v844_v48 = vsel %vm545_vm4, %v835_v21, 0.0  ;;  %v963_v22 = vsel %vm914_vm3, %v956_v49, 0.0 }
  0x57   : > { %v2684_v51 = vpop.eup %2308  ;;  %v836_v52 = vmul.f32 %v2675_v42, %v2557_v50  ;;  %v965_v55 = vsel %vm914_vm3, %v951_v44, 0.0  ;;  %v955_v56 = vmul.f32 %v2675_v42, %v2629_v14  ;;  %v962_v32 = vadd.f32 %v961_v45, %v960_v40 }
  0x58   : > { %v2691_v59 = vpop.eup %2310  ;;  %505 = vrot.lane.b32.xlu0 %v2563_v30, %s2411_s24  ;;  %1170 = vrot.lane.b32.xlu1 %v2551_v46, %s2412_s25  ;;  %v966_v60 = vsel %vm914_vm3, %v953_v54, 0.0  ;;  %v839_v61 = vmul.f32 %v2684_v51, %v2563_v30  ;;  %v848_v62 = vsel %vm545_vm4, %v830_v38, 0.0  ;;  %v849_v0 = vsel %vm545_vm4, %v833_v43, 0.0 }
  0x59   : > { %v2702_v4 = vpop.eup %2312  ;;  %v967_v5 = vadd.f32 %v966_v60, %v965_v55  ;;  %v968_v11 = vsel %vm914_vm3, %v955_v56, 0.0  ;;  %v850_v12 = vadd.f32 %v849_v0, %v848_v62  ;;  %v851_v16 = vsel %vm545_vm4, %v836_v52, 0.0 }
  0x5a   : > { %v2706_v17 = vpop.eup %2314  ;;  %v853_v21 = vsel %vm545_vm4, %v839_v61, 0.0  ;;  %v843_v23 = vadd.f32 %v842_v33, %v841_v34  ;;  %v875_v26 = vrot.slane %v2560_v53, 7  ;;  %v846_v40 = vsel %vm545_vm4, %v838_v27, 0.0 }
  0x5b   : > { %v2711_v38 = vadd.f32 %v968_v11, %v967_v5  ;;  %v852_v44 = vadd.f32 %v851_v16, %v850_v12  ;;  %v2714_v45 = vadd.f32 %v963_v22, %v962_v32  ;;  %v873_v33 = vrot.slane %v2557_v50, 7 }
  0x5c   : > { %1168 = vrot.lane.b32.xlu0 %v2528_v36, %s2412_s25  ;;  %1174 = vrot.lane.b32.xlu1 %v2531_v37, %s2412_s25  ;;  %v845_v43 = vadd.f32 %v844_v48, %v843_v23  ;;  %v831_v27 = vmul.f32 %v2593_v2, %v2522_v28  ;;  %v834_v48 = vmul.f32 %v2691_v59, %v2546_v41  ;;  %v878_v32 = vrot.slane %v2563_v30, 7 }
  0x5d   : > { %4030 = vst [vmem:[#allocation2_spill] sm:$0xff] %v2711_v38  ;;  %4031 = vst [vmem:[#allocation3_spill] sm:$0xff] %v2714_v45  ;;  %v2720_v54 = vadd.f32 %v853_v21, %v852_v44  ;;  %v2728_v49 = vsel %vm646_vm5, %v873_v33, %v875_v26  ;;  %v837_v52 = vmul.f32 %v2702_v4, %v2560_v53  ;;  %v880_v62 = vrot.slane %v2573_v31, 7 }
  0x5e   : > { %v2723_v34 = vadd.f32 %v846_v40, %v845_v43  ;;  %v840_v55 = vmul.f32 %v2706_v17, %v2573_v31  ;;  %v855_v56 = vsel %vm560_vm6, %v831_v27, 0.0  ;;  %v856_v60 = vsel %vm560_vm6, %v834_v48, 0.0 }
  0x5f   : > { %v858_v61 = vsel %vm560_vm6, %v837_v52, 0.0  ;;  %v857_v0 = vadd.f32 %v856_v60, %v855_v56  ;;  %v418_v5 = vmul.f32 2.0, %v2522_v28  ;;  %v2753_v11 = vmul.f32 2.0, %v2528_v36 }
  0x60   : > { %1172 = vrot.lane.b32.xlu0 %v2522_v28, %s2412_s25  ;;  %1178 = vrot.lane.b32.xlu1 %v2546_v41, %s2412_s25  ;;  %v860_v12 = vsel %vm560_vm6, %v840_v55, 0.0  ;;  %v2759_v16 = vsel %vm646_vm5, %v878_v32, %v880_v62  ;;  %v2762_v21 = vmul.f32 2.0, %v2531_v37  ;;  %v2765_v22 = vmul.f32 2.0, %v2551_v46 }
  0x61   : > { %v859_v23 = vadd.f32 %v858_v61, %v857_v0  ;;  %v2769_v26 = vsub.f32 %v418_v5, %v444_v57  ;;  %v473_v44 = vsub.f32 %v2753_v11, %v2610_v8  ;;  %v421_v27 = vmul.f32 2.0, %v2546_v41 }
  0x62   : > { %v476_v40 = vsub.f32 %v2762_v21, %v2624_v13  ;;  %v2785_v57 = vmul.f32 2.0, %v2554_v47  ;;  %v2792_v55 = vmul.f32 2.0, %v2557_v50  ;;  %v424_v61 = vmul.f32 2.0, %v2560_v53 }
  0x63   : > { %v2782_v48 = vadd.f32 %v860_v12, %v859_v23  ;;  %v2789_v52 = vsub.f32 %v421_v27, %v449_v58  ;;  %v459_v41 = vrot.slane %v2573_v31, 1  ;;  %v427_v58 = vmul.f32 2.0, %v2573_v31 }
  0x64   : > { %1176 = vrot.lane.b32.xlu0 %v2554_v47, %s2412_s25  ;;  %1182 = vrot.lane.b32.xlu1 %v2557_v50, %s2412_s25  ;;  %v2807_v62 = vsub.f32 %v424_v61, %v454_v63  ;;  %v863_v63 = vrot.slane %v2551_v46, 7  ;;  %v865_v46 = vrot.slane %v2522_v28, 7  ;;  %v2895_v47 = vrot.slane %v2537_v29, 7 }
  0x65   : > { %v2809_v0 = vsub.f32 %v427_v58, %v459_v41  ;;  %v2952_v60 = vmul.f32 2.0, %v2537_v29 }
  0x66   : > { %v2861_v5 = vsel %vm646_vm5, %v863_v63, %v865_v46  ;;  %v2910_v50 = vsel %vm646_vm5, %v2895_v47, %v878_v32  ;;  %v2928_v32 = vld [vmem:[%s2915_s29 + $0x10] sm:$0x3]  ;;  %v2949_v46 = vmul.f32 2.0, %v2534_v39 }
  0x67   : > { %4035 = vst [vmem:[#allocation7_spill] sm:$0xff] %v2910_v50  ;;  %4037 = vst [vmem:[#allocation9_spill] sm:$0xff] %v2928_v32  ;;  %v634_v61 = vrot.slane %v2928_v32, 2 }
  0x68   : > { %1180 = vrot.lane.b32.xlu0 %v2534_v39, %s2412_s25  ;;  %1186 = vrot.lane.b32.xlu1 %v2537_v29, %s2412_s25 }
  0x6c   : > { %1184 = vrot.lane.b32.xlu0 %v2560_v53, %s2412_s25  ;;  %1190 = vrot.lane.b32.xlu1 %v2573_v31, %s2412_s25  ;;  %v2826_v53 = vsel %vm440_vm2, %v457_v3, %v459_v41  ;;  %v2837_v31 = vrot.slane %v2528_v36, 7  ;;  %v2853_v36 = vrot.slane %v2531_v37, 7  ;;  %v2874_v37 = vrot.slane %v2534_v39, 7 }
  0x6e   : > { %v2846_v3 = vsel %vm646_vm5, %v2837_v31, %v863_v63  ;;  %v2871_v28 = vsel %vm646_vm5, %v2853_v36, %v868_v1  ;;  %v2884_v12 = vsel %vm646_vm5, %v2874_v37, %v873_v33  ;;  %v2922_v1 = vld [vmem:[%s2915_s29] sm:$0xff]  ;;  %v2925_v33 = vld [vmem:[%s2915_s29 + $0x8] sm:$0xff] }
  0x6f   : > { %4032 = vst [vmem:[#allocation4_spill] sm:$0xff] %v2846_v3  ;;  %4033 = vst [vmem:[#allocation5_spill] sm:$0xff] %v2871_v28  ;;  %v631_v23 = vrot.slane %v2922_v1, 2  ;;  %v632_v27 = vrot.slane %v2925_v33, 2 }
  0x70   : > { %1188 = vrot.lane.b32.xlu0 %v2563_v30, %s2412_s25  ;;  %1341 = vrot.lane.b32.xlu1 %v2607_v7, %s2412_s25  ;;  %4034 = vst [vmem:[#allocation6_spill] sm:$0xff] %v2884_v12  ;;  %4036 = vst [vmem:[#allocation8_spill] sm:$0xff] %v2922_v1 }
  0x71   : > { %v633_v41 = vsel %vm595_vm7, %v631_v23, %v632_v27  ;;  %v635_v58 = vsel %vm595_vm7, %v632_v27, %v634_v61 }
  0x72   : > { %vm638_vm8 = vcmp.lt.f32.partialorder %v2922_v1, %v633_v41  ;;  %vm639_vm9 = vcmp.lt.f32.partialorder %v2925_v33, %v635_v58 }
  0x73   : > { %v2958_v61 = vsel %vm638_vm8, %v2922_v1, %v633_v41  ;;  %v2969_v29 = vsel %vm639_vm9, %v2925_v33, %v635_v58 }
  0x74   : > { %1339 = vrot.lane.b32.xlu0 %v2610_v8, %s2412_s25  ;;  %1345 = vrot.lane.b32.xlu1 %v2615_v9, %s2412_s25 }
  0x78   : > { %1343 = vrot.lane.b32.xlu0 %v2624_v13, %s2412_s25  ;;  %1349 = vrot.lane.b32.xlu1 %v2629_v14, %s2412_s25 }
  0x7c   : > { %1347 = vrot.lane.b32.xlu0 %v2638_v18, %s2412_s25  ;;  %1353 = vrot.lane.b32.xlu1 %v2826_v53, %s2412_s25 }
  0x80   : > { %1351 = vrot.lane.b32.xlu0 %v2655_v24, %s2412_s25  ;;  %1636 = vrot.lane.b32.xlu1 %v2607_v7, %s2411_s24 }
  0x84   : > { %1634 = vrot.lane.b32.xlu0 %v2610_v8, %s2411_s24  ;;  %1640 = vrot.lane.b32.xlu1 %v2615_v9, %s2411_s24  ;;  %v479_v8 = vsub.f32 %v2949_v46, %v2638_v18  ;;  %v2413_v46 = vmov 0  }
  0x88   : > { %1638 = vrot.lane.b32.xlu0 %v2624_v13, %s2411_s24  ;;  %1476 = vrot.lane.b32.xlu1 %v2846_v3, %s2412_s25  ;;  %v482_v13 = vsub.f32 %v2952_v60, %v2655_v24 }
  0x8c   : > { %1474 = vrot.lane.b32.xlu0 %v2837_v31, %s2412_s25  ;;  %1480 = vrot.lane.b32.xlu1 %v2853_v36, %s2412_s25 }
  0x90   : > { %1478 = vrot.lane.b32.xlu0 %v2861_v5, %s2412_s25  ;;  %1484 = vrot.lane.b32.xlu1 %v2643_v19, %s2412_s25 }
  0x94   : > { %1482 = vrot.lane.b32.xlu0 %v2871_v28, %s2412_s25  ;;  %1644 = vrot.lane.b32.xlu1 %v2629_v14, %s2411_s24 }
  0x98   : > { %1642 = vrot.lane.b32.xlu0 %v2638_v18, %s2411_s24  ;;  %1488 = vrot.lane.b32.xlu1 %v2884_v12, %s2412_s25  ;;  %v3005_v18 = vsel %vm639_vm9, 1, %v2413_v46  ;;  %vm4028_vm9 = vcmask 130050  }
  0x9c   : > { %1486 = vrot.lane.b32.xlu0 %v2874_v37, %s2412_s25  ;;  %1646 = vrot.lane.b32.xlu1 %v2655_v24, %s2411_s24  ;;  %v2991_v24 = vsel %vm638_vm8, 1, %v2413_v46  ;;  %vm922_vm8 = vcmask 132104  }
  0xa0   : > { %1490 = vrot.lane.b32.xlu0 %v2728_v49, %s2412_s25  ;;  %1492 = vrot.lane.b32.xlu1 %v2895_v47, %s2412_s25 }
  0xa4   : > { %1648 = vrot.lane.b32.xlu0 %v2826_v53, %s2411_s24  ;;  %1496 = vrot.lane.b32.xlu1 %v2759_v16, %s2412_s25 }
  0xa8   : > { %1494 = vrot.lane.b32.xlu0 %v2910_v50, %s2412_s25  ;;  %1771 = vrot.lane.b32.xlu1 %v2846_v3, %s2411_s24  ;;  %v647_v3 = vrot.slane %v2958_v61, 7 }
  0xac   : > { %1769 = vrot.lane.b32.xlu0 %v2837_v31, %s2411_s24  ;;  %1775 = vrot.lane.b32.xlu1 %v2853_v36, %s2411_s24 }
  0xb0   : > { %1773 = vrot.lane.b32.xlu0 %v2861_v5, %s2411_s24  ;;  %1779 = vrot.lane.b32.xlu1 %v2643_v19, %s2411_s24 }
  0xb2   : > { %v490_v63 = vpop.permute.xlu1 %489 }
  0xb3   : > { %v523_v43 = vsub.f32 %v2769_v26, %v490_v63  ;;  %v2984_v26 = vmul.f32 2.0, %v2563_v30 }
  0xb4   : > { %1777 = vrot.lane.b32.xlu0 %v2871_v28, %s2411_s24  ;;  %1783 = vrot.lane.b32.xlu1 %v2884_v12, %s2411_s24 }
  0xb6   : > { %v486_v23 = vpop.permute.xlu0 %485  ;;  %v492_v27 = vpop.permute.xlu1 %491 }
  0xb7   : > { %v521_v56 = vsub.f32 %v473_v44, %v486_v23  ;;  %v524_v39 = vsub.f32 %v476_v40, %v492_v27  ;;  %v1039_v44 = vmul.f32 %v2617_v10, %v492_v27  ;;  %v1038_v40 = vmul.f32 %v2593_v2, %v490_v63 }
  0xb8   : > { %1781 = vrot.lane.b32.xlu0 %v2874_v37, %s2411_s24  ;;  %1787 = vrot.lane.b32.xlu1 %v2895_v47, %s2411_s24  ;;  %v1036_v60 = vmul.f32 %v2598_v6, %v486_v23  ;;  %v4038_v63 = vsub.f32 %v2765_v22, %v2607_v7  ;;  %v665_v22 = vrot.slane %v2991_v24, 7 }
  0xb9   : > { %v533_v11 = vmul.f32 %v2598_v6, %v521_v56  ;;  %v536_v21 = vmul.f32 %v2617_v10, %v524_v39  ;;  %v535_v39 = vmul.f32 %v2593_v2, %v523_v43  ;;  %v1049_v23 = vsel %vm580_vm11, %v1039_v44, 0.0 }
  0xba   : > { %v488_v12 = vpop.permute.xlu0 %487  ;;  %v496_v28 = vpop.permute.xlu1 %495  ;;  %v4039_v44 = vrot.slane %v2969_v29, 7 }
  0xbb   : > { %v546_v56 = vsel %vm545_vm4, %v533_v11, 0.0  ;;  %v547_v30 = vsel %vm545_vm4, %v536_v21, 0.0  ;;  %v522_v27 = vsub.f32 %v4038_v63, %v488_v12  ;;  %v526_v41 = vsub.f32 %v2789_v52, %v496_v28 }
  0xbc   : > { %v548_v61 = vadd.f32 %v547_v30, %v546_v56  ;;  %1785 = vrot.lane.b32.xlu0 %v2728_v49, %s2411_s24  ;;  %v1041_v11 = vmul.f32 %v2691_v59, %v496_v28  ;;  %1791 = vrot.lane.b32.xlu1 %v2759_v16, %s2411_s24  ;;  %v1037_v52 = vmul.f32 %v2657_v25, %v488_v12  ;;  %v1062_v56 = vsel %vm4029_vm10, %v1038_v40, 0.0 }
  0xbd   : > { %v534_v43 = vmul.f32 %v2657_v25, %v522_v27  ;;  %v538_v58 = vmul.f32 %v2691_v59, %v526_v41  ;;  %v649_v28 = vsel %vm646_vm5, %v647_v3, %v4039_v44  ;;  %v1048_v30 = vsel %vm580_vm11, %v1036_v60, 0.0 }
  0xbe   : > { %v494_v21 = vpop.permute.xlu0 %493  ;;  %v500_v46 = vpop.permute.xlu1 %499  ;;  %v4040_v63 = vsub.f32 %v2785_v57, %v2615_v9  ;;  %v666_v27 = vrot.slane %v3005_v18, 7  ;;  %v561_v12 = vsel %vm560_vm6, %v535_v39, 0.0  ;;  %v1050_v7 = vadd.f32 %v1049_v23, %v1048_v30 }
  0xbf   : > { %v562_v41 = vsel %vm560_vm6, %v538_v58, 0.0  ;;  %v4041_v44 = vsub.f32 %v2792_v55, %v2629_v14  ;;  %v1063_v60 = vsel %vm4029_vm10, %v1041_v11, 0.0  ;;  %v1040_v57 = vmul.f32 %v2668_v35, %v494_v21 }
  0xc0   : > { %v525_v24 = vsub.f32 %v4040_v63, %v494_v21  ;;  %1789 = vrot.lane.b32.xlu0 %v2910_v50, %s2411_s24  ;;  %v563_v32 = vadd.f32 %v562_v41, %v561_v12  ;;  %652 = vrot.lane.b32.xlu1 %v649_v28, %s2411_s24  ;;  %v553_v18 = vsel %vm545_vm4, %v534_v43, 0.0  ;;  %v1055_v39 = vsel %vm582_vm12, %v1037_v52, 0.0 }
  0xc1   : > { %v528_v40 = vsub.f32 %v4041_v44, %v500_v46  ;;  %v1043_v58 = vmul.f32 %v2675_v42, %v500_v46  ;;  %v1064_v12 = vadd.f32 %v1063_v60, %v1062_v56  ;;  %v1056_v52 = vsel %vm582_vm12, %v1040_v57, 0.0 }
  0xc2   : > { %v537_v9 = vmul.f32 %v2668_v35, %v525_v24  ;;  %v498_v30 = vpop.permute.xlu0 %497  ;;  %v504_v14 = vpop.permute.xlu1 %503 }
  0xc3   : > { %v540_v23 = vmul.f32 %v2675_v42, %v528_v40  ;;  %v527_v63 = vsub.f32 %v479_v8, %v498_v30  ;;  %v1042_v11 = vmul.f32 %v2631_v15, %v498_v30  ;;  %v530_v24 = vsub.f32 %v482_v13, %v504_v14 }
  0xc4   : > { %v554_v55 = vsel %vm545_vm4, %v537_v9, 0.0  ;;  %650 = vrot.lane.b32.xlu0 %v647_v3, %s2411_s24  ;;  %v1045_v43 = vmul.f32 %v2645_v20, %v504_v14  ;;  %668 = vrot.lane.b32.xlu1 %v665_v22, %s2411_s24  ;;  %v1058_v13 = vsel %vm582_vm12, %v1043_v58, 0.0 }
  0xc5   : > { %v555_v21 = vadd.f32 %v554_v55, %v553_v18  ;;  %v556_v28 = vsel %vm545_vm4, %v540_v23, 0.0  ;;  %v539_v46 = vmul.f32 %v2631_v15, %v527_v63  ;;  %v1051_v41 = vsel %vm580_vm11, %v1042_v11, 0.0 }
  0xc6   : > { %v542_v44 = vmul.f32 %v2645_v20, %v530_v24  ;;  %v1052_v56 = vadd.f32 %v1051_v41, %v1050_v7  ;;  %v1053_v40 = vsel %vm580_vm11, %v1045_v43, 0.0  ;;  %v502_v60 = vpop.permute.xlu0 %501  ;;  %v508_v3 = vpop.permute.xlu1 %507  ;;  %v4042_v55 = vrot.slane %v2969_v29, 7 }
  0xc7   : > { %v557_v8 = vadd.f32 %v556_v28, %v555_v21  ;;  %v549_v9 = vsel %vm545_vm4, %v539_v46, 0.0  ;;  %v529_v18 = vsub.f32 %v2807_v62, %v502_v60  ;;  %v1044_v23 = vmul.f32 %v2702_v4, %v502_v60 }
  0xc8   : > { %v551_v57 = vsel %vm545_vm4, %v542_v44, 0.0  ;;  %v550_v30 = vadd.f32 %v549_v9, %v548_v61  ;;  %v1054_v14 = vadd.f32 %v1053_v40, %v1052_v56  ;;  %654 = vrot.lane.b32.xlu0 %v4042_v55, %s2411_s24  ;;  %v532_v7 = vsub.f32 %v2809_v0, %v508_v3  ;;  %672 = vrot.lane.b32.xlu1 %v666_v27, %s2411_s24 }
  0xc9   : > { %v1047_v58 = vmul.f32 %v2706_v17, %v508_v3  ;;  %v1057_v63 = vadd.f32 %v1056_v52, %v1055_v39  ;;  %v541_v11 = vmul.f32 %v2702_v4, %v529_v18  ;;  %v1065_v24 = vsel %vm4029_vm10, %v1044_v23, 0.0 }
  0xca   : > { %v667_v21 = vsel %vm646_vm5, %v665_v22, %v666_v27  ;;  %v3066_v62 = vadd.f32 %v551_v57, %v550_v30  ;;  %v1066_v61 = vadd.f32 %v1065_v24, %v1064_v12  ;;  %v544_v28 = vmul.f32 %v2706_v17, %v532_v7  ;;  %v506_v43 = vpop.permute.xlu0 %505  ;;  %v1171_v0 = vpop.permute.xlu1 %1170 }
  0xcb   : > { %v1067_v29 = vsel %vm4029_vm10, %v1047_v58, 0.0  ;;  %v1059_v46 = vadd.f32 %v1058_v13, %v1057_v63  ;;  %v564_v39 = vsel %vm560_vm6, %v541_v11, 0.0  ;;  %v4044_v52 = vsub.f32 %v2984_v26, %v2826_v53 }
  0xcc   : > { %4043 = vst [vmem:[#allocation10_spill] sm:$0xff] %v3066_v62  ;;  %v1046_v22 = vmul.f32 %v2684_v51, %v506_v43  ;;  %v565_v44 = vadd.f32 %v564_v39, %v563_v32  ;;  %v566_v27 = vsel %vm560_vm6, %v544_v28, 0.0  ;;  %v1068_v56 = vadd.f32 %v1067_v29, %v1066_v61  ;;  %670 = vrot.lane.b32.xlu0 %v667_v21, %s2411_s24 }
  0xcd   : > { %v531_v41 = vsub.f32 %v4044_v52, %v506_v43  ;;  %v3078_v12 = vsub.f32 %v2723_v34, %v1054_v14  ;;  %v586_v7 = vrot.slane %v3066_v62, 1  ;;  %v596_v58 = vrot.slane %v3066_v62, 2 }
  0xce   : > { %v1060_v13 = vsel %vm582_vm12, %v1046_v22, 0.0  ;;  %v3082_v60 = vadd.f32 %v566_v27, %v565_v44  ;;  %v3085_v26 = vsub.f32 %v2782_v48, %v1068_v56  ;;  %v1169_v9 = vpop.permute.xlu0 %1168  ;;  %v1175_v57 = vpop.permute.xlu1 %1174  ;;  %vm906_vm6 = vcmask 138250  }
  0xcf   : > { %4045 = vst [vmem:[#allocation11_spill] sm:$0xff] %v3078_v12  ;;  %v543_v40 = vmul.f32 %v2684_v51, %v531_v41  ;;  %v1061_v3 = vadd.f32 %v1060_v13, %v1059_v46  ;;  %v1075_v32 = vrot.slane %v3078_v12, 7  ;;  %v1207_v39 = vmul.f32 %v2617_v10, %v1175_v57 }
  0xd0   : > { %4046 = vst [vmem:[#allocation12_spill] sm:$0xff] %v3082_v60  ;;  %4047 = vst [vmem:[#allocation13_spill] sm:$0xff] %v3085_v26  ;;  %v1078_v14 = vrot.slane %v3085_v26, 7  ;;  %v589_v55 = vrot.slane %v3082_v60, 1  ;;  %v599_v61 = vrot.slane %v3082_v60, 2 }
  0xd1   : > { %v558_v18 = vsel %vm545_vm4, %v543_v40, 0.0  ;;  %v3092_v30 = vsub.f32 %v2720_v54, %v1061_v3  ;;  %1080 = vrot.lane.b32.xlu0 %v1075_v32, %s2412_s25  ;;  %v1204_v40 = vmul.f32 %v2598_v6, %v1169_v9  ;;  %vm727_vm4 = vcmask 1041408  }
  0xd2   : > { %v3089_v23 = vadd.f32 %v558_v18, %v557_v8  ;;  %v3099_v63 = vpop.permute.xlu0 %1172  ;;  %v3102_v24 = vpop.permute.xlu1 %1178 }
  0xd3   : > { %4049 = vst [vmem:[#allocation15_spill] sm:$0xff] %v3092_v30  ;;  %v1076_v11 = vrot.slane %v3092_v30, 7 }
  0xd4   : > { %4048 = vst [vmem:[#allocation14_spill] sm:$0xff] %v3089_v23  ;;  %v587_v8 = vrot.slane %v3089_v23, 1  ;;  %v597_v21 = vrot.slane %v3089_v23, 2 }
  0xd5   : > { %v1079_v28 = vsel %vm646_vm5, %v1076_v11, %v1078_v14  ;;  %v3109_v29 = vsel %vm646_vm5, %v1075_v32, %v1076_v11  ;;  %v1218_v32 = vsel %vm1216_vm13, %v1207_v39, 0.0  ;;  %v1217_v14 = vsel %vm1216_vm13, %v1204_v40, 0.0 }
  0xd6   : > { %v588_v43 = vsel %vm440_vm2, %v586_v7, %v587_v8  ;;  %v598_v46 = vsel %vm595_vm7, %v596_v58, %v597_v21  ;;  %1084 = vrot.lane.b32.xlu0 %v1079_v28, %s2412_s25  ;;  %v590_v41 = vsel %vm440_vm2, %v587_v8, %v589_v55  ;;  %v1177_v22 = vpop.permute.xlu0 %1176  ;;  %v1183_v44 = vpop.permute.xlu1 %1182  ;;  %v600_v56 = vsel %vm595_vm7, %v597_v21, %v599_v61 }
  0xd7   : > { %v593_v52 = vmax.f32 %v3066_v62, %v588_v43  ;;  %v594_v27 = vmax.f32 %v3089_v23, %v590_v41  ;;  %v1208_v7 = vmul.f32 %v2668_v35, %v1177_v22  ;;  %v1219_v11 = vadd.f32 %v1218_v32, %v1217_v14 }
  0xd8   : > { %v1205_v8 = vmul.f32 %v2657_v25, %v1171_v0  ;;  %v1211_v9 = vmul.f32 %v2675_v42, %v1183_v44 }
  0xd9   : > { %v3120_v13 = vmax.f32 %v593_v52, %v598_v46  ;;  %v3122_v3 = vmax.f32 %v594_v27, %v600_v56  ;;  %v1226_v39 = vsel %vm1224_vm14, %v1208_v7, 0.0 }
  0xda   : > { %v1181_v57 = vpop.permute.xlu0 %1180  ;;  %v1187_v18 = vpop.permute.xlu1 %1186  ;;  %v1225_v41 = vsel %vm1224_vm14, %v1205_v8, 0.0  ;;  %v1228_v22 = vsel %vm1224_vm14, %v1211_v9, 0.0 }
  0xdb   : > { %4050 = vst [vmem:[#allocation16_spill] sm:$0xff] %v3120_v13  ;;  %4051 = vst [vmem:[#allocation17_spill] sm:$0xff] %v3122_v3  ;;  %v1210_v55 = vmul.f32 %v2631_v15, %v1181_v57  ;;  %v1213_v58 = vmul.f32 %v2645_v20, %v1187_v18  ;;  %v1227_v27 = vadd.f32 %v1226_v39, %v1225_v41 }
  0xdd   : > { %v1220_v21 = vsel %vm1216_vm13, %v1210_v55, 0.0  ;;  %v1222_v61 = vsel %vm1216_vm13, %v1213_v58, 0.0  ;;  %v1229_v32 = vadd.f32 %v1228_v22, %v1227_v27  ;;  %vm4027_vm13 = vcmask 123904  }
  0xde   : > { %v1221_v28 = vadd.f32 %v1220_v21, %v1219_v11  ;;  %v1185_v43 = vpop.permute.xlu0 %1184  ;;  %v1191_v46 = vpop.permute.xlu1 %1190 }
  0xdf   : > { %v1215_v60 = vmul.f32 %v2706_v17, %v1191_v46 }
  0xe0   : > { %v1223_v52 = vadd.f32 %v1222_v61, %v1221_v28 }
  0xe1   : > { %v1238_v50 = vsel %vm1232_vm15, %v1215_v60, 0.0 }
  0xe2   : > { %v3133_v56 = vsub.f32 %v2723_v34, %v1223_v52  ;;  %v1189_v0 = vpop.permute.xlu0 %1188  ;;  %v1342_v40 = vpop.permute.xlu1 %1341 }
  0xe3   : > { %v1214_v44 = vmul.f32 %v2684_v51, %v1189_v0  ;;  %v1364_v13 = vmul.f32 %v2657_v25, %v1342_v40 }
  0xe4   : > { %4052 = vst [vmem:[#allocation18_spill] sm:$0xff] %v3133_v56  ;;  %v1246_v57 = vrot.slane %v3133_v56, 7 }
  0xe5   : > { %v1230_v18 = vsel %vm1224_vm14, %v1214_v44, 0.0  ;;  %v1378_v45 = vsel %vm1224_vm14, %v1364_v13, 0.0 }
  0xe6   : > { %v1231_v14 = vadd.f32 %v1230_v18, %v1229_v32  ;;  %v1340_v7 = vpop.permute.xlu0 %1339  ;;  %1251 = vrot.lane.b32.xlu1 %v1246_v57, %s2411_s24  ;;  %v1346_v55 = vpop.permute.xlu1 %1345 }
  0xe7   : > { %v1366_v26 = vmul.f32 %v2668_v35, %v1346_v55  ;;  %v1363_v55 = vmul.f32 %v2598_v6, %v1340_v7 }
  0xe8   : > { %v3140_v58 = vsub.f32 %v2720_v54, %v1231_v14 }
  0xe9   : > { %v1379_v46 = vsel %vm1224_vm14, %v1366_v26, 0.0 }
  0xea   : > { %v1344_v11 = vpop.permute.xlu0 %1343  ;;  %v3994_v8 = vrot.slane %v3140_v58, 7  ;;  %v1350_v9 = vpop.permute.xlu1 %1349 }
  0xeb   : > { %v1368_v30 = vmul.f32 %v2675_v42, %v1350_v9 }
  0xec   : > { %v1248_v21 = vsel %vm646_vm5, %v1246_v57, %v3994_v8  ;;  %v1209_v57 = vmul.f32 %v2691_v59, %v3102_v24  ;;  %v1212_v8 = vmul.f32 %v2702_v4, %v1185_v43 }
  0xed   : > { %1253 = vrot.lane.b32.xlu0 %v1248_v21, %s2411_s24  ;;  %v1206_v21 = vmul.f32 %v2593_v2, %v3099_v63  ;;  %v1365_v63 = vmul.f32 %v2617_v10, %v1344_v11  ;;  %v1380_v11 = vadd.f32 %v1379_v46, %v1378_v45 }
  0xee   : > { %v1348_v61 = vpop.permute.xlu0 %1347  ;;  %v1354_v28 = vpop.permute.xlu1 %1353  ;;  %v1234_v3 = vsel %vm1232_vm15, %v1209_v57, 0.0  ;;  %v1236_v12 = vsel %vm1232_vm15, %v1212_v8, 0.0  ;;  %v1381_v8 = vsel %vm1224_vm14, %v1368_v30, 0.0 }
  0xef   : > { %v1233_v56 = vsel %vm1232_vm15, %v1206_v21, 0.0  ;;  %v1370_v57 = vmul.f32 %v2684_v51, %v1354_v28  ;;  %v1372_v9 = vsel %vm1224_vm14, %v1365_v63, 0.0  ;;  %v1382_v30 = vadd.f32 %v1381_v8, %v1380_v11 }
  0xf0   : > { %v1235_v24 = vadd.f32 %v1234_v3, %v1233_v56  ;;  %v1367_v3 = vmul.f32 %v2631_v15, %v1348_v61  ;;  %v1371_v61 = vsel %vm1224_vm14, %v1363_v55, 0.0 }
  0xf1   : > { %v1383_v28 = vsel %vm1224_vm14, %v1370_v57, 0.0  ;;  %v1373_v21 = vadd.f32 %v1372_v9, %v1371_v61 }
  0xf2   : > { %v1352_v39 = vpop.permute.xlu0 %1351  ;;  %v1637_v52 = vpop.permute.xlu1 %1636  ;;  %v1237_v1 = vadd.f32 %v1236_v12, %v1235_v24  ;;  %v1384_v24 = vadd.f32 %v1383_v28, %v1382_v30 }
  0xf4   : > { %v1239_v56 = vadd.f32 %v1238_v50, %v1237_v1  ;;  %v3197_v30 = vsub.f32 %v2720_v54, %v1384_v24 }
  0xf6   : > { %v3147_v41 = vpop.permute.xlu0 %1634  ;;  %v1641_v22 = vpop.permute.xlu1 %1640  ;;  %v3183_v1 = vsub.f32 %v2782_v48, %v1239_v56 }
  0xf7   : > { %v1658_v61 = vmul.f32 %v2598_v6, %v3147_v41 }
  0xfa   : > { %v3149_v27 = vpop.permute.xlu0 %1638  ;;  %v1477_v0 = vpop.permute.xlu1 %1476 }
  0xfb   : > { %v1511_v56 = vmul.f32 %v2657_v25, %v1477_v0 }
  0xfe   : > { %v1475_v44 = vpop.permute.xlu0 %1474  ;;  %v1481_v32 = vpop.permute.xlu1 %1480 }
  0xff   : > { %v1513_v40 = vmul.f32 %v2617_v10, %v1481_v32  ;;  %v1510_v60 = vmul.f32 %v2598_v6, %v1475_v44  ;;  %v1369_v32 = vmul.f32 %v2645_v20, %v1352_v39  ;;  %v1374_v44 = vsel %vm1224_vm14, %v1367_v3, 0.0 }
 0x100   : > { %v1375_v3 = vadd.f32 %v1374_v44, %v1373_v21 }
 0x101   : > { %v1524_v12 = vsel %vm1522_vm0, %v1513_v40, 0.0  ;;  %v1523_v45 = vsel %vm1522_vm0, %v1510_v60, 0.0  ;;  %v1376_v57 = vsel %vm1224_vm14, %v1369_v32, 0.0  ;;  %v1659_v40 = vmul.f32 %v2657_v25, %v1637_v52 }
 0x102   : > { %v3151_v18 = vpop.permute.xlu0 %1478  ;;  %v3153_v14 = vpop.permute.xlu1 %1484  ;;  %v1525_v63 = vadd.f32 %v1524_v12, %v1523_v45  ;;  %v1661_v60 = vmul.f32 %v2668_v35, %v1641_v22  ;;  %v1377_v28 = vadd.f32 %v1376_v57, %v1375_v3  ;;  %v1660_v32 = vmul.f32 %v2617_v10, %v3149_v27 }
 0x103   : > { %v1673_v22 = vsel %vm582_vm12, %v1659_v40, 0.0  ;;  %v1515_v27 = vmul.f32 %v2691_v59, %v3153_v14 }
 0x104   : > { %v1674_v44 = vsel %vm582_vm12, %v1661_v60, 0.0  ;;  %v1667_v41 = vsel %vm582_vm12, %v1660_v32, 0.0  ;;  %v1666_v60 = vsel %vm582_vm12, %v1658_v61, 0.0 }
 0x106   : > { %v1483_v23 = vpop.permute.xlu0 %1482  ;;  %v1645_v62 = vpop.permute.xlu1 %1644 }
 0x107   : > { %v1514_v55 = vmul.f32 %v2668_v35, %v1483_v23 }
 0x109   : > { %v1531_v0 = vsel %vm1224_vm14, %v1514_v55, 0.0 }
 0x10a   : > { %v1643_v38 = vpop.permute.xlu0 %1642  ;;  %v1489_v43 = vpop.permute.xlu1 %1488 }
 0x10b   : > { %v1517_v9 = vmul.f32 %v2675_v42, %v1489_v43  ;;  %v1663_v43 = vmul.f32 %v2675_v42, %v1645_v62  ;;  %v1662_v21 = vmul.f32 %v2631_v15, %v1643_v38  ;;  %v3215_v62 = vsub.f32 %v2723_v34, %v1377_v28 }
 0x10d   : > { %v1533_v24 = vsel %vm1224_vm14, %v1517_v9, 0.0  ;;  %v1676_v38 = vsel %vm582_vm12, %v1663_v43, 0.0  ;;  %v1669_v9 = vsel %vm582_vm12, %v1662_v21, 0.0 }
 0x10e   : > { %v1487_v13 = vpop.permute.xlu0 %1486  ;;  %v1647_v26 = vpop.permute.xlu1 %1646 }
 0x10f   : > { %v1516_v7 = vmul.f32 %v2631_v15, %v1487_v13  ;;  %v1664_v55 = vmul.f32 %v2645_v20, %v1647_v26 }
 0x111   : > { %v1526_v50 = vsel %vm1522_vm0, %v1516_v7, 0.0  ;;  %v1249_v7 = vrot.slane %v3183_v1, 7  ;;  %v1671_v43 = vsel %vm582_vm12, %v1664_v55, 0.0 }
 0x112   : > { %v1491_v39 = vpop.permute.xlu0 %1490  ;;  %v1493_v46 = vpop.permute.xlu1 %1492  ;;  %v1527_v11 = vadd.f32 %v1526_v50, %v1525_v63  ;;  %v1530_v50 = vsel %vm1224_vm14, %v1511_v56, 0.0 }
 0x113   : > { %v1519_v8 = vmul.f32 %v2645_v20, %v1493_v46  ;;  %v1512_v46 = vmul.f32 %v2593_v2, %v3151_v18  ;;  %v1532_v14 = vadd.f32 %v1531_v0, %v1530_v50  ;;  %v1539_v18 = vsel %vm1537_vm1, %v1515_v27, 0.0 }
 0x115   : > { %v1528_v13 = vsel %vm1522_vm0, %v1519_v8, 0.0  ;;  %v1518_v8 = vmul.f32 %v2702_v4, %v1491_v39  ;;  %v1534_v56 = vadd.f32 %v1533_v24, %v1532_v14  ;;  %v1389_v24 = vrot.slane %v3215_v62, 6 }
 0x116   : > { %v1529_v52 = vadd.f32 %v1528_v13, %v1527_v11  ;;  %v1649_v12 = vpop.permute.xlu0 %1648  ;;  %v1497_v23 = vpop.permute.xlu1 %1496  ;;  %v1675_v11 = vadd.f32 %v1674_v44, %v1673_v22  ;;  %v1538_v22 = vsel %vm1537_vm1, %v1512_v46, 0.0 }
 0x117   : > { %v1665_v63 = vmul.f32 %v2684_v51, %v1649_v12  ;;  %v1521_v28 = vmul.f32 %v2706_v17, %v1497_v23  ;;  %v1541_v61 = vsel %vm1537_vm1, %v1518_v8, 0.0  ;;  %v1540_v44 = vadd.f32 %v1539_v18, %v1538_v22 }
 0x118   : > { %v3208_v45 = vsub.f32 %v2723_v34, %v1529_v52  ;;  %v1668_v52 = vadd.f32 %v1667_v41, %v1666_v60  ;;  %v1677_v26 = vadd.f32 %v1676_v38, %v1675_v11  ;;  %v1390_v41 = vrot.slane %v3197_v30, 6 }
 0x119   : > { %v1678_v13 = vsel %vm582_vm12, %v1665_v63, 0.0  ;;  %v1543_v21 = vsel %vm1537_vm1, %v1521_v28, 0.0  ;;  %v4053_v63 = vrot.slane %v3140_v58, 7  ;;  %v1542_v14 = vadd.f32 %v1541_v61, %v1540_v44 }
 0x11a   : > { %v1495_v57 = vpop.permute.xlu0 %1494  ;;  %v3220_v40 = vpop.permute.xlu1 %1771  ;;  %1551 = vrot.lane.b32.xlu1 %v3208_v45, %s2411_s24  ;;  %v1670_v27 = vadd.f32 %v1669_v9, %v1668_v52  ;;  %v1679_v50 = vadd.f32 %v1678_v13, %v1677_v26  ;;  %v1391_v60 = vsel %vm727_vm4, %v1389_v24, %v1390_v41  ;;  %v899_v52 = vmul.f32 %v2691_v59, %v2643_v19 }
 0x11b   : > { %v1520_v3 = vmul.f32 %v2684_v51, %v1495_v57  ;;  %v1544_v8 = vadd.f32 %v1543_v21, %v1542_v14 }
 0x11c   : > { %v1672_v46 = vadd.f32 %v1671_v43, %v1670_v27  ;;  %v3252_v55 = vsub.f32 %v2720_v54, %v1679_v50  ;;  %v1806_v43 = vmul.f32 %v2657_v25, %v3220_v40  ;;  %v903_v40 = vmul.f32 %v2645_v20, %v2895_v47 }
 0x11d   : > { %v1535_v32 = vsel %vm1224_vm14, %v1520_v3, 0.0  ;;  %v897_v3 = vmul.f32 %v2617_v10, %v2853_v36  ;;  %v894_v36 = vmul.f32 %v2598_v6, %v2837_v31  ;;  %v3269_v13 = vsub.f32 %v2782_v48, %v1544_v8 }
 0x11e   : > { %v1536_v12 = vadd.f32 %v1535_v32, %v1534_v56  ;;  %v1770_v39 = vpop.permute.xlu0 %1769  ;;  %v1776_v0 = vpop.permute.xlu1 %1775  ;;  %1082 = vrot.lane.b32.xlu1 %v3109_v29, %s2412_s25  ;;  %v1250_v29 = vsel %vm646_vm5, %v4053_v63, %v1249_v7  ;;  %v3259_v11 = vsub.f32 %v2723_v34, %v1672_v46  ;;  %v1685_v28 = vrot.slane %v3252_v55, 6 }
 0x11f   : > { %v1808_v7 = vmul.f32 %v2617_v10, %v1776_v0  ;;  %v1805_v18 = vmul.f32 %v2598_v6, %v1770_v39  ;;  %v896_v10 = vmul.f32 %v2593_v2, %v2861_v5  ;;  %v908_v32 = vsel %vm906_vm6, %v897_v3, 0.0 }
 0x120   : > { %v3240_v23 = vsub.f32 %v2720_v54, %v1536_v12  ;;  %v900_v6 = vmul.f32 %v2631_v15, %v2874_v37  ;;  %v1684_v0 = vrot.slane %v3259_v11, 6  ;;  %v907_v27 = vsel %vm906_vm6, %v894_v36, 0.0 }
 0x121   : > { %v1819_v26 = vsel %vm4028_vm9, %v1808_v7, 0.0  ;;  %v1818_v31 = vsel %vm4028_vm9, %v1805_v18, 0.0  ;;  %v924_v63 = vsel %vm922_vm8, %v899_v52, 0.0  ;;  %v1825_v18 = vsel %vm582_vm12, %v1806_v43, 0.0 }
 0x122   : > { %v1774_v57 = vpop.permute.xlu0 %1773  ;;  %1553 = vrot.lane.b32.xlu0 %v3240_v23, %s2411_s24  ;;  %v1780_v38 = vpop.permute.xlu1 %1779  ;;  %1255 = vrot.lane.b32.xlu1 %v1250_v29, %s2411_s24  ;;  %v1820_v61 = vadd.f32 %v1819_v26, %v1818_v31  ;;  %v1686_v44 = vsel %vm727_vm4, %v1684_v0, %v1685_v28  ;;  %v905_v43 = vmul.f32 %v2706_v17, %v2759_v16 }
 0x123   : > { %v1810_v12 = vmul.f32 %v2691_v59, %v1780_v38  ;;  %v1807_v19 = vmul.f32 %v2593_v2, %v1774_v57 }
 0x125   : > { %v1834_v50 = vsel %vm4027_vm13, %v1810_v12, 0.0  ;;  %v1833_v46 = vsel %vm4027_vm13, %v1807_v19, 0.0  ;;  %v902_v12 = vmul.f32 %v2702_v4, %v2728_v49 }
 0x126   : > { %v1778_v56 = vpop.permute.xlu0 %1777  ;;  %1392 = vrot.lane.b32.xlu0 %v1389_v24, %s2411_s24  ;;  %v1784_v9 = vpop.permute.xlu1 %1783  ;;  %1394 = vrot.lane.b32.xlu1 %v1391_v60, %s2411_s24  ;;  %v1835_v8 = vadd.f32 %v1834_v50, %v1833_v46  ;;  %v909_v60 = vadd.f32 %v908_v32, %v907_v27  ;;  %v957_v32 = vmul.f32 %v2684_v51, %v2826_v53  ;;  %v4055_v27 = vld [vmem:[#allocation3_spill] sm:$0xff] }
 0x127   : > { %v1809_v22 = vmul.f32 %v2668_v35, %v1778_v56  ;;  %v1812_v21 = vmul.f32 %v2675_v42, %v1784_v9  ;;  %v3340_v50 = vsub.f32 %v2723_v34, %v4055_v27 }
 0x128   : > { %v970_v49 = vsel %vm914_vm3, %v957_v32, 0.0 }
 0x129   : > { %v1826_v14 = vsel %vm582_vm12, %v1809_v22, 0.0  ;;  %v1828_v56 = vsel %vm582_vm12, %v1812_v21, 0.0 }
 0x12a   : > { %v1782_v5 = vpop.permute.xlu0 %1781  ;;  %1396 = vrot.lane.b32.xlu0 %v1390_v41, %s2411_s24  ;;  %v1788_v39 = vpop.permute.xlu1 %1787  ;;  %1555 = vrot.lane.b32.xlu1 %v3269_v13, %s2411_s24  ;;  %v1827_v47 = vadd.f32 %v1826_v14, %v1825_v18  ;;  %v976_v14 = vrot.slane %v3340_v50, 6 }
 0x12b   : > { %v1811_v59 = vmul.f32 %v2631_v15, %v1782_v5  ;;  %v1814_v37 = vmul.f32 %v2645_v20, %v1788_v39  ;;  %v923_v15 = vsel %vm922_vm8, %v896_v10, 0.0  ;;  %v910_v20 = vsel %vm906_vm6, %v900_v6, 0.0 }
 0x12c   : > { %v1829_v5 = vadd.f32 %v1828_v56, %v1827_v47  ;;  %v911_v19 = vadd.f32 %v910_v20, %v909_v60 }
 0x12d   : > { %v1821_v2 = vsel %vm4028_vm9, %v1811_v59, 0.0  ;;  %v1823_v24 = vsel %vm4028_vm9, %v1814_v37, 0.0  ;;  %v926_v37 = vsel %vm922_vm8, %v902_v12, 0.0 }
 0x12e   : > { %v1822_v29 = vadd.f32 %v1821_v2, %v1820_v61  ;;  %v1786_v41 = vpop.permute.xlu0 %1785  ;;  %1687 = vrot.lane.b32.xlu0 %v1684_v0, %s2412_s25  ;;  %1689 = vrot.lane.b32.xlu1 %v1686_v44, %s2412_s25  ;;  %v1792_v38 = vpop.permute.xlu1 %1791  ;;  %v925_v0 = vadd.f32 %v924_v63, %v923_v15  ;;  %v4054_v61 = vld [vmem:[#allocation8_spill] sm:$0xff] }
 0x12f   : > { %v1813_v57 = vmul.f32 %v2702_v4, %v1786_v41  ;;  %v1816_v7 = vmul.f32 %v2706_v17, %v1792_v38  ;;  %v912_v4 = vsel %vm906_vm6, %v903_v40, 0.0  ;;  %v4057_v40 = vld [vmem:[#allocation9_spill] sm:$0xff] }
 0x130   : > { %v1824_v3 = vadd.f32 %v1823_v24, %v1822_v29  ;;  %v913_v2 = vadd.f32 %v912_v4, %v911_v19  ;;  %v4056_v24 = vld [vmem:[#allocation2_spill] sm:$0xff]  ;;  %v927_v17 = vadd.f32 %v926_v37, %v925_v0  ;;  %v928_v29 = vsel %vm922_vm8, %v905_v43, 0.0  ;;  %v4058_v19 = vld [vmem:[#allocation4_spill] sm:$0xff] }
 0x131   : > { %v1836_v9 = vsel %vm4027_vm13, %v1813_v57, 0.0  ;;  %v1838_v10 = vsel %vm4027_vm13, %v1816_v7, 0.0  ;;  %v971_v15 = vadd.f32 %v970_v49, %v4056_v24  ;;  %v4060_v43 = vld [vmem:[#allocation6_spill] sm:$0xff] }
 0x132   : > { %v1837_v36 = vadd.f32 %v1836_v9, %v1835_v8  ;;  %v1790_v52 = vpop.permute.xlu0 %1789  ;;  %1691 = vrot.lane.b32.xlu0 %v1685_v28, %s2412_s25  ;;  %v3313_v26 = vsub.f32 %v2723_v34, %v1824_v3  ;;  %v653_v39 = vpop.permute.xlu1 %652  ;;  %v3354_v46 = vsub.f32 %v2723_v34, %v913_v2  ;;  %v929_v38 = vadd.f32 %v928_v29, %v927_v17  ;;  %v4061_v2 = vld [vmem:[#allocation7_spill] sm:$0xff] }
 0x133   : > { %v1815_v31 = vmul.f32 %v2684_v51, %v1790_v52  ;;  %vm660_vm14 = vcmp.lt.f32.partialorder %v2925_v33, %v653_v39  ;;  %v3358_v57 = vsub.f32 %v2720_v54, %v971_v15  ;;  %v904_v24 = vmul.f32 %v2684_v51, %v4061_v2 }
 0x134   : > { %v1839_v6 = vadd.f32 %v1838_v10, %v1837_v36  ;;  %1846 = vrot.lane.b32.xlu1 %v3313_v26, %s2412_s25  ;;  %v663_v21 = vsel %vm660_vm14, %v2925_v33, %v653_v39  ;;  %v1021_v7 = vadd.f32 %v976_v14, %v3354_v46  ;;  %v3367_v34 = vsub.f32 %v2782_v48, %v929_v38 }
 0x135   : > { %v1830_v28 = vsel %vm582_vm12, %v1815_v31, 0.0  ;;  %v977_v9 = vrot.slane %v3358_v57, 6  ;;  %v920_v17 = vsel %vm914_vm3, %v904_v24, 0.0 }
 0x136   : > { %v1831_v22 = vadd.f32 %v1830_v28, %v1829_v5  ;;  %v651_v59 = vpop.permute.xlu0 %650  ;;  %v3325_v53 = vsub.f32 %v2782_v48, %v1839_v6  ;;  %v669_v63 = vpop.permute.xlu1 %668  ;;  %v3384_v5 = vmax.f32 %v3354_v46, %v976_v14 }
 0x137   : > { %vm659_vm15 = vcmp.lt.f32.partialorder %v4054_v61, %v651_v59  ;;  %v1023_v36 = vadd.f32 %v977_v9, %v3367_v34  ;;  %v3376_v52 = vmax.f32 %v3367_v34, %v977_v9 }
 0x138   : > { %v3334_v44 = vsub.f32 %v2720_v54, %v1831_v22  ;;  %1850 = vrot.lane.b32.xlu1 %v3325_v53, %s2412_s25  ;;  %v662_v41 = vsel %vm659_vm15, %v4054_v61, %v651_v59  ;;  %v674_v60 = vsel %vm659_vm15, 2, %v669_v63  ;;  %v895_v22 = vmul.f32 %v2657_v25, %v4058_v19  ;;  %v4059_v59 = vld [vmem:[#allocation5_spill] sm:$0xff] }
 0x139   : > { %v898_v4 = vmul.f32 %v2668_v35, %v4059_v59  ;;  %v901_v61 = vmul.f32 %v2675_v42, %v4060_v43  ;;  %v978_v63 = vsel %vm727_vm4, %v976_v14, %v977_v9 }
 0x13a   : > { %v655_v16 = vpop.permute.xlu0 %654  ;;  %1848 = vrot.lane.b32.xlu0 %v3334_v44, %s2412_s25  ;;  %v673_v18 = vpop.permute.xlu1 %672  ;;  %v915_v49 = vsel %vm914_vm3, %v895_v22, 0.0 }
 0x13b   : > { %vm661_vm0 = vcmp.lt.f32.partialorder %v4057_v40, %v655_v16  ;;  %v916_v37 = vsel %vm914_vm3, %v898_v4, 0.0 }
 0x13c   : > { %682 = vrot.lane.b32.xlu1 %v663_v21, %s2414_s30  ;;  %v664_v3 = vsel %vm661_vm0, %v4057_v40, %v655_v16  ;;  %v676_v47 = vsel %vm661_vm0, 2, %v673_v18  ;;  %v917_v27 = vadd.f32 %v916_v37, %v915_v49  ;;  %v918_v21 = vsel %vm914_vm3, %v901_v61, 0.0 }
 0x13e   : > { %v671_v8 = vpop.permute.xlu0 %670  ;;  %680 = vrot.lane.b32.xlu0 %v662_v41, %s2414_s30  ;;  %v919_v15 = vadd.f32 %v918_v21, %v917_v27 }
 0x13f   : > { %v675_v10 = vsel %vm660_vm14, 2, %v671_v8 }
 0x140   : > { %695 = vrot.lane.b32.xlu1 %v674_v60, %s2414_s30  ;;  %v921_v25 = vadd.f32 %v920_v17, %v919_v15 }
 0x142   : > { %684 = vrot.lane.b32.xlu0 %v664_v3, %s2414_s30  ;;  %v3407_v16 = vsub.f32 %v2720_v54, %v921_v25 }
 0x143   : > { %v1081_v56 = vpop.permute.xlu0 %1080 }
 0x144   : > { %v1150_v20 = vadd.f32 %v1081_v56, %v1021_v7  ;;  %699 = vrot.lane.b32.xlu1 %v676_v47, %s2414_s30  ;;  %v3387_v6 = vmax.f32 %v3384_v5, %v1081_v56  ;;  %v1022_v29 = vadd.f32 %v978_v63, %v3407_v16  ;;  %v3412_v42 = vmax.f32 %v3407_v16, %v978_v63 }
 0x146   : > { %697 = vrot.lane.b32.xlu0 %v675_v10, %s2414_s30  ;;  %v1107_v14 = vrot.slane %v3387_v6, 1 }
 0x148   : > { %v1085_v48 = vpop.permute.xlu0 %1084 }
 0x149   : > { %v3379_v32 = vmax.f32 %v3376_v52, %v1085_v48  ;;  %v1152_v12 = vadd.f32 %v1085_v48, %v1023_v36 }
 0x14b   : > { %v1110_v31 = vrot.slane %v3379_v32, 1 }
 0x14d   : > { %1116 = vrot.lane.b32.xlu0 %v1110_v31, %s2411_s24 }
 0x158   : > { %v1252_v33 = vpop.permute.xlu1 %1251 }
 0x159   : > { %v3390_v39 = vmax.f32 %v3387_v6, %v1252_v33  ;;  %v1321_v0 = vadd.f32 %v1252_v33, %v1150_v20 }
 0x15b   : > { %v1278_v27 = vrot.slane %v3390_v39, 1 }
 0x15f   : > { %v1254_v41 = vpop.permute.xlu0 %1253 }
 0x18c   : > { %v1552_v35 = vpop.permute.xlu1 %1551 }
 0x190   : > { %v1083_v40 = vpop.permute.xlu1 %1082 }
 0x191   : > { %v3415_v38 = vmax.f32 %v3412_v42, %v1083_v40  ;;  %v1151_v51 = vadd.f32 %v1083_v40, %v1022_v29 }
 0x193   : > { %v3418_v8 = vmax.f32 %v3415_v38, %v1254_v41  ;;  %v1108_v54 = vrot.slane %v3415_v38, 1  ;;  %v1322_v3 = vadd.f32 %v1254_v41, %v1151_v51 }
 0x194   : > { %v1554_v7 = vpop.permute.xlu0 %1553  ;;  %v1256_v60 = vpop.permute.xlu1 %1255 }
 0x195   : > { %v3425_v56 = vmax.f32 %v3379_v32, %v1256_v60  ;;  %v1323_v9 = vadd.f32 %v1256_v60, %v1152_v12  ;;  %v1111_v20 = vsel %vm440_vm2, %v1108_v54, %v1110_v31  ;;  %v1109_v47 = vsel %vm440_vm2, %v1107_v14, %v1108_v54 }
 0x196   : > { %1114 = vrot.lane.b32.xlu1 %v1111_v20, %s2411_s24  ;;  %1112 = vrot.lane.b32.xlu0 %v1109_v47, %s2411_s24  ;;  %v1279_v33 = vrot.slane %v3418_v8, 1 }
 0x197   : > { %v1281_v36 = vrot.slane %v3425_v56, 1 }
 0x198   : > { %v1393_v10 = vpop.permute.xlu0 %1392  ;;  %v1395_v48 = vpop.permute.xlu1 %1394  ;;  %v1280_v17 = vsel %vm440_vm2, %v1278_v27, %v1279_v33 }
 0x199   : > { %v3434_v19 = vmax.f32 %v3390_v39, %v1393_v10  ;;  %v1453_v22 = vadd.f32 %v1393_v10, %v1321_v0  ;;  %v3437_v12 = vmax.f32 %v3418_v8, %v1395_v48  ;;  %v1454_v31 = vadd.f32 %v1395_v48, %v1322_v3 }
 0x19a   : > { %v1282_v59 = vsel %vm440_vm2, %v1279_v33, %v1281_v36  ;;  %1287 = vrot.lane.b32.xlu1 %v1281_v36, %s2412_s25 }
 0x19b   : > { %1285 = vrot.lane.b32.xlu0 %v1282_v59, %s2412_s25  ;;  %v3445_v49 = vmax.f32 %v3434_v19, %v1552_v35  ;;  %v1611_v37 = vadd.f32 %v1552_v35, %v1453_v22  ;;  %v3451_v21 = vmax.f32 %v3437_v12, %v1554_v7  ;;  %v1612_v2 = vadd.f32 %v1554_v7, %v1454_v31  ;;  %v3539_v22 = vld [vmem:[%s2915_s29 + $0x10] sm:$0x3] }
 0x19c   : > { %v1397_v43 = vpop.permute.xlu0 %1396  ;;  %v1556_v61 = vpop.permute.xlu1 %1555  ;;  %v1420_v25 = vrot.slane %v3437_v12, 2  ;;  %v1419_v7 = vrot.slane %v3434_v19, 2  ;;  %4072 = vst [vmem:[#allocation21_spill] sm:$0xff] %v3539_v22 }
 0x19d   : > { %4062 = vst [vmem:[#allocation8_spill] sm:$0xff] %v3451_v21  ;;  %v3454_v24 = vmax.f32 %v3425_v56, %v1397_v43  ;;  %v1455_v15 = vadd.f32 %v1397_v43, %v1323_v9 }
 0x19e   : > { %1283 = vrot.lane.b32.xlu1 %v1280_v17, %s2412_s25  ;;  %v1421_v10 = vsel %vm595_vm7, %v1419_v7, %v1420_v25 }
 0x19f   : > { %v3465_v41 = vmax.f32 %v3454_v24, %v1556_v61  ;;  %v1613_v40 = vadd.f32 %v1556_v61, %v1455_v15  ;;  %1578 = vrot.lane.b32.xlu0 %v3445_v49, %s2412_s25  ;;  %v1422_v3 = vrot.slane %v3454_v24, 2 }
 0x1a0   : > { %v1688_v51 = vpop.permute.xlu0 %1687  ;;  %v1690_v54 = vpop.permute.xlu1 %1689 }
 0x1a1   : > { %v3473_v60 = vmax.f32 %v3445_v49, %v1688_v51  ;;  %v1748_v14 = vadd.f32 %v1688_v51, %v1611_v37  ;;  %v3478_v20 = vmax.f32 %v3451_v21, %v1690_v54  ;;  %v1749_v47 = vadd.f32 %v1690_v54, %v1612_v2 }
 0x1a2   : > { %v1423_v36 = vsel %vm595_vm7, %v1420_v25, %v1422_v3 }
 0x1a3   : > { %4063 = vst [vmem:[#allocation3_spill] sm:$0xff] %v3473_v60  ;;  %4064 = vst [vmem:[#allocation2_spill] sm:$0xff] %v3478_v20  ;;  %1426 = vrot.lane.b32.xlu1 %v1423_v36, %s2412_s25  ;;  %1424 = vrot.lane.b32.xlu0 %v1421_v10, %s2412_s25  ;;  %v1715_v43 = vrot.slane %v3478_v20, 2  ;;  %v1714_v2 = vrot.slane %v3473_v60, 2  ;;  %v3521_v10 = vld [vmem:[%s2915_s29 + $0x8] sm:$0xff] }
 0x1a4   : > { %v1692_v33 = vpop.permute.xlu0 %1691 }
 0x1a5   : > { %v3489_v31 = vmax.f32 %v3465_v41, %v1692_v33  ;;  %v1750_v59 = vadd.f32 %v1692_v33, %v1613_v40  ;;  %v1716_v25 = vsel %vm595_vm7, %v1714_v2, %v1715_v43 }
 0x1a6   : > { %v1847_v37 = vpop.permute.xlu1 %1846 }
 0x1a7   : > { %4065 = vst [vmem:[#allocation9_spill] sm:$0xff] %v3489_v31  ;;  %v3494_v27 = vadd.f32 %v1847_v37, %v1748_v14  ;;  %1580 = vrot.lane.b32.xlu1 %v3451_v21, %s2412_s25  ;;  %1582 = vrot.lane.b32.xlu0 %v3465_v41, %s2412_s25  ;;  %v1717_v15 = vrot.slane %v3489_v31, 2  ;;  %v3509_v3 = vmax.f32 %v3473_v60, %v1847_v37  ;;  %v3531_v37 = vld [vmem:[%s2915_s29] sm:$0xff] }
 0x1a9   : > { %4066 = vst [vmem:[#allocation4_spill] sm:$0xff] %v3494_v27  ;;  %v1718_v40 = vsel %vm595_vm7, %v1715_v43, %v1717_v15  ;;  %4068 = vst [vmem:[#allocation6_spill] sm:$0xff] %v3509_v3 }
 0x1aa   : > { %v1851_v17 = vpop.permute.xlu1 %1850 }
 0x1ab   : > { %v3504_v51 = vadd.f32 %v1851_v17, %v1750_v59  ;;  %1719 = vrot.lane.b32.xlu1 %v1716_v25, %s2411_s24  ;;  %1721 = vrot.lane.b32.xlu0 %v1718_v40, %s2411_s24 }
 0x1ac   : > { %v1849_v54 = vpop.permute.xlu0 %1848 }
 0x1ad   : > { %4067 = vst [vmem:[#allocation5_spill] sm:$0xff] %v3504_v51  ;;  %v3512_v7 = vmax.f32 %v3478_v20, %v1849_v54  ;;  %v3514_v14 = vadd.f32 %v1849_v54, %v1749_v47  ;;  %v3528_v47 = vmax.f32 %v3489_v31, %v1851_v17 }
 0x1ae   : > { %v683_v36 = vpop.permute.xlu1 %682 }
 0x1af   : > { %4069 = vst [vmem:[#allocation7_spill] sm:$0xff] %v3512_v7  ;;  %4070 = vst [vmem:[#allocation19_spill] sm:$0xff] %v3514_v14  ;;  %1873 = vrot.lane.b32.xlu1 %v3509_v3, %s2411_s24  ;;  %1875 = vrot.lane.b32.xlu0 %v3512_v7, %s2411_s24  ;;  %vm690_vm3 = vcmp.lt.f32.partialorder %v3521_v10, %v683_v36 }
 0x1b0   : > { %v681_v33 = vpop.permute.xlu0 %680  ;;  %v693_v59 = vsel %vm690_vm3, %v3521_v10, %v683_v36  ;;  %4071 = vst [vmem:[#allocation20_spill] sm:$0xff] %v3528_v47 }
 0x1b1   : > { %vm689_vm1 = vcmp.lt.f32.partialorder %v3531_v37, %v681_v33  ;;  %v708_v43 = vrot.slane %v693_v59, 1 }
 0x1b2   : > { %v692_v2 = vsel %vm689_vm1, %v3531_v37, %v681_v33  ;;  %v696_v15 = vpop.permute.xlu1 %695 }
 0x1b3   : > { %v707_v25 = vrot.slane %v692_v2, 1  ;;  %1877 = vrot.lane.b32.xlu1 %v3528_v47, %s2411_s24  ;;  %v701_v59 = vsel %vm689_vm1, 3, %v696_v15 }
 0x1b4   : > { %v685_v40 = vpop.permute.xlu0 %684  ;;  %v718_v4 = vrot.slane %v701_v59, 1 }
 0x1b5   : > { %v709_v54 = vsel %vm440_vm2, %v707_v25, %v708_v43  ;;  %vm691_vm6 = vcmp.lt.f32.partialorder %v3539_v22, %v685_v40 }
 0x1b6   : > { %vm714_vm8 = vcmp.lt.f32.partialorder %v3531_v37, %v709_v54  ;;  %v694_v17 = vsel %vm691_vm6, %v3539_v22, %v685_v40  ;;  %v700_v61 = vpop.permute.xlu1 %699 }
 0x1b7   : > { %v716_v33 = vsel %vm714_vm8, %v3531_v37, %v709_v54  ;;  %v710_v2 = vrot.slane %v694_v17, 1  ;;  %v703_v63 = vsel %vm691_vm6, 3, %v700_v61 }
 0x1b8   : > { %v698_v48 = vpop.permute.xlu0 %697  ;;  %v728_v9 = vrot.slane %v716_v33, 6  ;;  %v721_v35 = vrot.slane %v703_v63, 1 }
 0x1b9   : > { %v702_v25 = vsel %vm690_vm3, 3, %v698_v48  ;;  %v711_v29 = vsel %vm440_vm2, %v708_v43, %v710_v2 }
 0x1ba   : > { %v719_v0 = vrot.slane %v702_v25, 1  ;;  %vm715_vm14 = vcmp.lt.f32.partialorder %v3521_v10, %v711_v29  ;;  %vm734_vm15 = vcmp.lt.f32.partialorder %v3531_v37, %v728_v9 }
 0x1bb   : > { %v717_v15 = vsel %vm715_vm14, %v3521_v10, %v711_v29  ;;  %v737_v48 = vsel %vm734_vm15, %v3531_v37, %v728_v9 }
 0x1bc   : > { %v720_v40 = vsel %vm440_vm2, %v718_v4, %v719_v0  ;;  %v729_v17 = vrot.slane %v717_v15, 6  ;;  %v722_v61 = vsel %vm440_vm2, %v719_v0, %v721_v35  ;;  %v749_v25 = vrot.slane %v737_v48, 2 }
 0x1bd   : > { %v723_v63 = vsel %vm714_vm8, 4, %v720_v40  ;;  %v724_v36 = vsel %vm715_vm14, 4, %v722_v61 }
 0x1be   : > { %v740_v43 = vrot.slane %v723_v63, 6  ;;  %v741_v59 = vrot.slane %v724_v36, 6  ;;  %v730_v33 = vsel %vm727_vm4, %v728_v9, %v729_v17  ;;  %vm736_vm0 = vcmp.lt.f32.partialorder %v3539_v22, %v729_v17  ;;  %v4073_v9 = vld [vmem:[#allocation15_spill] sm:$0xff] }
 0x1bf   : > { %vm735_vm3 = vcmp.lt.f32.partialorder %v3521_v10, %v730_v33  ;;  %v739_v4 = vsel %vm736_vm0, %v3539_v22, %v729_v17 }
 0x1c0   : > { %v738_v0 = vsel %vm735_vm3, %v3521_v10, %v730_v33  ;;  %v752_v35 = vrot.slane %v739_v4, 2  ;;  %v742_v29 = vsel %vm727_vm4, %v740_v43, %v741_v59  ;;  %v745_v54 = vsel %vm736_vm0, 5, %v741_v59  ;;  %v4075_v59 = vld [vmem:[#allocation18_spill] sm:$0xff]  ;;  %v4076_v33 = vld [vmem:[#allocation13_spill] sm:$0xff] }
 0x1c1   : > { %v750_v2 = vrot.slane %v738_v0, 2  ;;  %v744_v15 = vsel %vm735_vm3, 5, %v742_v29  ;;  %v767_v40 = vrot.slane %v745_v54, 2  ;;  %v743_v61 = vsel %vm734_vm15, 5, %v740_v43  ;;  %v4074_v43 = vld [vmem:[#allocation11_spill] sm:$0xff] }
 0x1c2   : > { %v765_v18 = vrot.slane %v744_v15, 2  ;;  %v764_v28 = vrot.slane %v743_v61, 2 }
 0x1c3   : > { %v753_v63 = vsel %vm595_vm7, %v750_v2, %v752_v35  ;;  %v751_v36 = vsel %vm595_vm7, %v749_v25, %v750_v2 }
 0x1c4   : > { %756 = vrot.lane.b32.xlu1 %v753_v63, %s2415_s6  ;;  %754 = vrot.lane.b32.xlu0 %v751_v36, %s2415_s6  ;;  %v768_v17 = vsel %vm595_vm7, %v765_v18, %v767_v40  ;;  %v766_v48 = vsel %vm595_vm7, %v764_v28, %v765_v18  ;;  %v1117_v18 = vpop.permute.xlu0 %1116 }
 0x1c5   : > { %v1123_v7 = vsub.f32 %v4076_v33, %v1117_v18 }
 0x1c8   : > { %771 = vrot.lane.b32.xlu1 %v768_v17, %s2415_s6  ;;  %769 = vrot.lane.b32.xlu0 %v766_v48, %s2415_s6 }
 0x1cc   : > { %1158 = vrot.lane.b32.xlu1 %v4073_v9, %s2412_s25  ;;  %1156 = vrot.lane.b32.xlu0 %v4074_v43, %s2412_s25 }
 0x1d0   : > { %1327 = vrot.lane.b32.xlu1 %v4075_v59, %s2411_s24  ;;  %1160 = vrot.lane.b32.xlu0 %v4076_v33, %s2412_s25 }
 0x1d4   : > { %1331 = vrot.lane.b32.xlu1 %v3183_v1, %s2411_s24  ;;  %1329 = vrot.lane.b32.xlu0 %v3140_v58, %s2411_s24 }
 0x208   : > { %v1115_v28 = vpop.permute.xlu1 %1114  ;;  %v1113_v4 = vpop.permute.xlu0 %1112 }
 0x209   : > { %v1122_v17 = vsub.f32 %v4073_v9, %v1115_v28  ;;  %v1121_v48 = vsub.f32 %v4074_v43, %v1113_v4 }
 0x20b   : > { %v1126_v27 = vmul.f32 1.442695, %v1122_v17  ;;  %v1124_v20 = vmul.f32 1.442695, %v1121_v48  ;;  %v1128_v17 = vmul.f32 1.442695, %v1123_v7 }
 0x20c   : > { %v3588_v0 = vpop.permute.xlu1 %1287 }
 0x20d   : > { %v3590_v35 = vpop.permute.xlu0 %1285  ;;  %2316 = vpow2.f32 %v1126_v27 }
 0x20e   : > { %2318 = vpow2.f32 %v1124_v20 }
 0x20f   : > { %2320 = vpow2.f32 %v1128_v17 }
 0x210   : > { %v1284_v29 = vpop.permute.xlu1 %1283 }
 0x211   : > { %v1579_v54 = vpop.permute.xlu0 %1578  ;;  %v1292_v33 = vsub.f32 %v4075_v59, %v1284_v29 }
 0x212   : > { %v1587_v43 = vsub.f32 %v3208_v45, %v1579_v54 }
 0x214   : > { %v1590_v20 = vmul.f32 1.442695, %v1587_v43  ;;  %v1295_v43 = vmul.f32 1.442695, %v1292_v33 }
 0x215   : > { %v3592_v2 = vpop.permute.xlu1 %1426  ;;  %v3594_v25 = vpop.permute.xlu0 %1424 }
 0x216   : > { %2322 = vpow2.f32 %v1590_v20 }
 0x217   : > { %2324 = vpow2.f32 %v1295_v43 }
 0x219   : > { %v3596_v15 = vpop.permute.xlu1 %1580  ;;  %v3598_v40 = vpop.permute.xlu0 %1582 }
 0x21d   : > { %v3600_v61 = vpop.permute.xlu1 %1719  ;;  %v3602_v63 = vpop.permute.xlu0 %1721 }
 0x221   : > { %v3604_v36 = vpop.permute.xlu1 %1873  ;;  %v3608_v14 = vpop.permute.xlu0 %1875 }
 0x225   : > { %v3610_v51 = vpop.permute.xlu1 %1877 }
 0x236   : > { %v757_v47 = vpop.permute.xlu1 %756  ;;  %v755_v31 = vpop.permute.xlu0 %754 }
 0x237   : > { %vm761_vm1 = vcmp.lt.f32.partialorder %v3521_v10, %v757_v47  ;;  %vm760_vm6 = vcmp.lt.f32.partialorder %v3531_v37, %v755_v31 }
 0x238   : > { %v763_v21 = vsel %vm761_vm1, %v3521_v10, %v757_v47  ;;  %v762_v9 = vsel %vm760_vm6, %v3531_v37, %v755_v31 }
 0x239   : > { %v778_v28 = vrot.slane %v763_v21, 6  ;;  %v777_v4 = vrot.slane %v762_v9, 6 }
 0x23a   : > { %v772_v18 = vpop.permute.xlu1 %771  ;;  %v770_v48 = vpop.permute.xlu0 %769 }
 0x23b   : > { %vm785_vm8 = vcmp.lt.f32.partialorder %v3539_v22, %v778_v28  ;;  %v774_v3 = vsel %vm761_vm1, 6, %v772_v18  ;;  %v779_v47 = vsel %vm727_vm4, %v777_v4, %v778_v28  ;;  %vm783_vm14 = vcmp.lt.f32.partialorder %v3531_v37, %v777_v4 }
 0x23c   : > { %v788_v60 = vsel %vm785_vm8, %v3539_v22, %v778_v28  ;;  %v790_v27 = vrot.slane %v774_v3, 6  ;;  %vm784_vm15 = vcmp.lt.f32.partialorder %v3521_v10, %v779_v47  ;;  %v786_v21 = vsel %vm783_vm14, %v3531_v37, %v777_v4 }
 0x23d   : > { %v801_v7 = vrot.slane %v788_v60, 1  ;;  %v773_v59 = vsel %vm760_vm6, 6, %v770_v48  ;;  %v787_v29 = vsel %vm784_vm15, %v3521_v10, %v779_v47  ;;  %v798_v9 = vrot.slane %v786_v21, 1 }
 0x23e   : > { %v794_v54 = vsel %vm785_vm8, 7, %v790_v27  ;;  %v789_v18 = vrot.slane %v773_v59, 6  ;;  %v799_v28 = vrot.slane %v787_v29, 1  ;;  %v1293_v3 = vsub.f32 %v3140_v58, %v3590_v35  ;;  %v2317_v59 = vpop.eup %2316 }
 0x23f   : > { %v818_v22 = vrot.slane %v794_v54, 1  ;;  %807 = vrot.lane.b32.xlu0 %v801_v7, %s2412_s25  ;;  %v1588_v60 = vsub.f32 %v3240_v23, %v3596_v15  ;;  %v1589_v58 = vsub.f32 %v3269_v13, %v3598_v40  ;;  %v1294_v15 = vsub.f32 %v3183_v1, %v3588_v0  ;;  %v2319_v4 = vpop.eup %2318 }
 0x240   : > { %v791_v31 = vsel %vm727_vm4, %v789_v18, %v790_v27  ;;  %v792_v48 = vsel %vm783_vm14, 7, %v789_v18  ;;  %v800_v17 = vsel %vm440_vm2, %v798_v9, %v799_v28  ;;  %v1297_v33 = vmul.f32 1.442695, %v1293_v3  ;;  %v2321_v18 = vpop.eup %2320 }
 0x241   : > { %v793_v21 = vsel %vm784_vm15, 7, %v791_v31  ;;  %824 = vrot.lane.b32.xlu1 %v818_v22, %s2412_s25  ;;  %v1430_v47 = vsub.f32 %v3215_v62, %v3594_v25  ;;  %v1592_v27 = vmul.f32 1.442695, %v1588_v60  ;;  %v815_v29 = vrot.slane %v792_v48, 1 }
 0x242   : > { %v816_v35 = vrot.slane %v793_v21, 1  ;;  %v802_v20 = vsel %vm440_vm2, %v799_v28, %v801_v7  ;;  %v1594_v40 = vmul.f32 1.442695, %v1589_v58  ;;  %v1299_v9 = vmul.f32 1.442695, %v1294_v15 }
 0x243   : > { %803 = vrot.lane.b32.xlu0 %v800_v17, %s2412_s25  ;;  %2326 = vpow2.f32 %v1297_v33  ;;  %v1431_v1 = vsub.f32 %v3197_v30, %v3592_v2  ;;  %v1432_v0 = vmul.f32 1.442695, %v1430_v47  ;;  %v1133_v3 = vrot.slane %v2319_v4, 7 }
 0x244   : > { %v819_v54 = vsel %vm440_vm2, %v816_v35, %v818_v22  ;;  %2328 = vpow2.f32 %v1592_v27  ;;  %v817_v25 = vsel %vm440_vm2, %v815_v29, %v816_v35  ;;  %v1134_v7 = vrot.slane %v2317_v59, 7  ;;  %v2323_v22 = vpop.eup %2322 }
 0x245   : > { %805 = vrot.lane.b32.xlu1 %v802_v20, %s2412_s25  ;;  %2330 = vpow2.f32 %v1594_v40  ;;  %v1136_v28 = vrot.slane %v2321_v18, 7  ;;  %v1434_v60 = vmul.f32 1.442695, %v1431_v1  ;;  %v1882_v2 = vsub.f32 %v3313_v26, %v3604_v36  ;;  %v2325_v43 = vpop.eup %2324 }
 0x246   : > { %2332 = vpow2.f32 %v1299_v9  ;;  %v1725_v48 = vsub.f32 %v3259_v11, %v3600_v61  ;;  %v1883_v21 = vsub.f32 %v3334_v44, %v3608_v14  ;;  %v1135_v58 = vsel %vm646_vm5, %v1133_v3, %v1134_v7 }
 0x247   : > { %822 = vrot.lane.b32.xlu0 %v819_v54, %s2412_s25  ;;  %2334 = vpow2.f32 %v1432_v0  ;;  %v1137_v31 = vsel %vm646_vm5, %v1134_v7, %v1136_v28  ;;  %v1304_v59 = vrot.slane %v2325_v43, 7  ;;  %v1885_v36 = vmul.f32 1.442695, %v1882_v2 }
 0x248   : > { %2336 = vpow2.f32 %v1434_v60  ;;  %v1727_v15 = vmul.f32 1.442695, %v1725_v48  ;;  %v1726_v33 = vsub.f32 %v3252_v55, %v3602_v63  ;;  %v1887_v47 = vmul.f32 1.442695, %v1883_v21 }
 0x249   : > { %820 = vrot.lane.b32.xlu1 %v817_v25, %s2412_s25  ;;  %2338 = vpow2.f32 %v1885_v36  ;;  %v1884_v29 = vsub.f32 %v3325_v53, %v3610_v51  ;;  %v1459_v43 = vrot.slane %v3215_v62, 7  ;;  %v1460_v48 = vrot.slane %v3197_v30, 7 }
 0x24a   : > { %2340 = vpow2.f32 %v1727_v15  ;;  %v1729_v40 = vmul.f32 1.442695, %v1726_v33  ;;  %v1912_v36 = vrot.slane %v3313_v26, 1  ;;  %v1915_v15 = vrot.slane %v3325_v53, 1  ;;  %v4078_v33 = vld [vmem:[#allocation17_spill] sm:$0xff]  ;;  %v4079_v26 = vld [vmem:[#allocation10_spill] sm:$0xff] }
 0x24b   : > { %1138 = vrot.lane.b32.xlu0 %v1133_v3, %s2412_s25  ;;  %2342 = vpow2.f32 %v1887_v47  ;;  %v1889_v1 = vmul.f32 1.442695, %v1884_v29  ;;  %v1461_v21 = vsel %vm646_vm5, %v1459_v43, %v1460_v48  ;;  %v4080_v53 = vld [vmem:[#allocation14_spill] sm:$0xff]  ;;  %v997_v47 = vrot.slane %v3384_v5, 2 }
 0x24c   : > { %2344 = vpow2.f32 %v1729_v40 }
 0x24d   : > { %1599 = vrot.lane.b32.xlu1 %v2323_v22, %s2411_s24  ;;  %v2327_v35 = vpop.eup %2326  ;;  %2346 = vpow2.f32 %v1889_v1 }
 0x24e   : > { %v2329_v17 = vpop.eup %2328  ;;  %v1305_v4 = vrot.slane %v2327_v35, 7  ;;  %v1617_v35 = vrot.slane %v3208_v45, 1 }
 0x24f   : > { %1142 = vrot.lane.b32.xlu0 %v1137_v31, %s2412_s25  ;;  %v2331_v61 = vpop.eup %2330 }
 0x250   : > { %v2333_v27 = vpop.eup %2332  ;;  %v1306_v20 = vsel %vm646_vm5, %v1304_v59, %v1305_v4 }
 0x251   : > { %1140 = vrot.lane.b32.xlu1 %v1135_v58, %s2412_s25  ;;  %v2335_v14 = vpop.eup %2334  ;;  %v1307_v63 = vrot.slane %v2333_v27, 7  ;;  %v1618_v58 = vrot.slane %v3240_v23, 1  ;;  %v1754_v23 = vrot.slane %v3259_v11, 7 }
 0x252   : > { %v1438_v54 = vrot.slane %v2335_v14, 6  ;;  %v2337_v9 = vpop.eup %2336  ;;  %v1000_v14 = vrot.slane %v3376_v52, 2 }
 0x253   : > { %1601 = vrot.lane.b32.xlu0 %v2329_v17, %s2411_s24  ;;  %v1308_v0 = vsel %vm646_vm5, %v1305_v4, %v1307_v63  ;;  %v1439_v25 = vrot.slane %v2337_v9, 6  ;;  %v2339_v51 = vpop.eup %2338  ;;  %v1620_v17 = vrot.slane %v3269_v13, 1  ;;  %v1619_v62 = vsel %vm440_vm2, %v1617_v35, %v1618_v58  ;;  %v3745_v63 = vpop.permute.xlu1 %1158 }
 0x254   : > { %v2341_v18 = vpop.eup %2340  ;;  %v1913_v13 = vrot.slane %v3334_v44, 1  ;;  %v4077_v44 = vld [vmem:[#allocation16_spill] sm:$0xff]  ;;  %v998_v4 = vrot.slane %v3412_v42, 2 }
 0x255   : > { %1603 = vrot.lane.b32.xlu1 %v2331_v61, %s2411_s24  ;;  %v2343_v3 = vpop.eup %2342  ;;  %v1440_v7 = vsel %vm727_vm4, %v1438_v54, %v1439_v25  ;;  %v1733_v28 = vrot.slane %v2341_v18, 6  ;;  %v1621_v30 = vsel %vm440_vm2, %v1618_v58, %v1620_v17  ;;  %v4081_v61 = vld [vmem:[#allocation12_spill] sm:$0xff] }
 0x256   : > { %v2345_v22 = vpop.eup %2344  ;;  %v1916_v11 = vsel %vm440_vm2, %v1913_v13, %v1915_v15  ;;  %v999_v27 = vsel %vm595_vm7, %v997_v47, %v998_v4  ;;  %v1001_v40 = vsel %vm595_vm7, %v998_v4, %v1000_v14 }
 0x257   : > { %1311 = vrot.lane.b32.xlu0 %v1306_v20, %s2411_s24  ;;  %v2347_v60 = vpop.eup %2346  ;;  %v1734_v2 = vrot.slane %v2345_v22, 6  ;;  %v1004_v29 = vsub.f32 %v3340_v50, %v999_v27  ;;  %v3742_v20 = vpop.permute.xlu0 %1156  ;;  %v1005_v1 = vsub.f32 %v3358_v57, %v1001_v40  ;;  %v4084_v27 = vsub.f32 %v3418_v8, %v3437_v12 }
 0x259   : > { %1309 = vrot.lane.b32.xlu1 %v1304_v59, %s2411_s24  ;;  %v1735_v31 = vsel %vm727_vm4, %v1733_v28, %v1734_v2  ;;  %v1755_v59 = vrot.slane %v3252_v55, 7  ;;  %v1914_v55 = vsel %vm440_vm2, %v1912_v36, %v1913_v13  ;;  %v1006_v9 = vmul.f32 1.442695, %v1004_v29 }
 0x25a   : > { %v1008_v18 = vmul.f32 1.442695, %v1005_v1  ;;  %v4083_v13 = vsub.f32 %v3415_v38, %v3418_v8  ;;  %v1409_v14 = vmul.f32 1.442695, %v4084_v27  ;;  %v4086_v8 = vsub.f32 %v3425_v56, %v3454_v24 }
 0x25b   : > { %1441 = vrot.lane.b32.xlu0 %v1438_v54, %s2411_s24  ;;  %v1756_v45 = vsel %vm646_vm5, %v1754_v23, %v1755_v59  ;;  %v985_v54 = vsub.f32 %v3354_v46, %v3384_v5  ;;  %2348 = vpow2.f32 %v1006_v9 }
 0x25c   : > { %v1268_v36 = vmul.f32 1.442695, %v4083_v13 }
 0x25d   : > { %1313 = vrot.lane.b32.xlu1 %v1308_v0, %s2411_s24  ;;  %v1092_v0 = vsub.f32 %v3384_v5, %v3387_v6 }
 0x25f   : > { %1445 = vrot.lane.b32.xlu0 %v1439_v25, %s2411_s24  ;;  %v3752_v25 = vpop.permute.xlu0 %1160  ;;  %v1095_v22 = vmul.f32 1.442695, %v1092_v0 }
 0x261   : > { %1894 = vrot.lane.b32.xlu1 %v2339_v51, %s2412_s25  ;;  %v988_v51 = vmul.f32 1.442695, %v985_v54 }
 0x263   : > { %1896 = vrot.lane.b32.xlu0 %v2343_v3, %s2412_s25  ;;  %v986_v3 = vsub.f32 %v3407_v16, %v3412_v42  ;;  %2350 = vpow2.f32 %v988_v51 }
 0x264   : > { %2352 = vpow2.f32 %v1008_v18 }
 0x265   : > { %1443 = vrot.lane.b32.xlu1 %v1440_v7, %s2411_s24  ;;  %v3756_v7 = vpop.permute.xlu1 %1327  ;;  %2354 = vpow2.f32 %v1095_v22 }
 0x267   : > { %1736 = vrot.lane.b32.xlu0 %v1733_v28, %s2412_s25  ;;  %v990_v28 = vmul.f32 1.442695, %v986_v3 }
 0x269   : > { %1898 = vrot.lane.b32.xlu1 %v2347_v60, %s2412_s25  ;;  %v1093_v60 = vsub.f32 %v3412_v42, %v3415_v38  ;;  %v3762_v5 = vpop.permute.xlu1 %1331  ;;  %2356 = vpow2.f32 %v990_v28  ;;  %v1094_v42 = vsub.f32 %v3376_v52, %v3379_v32 }
 0x26b   : > { %1740 = vrot.lane.b32.xlu0 %v1734_v2, %s2412_s25  ;;  %v3760_v2 = vpop.permute.xlu0 %1329  ;;  %v1097_v58 = vmul.f32 1.442695, %v1093_v60  ;;  %v1411_v60 = vmul.f32 1.442695, %v4086_v8 }
 0x26d   : > { %1738 = vrot.lane.b32.xlu1 %v1735_v31, %s2412_s25  ;;  %v987_v31 = vsub.f32 %v3367_v34, %v3376_v52 }
 0x26f   : > { %1462 = vrot.lane.b32.xlu0 %v1459_v43, %s2411_s24  ;;  %v4082_v43 = vsub.f32 %v3387_v6, %v3390_v39  ;;  %v1099_v6 = vmul.f32 1.442695, %v1094_v42 }
 0x271   : > { %1464 = vrot.lane.b32.xlu1 %v1461_v21, %s2411_s24  ;;  %v2349_v21 = vpop.eup %2348 }
 0x273   : > { %1466 = vrot.lane.b32.xlu0 %v1460_v48, %s2411_s24  ;;  %v1266_v48 = vmul.f32 1.442695, %v4082_v43 }
 0x275   : > { %1622 = vrot.lane.b32.xlu1 %v1619_v62, %s2411_s24  ;;  %v992_v62 = vmul.f32 1.442695, %v987_v31  ;;  %2358 = vpow2.f32 %v1266_v48  ;;  %v4087_v48 = vsub.f32 %v3434_v19, %v3445_v49 }
 0x276   : > { %2360 = vpow2.f32 %v1097_v58 }
 0x277   : > { %1624 = vrot.lane.b32.xlu0 %v1621_v30, %s2411_s24  ;;  %v1012_v30 = vrot.slane %v2349_v21, 6  ;;  %2362 = vpow2.f32 %v992_v62  ;;  %v1566_v21 = vmul.f32 1.442695, %v4087_v48 }
 0x278   : > { %2364 = vpow2.f32 %v1099_v6  ;;  %v4089_v6 = vld [vmem:[#allocation3_spill] sm:$0xff] }
 0x279   : > { %1626 = vrot.lane.b32.xlu1 %v1620_v17, %s2411_s24  ;;  %2366 = vpow2.f32 %v1268_v36  ;;  %v4090_v13 = vsub.f32 %v3445_v49, %v4089_v6 }
 0x27a   : > { %2368 = vpow2.f32 %v1409_v14 }
 0x27b   : > { %1757 = vrot.lane.b32.xlu0 %v1754_v23, %s2412_s25  ;;  %v1702_v36 = vmul.f32 1.442695, %v4090_v13 }
 0x27d   : > { %1759 = vrot.lane.b32.xlu1 %v1756_v45, %s2412_s25 }
 0x27f   : > { %1761 = vrot.lane.b32.xlu0 %v1755_v59, %s2412_s25  ;;  %v2351_v59 = vpop.eup %2350 }
 0x280   : > { %v2353_v45 = vpop.eup %2352 }
 0x281   : > { %1917 = vrot.lane.b32.xlu1 %v1914_v55, %s2412_s25  ;;  %v1018_v55 = vadd.f32 %v2351_v59, %v1012_v30  ;;  %v2355_v52 = vpop.eup %2354  ;;  %v4088_v59 = vsub.f32 %v3454_v24, %v3465_v41 }
 0x283   : > { %1919 = vrot.lane.b32.xlu0 %v1916_v11, %s2412_s25  ;;  %v1101_v38 = vmul.f32 %v2355_v52, %v1018_v55  ;;  %v4091_v52 = vld [vmem:[#allocation6_spill] sm:$0xff] }
 0x285   : > { %1921 = vrot.lane.b32.xlu1 %v1915_v15, %s2412_s25 }
 0x287   : > { %607 = vrot.lane.b32.xlu0 %v4077_v44, %s2411_s24 }
 0x289   : > { %609 = vrot.lane.b32.xlu1 %v4078_v33, %s2411_s24 }
 0x28b   : > { %615 = vrot.lane.b32.xlu0 %v4077_v44, %s2415_s6 }
 0x28d   : > { %617 = vrot.lane.b32.xlu1 %v4078_v33, %s2415_s6 }
 0x28f   : > { %571 = vrot.lane.b32.xlu0 %v4079_v26, %s2411_s24  ;;  %v1013_v26 = vrot.slane %v2353_v45, 6  ;;  %v1570_v45 = vmul.f32 1.442695, %v4088_v59 }
 0x291   : > { %573 = vrot.lane.b32.xlu1 %v4080_v53, %s2411_s24  ;;  %v1265_v53 = vsub.f32 %v3379_v32, %v3425_v56  ;;  %v1014_v47 = vsel %vm727_vm4, %v1012_v30, %v1013_v26  ;;  %v4085_v32 = vsub.f32 %v3390_v39, %v3434_v19 }
 0x293   : > { %575 = vrot.lane.b32.xlu0 %v4081_v61, %s2411_s24  ;;  %v2357_v61 = vpop.eup %2356  ;;  %v1270_v54 = vmul.f32 1.442695, %v1265_v53  ;;  %v1407_v51 = vmul.f32 1.442695, %v4085_v32 }
 0x294   : > { %v2359_v40 = vpop.eup %2358  ;;  %v1019_v1 = vadd.f32 %v2357_v61, %v1014_v47 }
 0x295   : > { %v2361_v0 = vpop.eup %2360  ;;  %2370 = vpow2.f32 %v1270_v54 }
 0x296   : > { %v2363_v22 = vpop.eup %2362  ;;  %v1102_v31 = vmul.f32 %v2361_v0, %v1019_v1  ;;  %2372 = vpow2.f32 %v1407_v51 }
 0x297   : > { %v2365_v58 = vpop.eup %2364  ;;  %v1020_v39 = vadd.f32 %v2363_v22, %v1013_v26  ;;  %2374 = vpow2.f32 %v1411_v60  ;;  %v1858_v26 = vsub.f32 %v4089_v6, %v4091_v52  ;;  %v4096_v22 = vld [vmem:[#allocation20_spill] sm:$0xff] }
 0x298   : > { %v2367_v62 = vpop.eup %2366  ;;  %2376 = vpow2.f32 %v1566_v21 }
 0x299   : > { %v1103_v19 = vmul.f32 %v2365_v58, %v1020_v39  ;;  %2378 = vpow2.f32 %v1570_v45  ;;  %v2369_v14 = vpop.eup %2368  ;;  %v1861_v51 = vmul.f32 1.442695, %v1858_v26 }
 0x29a   : > { %2380 = vpow2.f32 %v1702_v36 }
 0x2b1   : > { %v3769_v35 = vpop.permute.xlu0 %807 }
 0x2b3   : > { %v3773_v17 = vpop.permute.xlu1 %824 }
 0x2b5   : > { %v3775_v23 = vpop.permute.xlu0 %803 }
 0x2b6   : > { %vm812_vm0 = vcmp.lt.f32.partialorder %v3531_v37, %v3775_v23  ;;  %v1028_v23 = vrot.slane %v3358_v57, 7 }
 0x2b7   : > { %v3780_v15 = vpop.permute.xlu1 %805 }
 0x2b8   : > { %vm813_vm4 = vcmp.lt.f32.partialorder %v3521_v10, %v3780_v15 }
 0x2b9   : > { %v3782_v11 = vpop.permute.xlu0 %822 }
 0x2ba   : > { %v3838_v15 = vsel %vm813_vm4, 8, %v3782_v11 }
 0x2bb   : > { %v3786_v4 = vpop.permute.xlu1 %820  ;;  %vm934_vm1 = vcmp.eq.s32.totalorder %v3838_v15, 0  ;;  %vm1025_vm14 = vcmp.eq.s32.totalorder %v3838_v15, 1  ;;  %vm1154_vm4 = vcmp.eq.s32.totalorder %v3838_v15, 2  ;;  %vm1615_vm13 = vcmp.eq.s32.totalorder %v3838_v15, 5 }
 0x2bd   : > { %v1139_v29 = vpop.permute.xlu0 %1138 }
 0x2be   : > { %v1147_v9 = vadd.f32 %v1139_v29, %v1101_v38  ;;  %v4092_v38 = vld [vmem:[#allocation8_spill] sm:$0xff]  ;;  %v4094_v29 = vld [vmem:[#allocation9_spill] sm:$0xff] }
 0x2bf   : > { %v1600_v18 = vpop.permute.xlu1 %1599  ;;  %v4093_v27 = vsub.f32 %v3437_v12, %v4092_v38  ;;  %v4095_v49 = vsub.f32 %v3465_v41, %v4094_v29  ;;  %v4097_v12 = vld [vmem:[#allocation2_spill] sm:$0xff]  ;;  %v4099_v41 = vld [vmem:[#allocation7_spill] sm:$0xff] }
 0x2c0   : > { %v1272_v3 = vmul.f32 %v2359_v40, %v1147_v9  ;;  %v2371_v9 = vpop.eup %2370  ;;  %v1859_v21 = vsub.f32 %v4097_v12, %v4099_v41 }
 0x2c1   : > { %v1143_v28 = vpop.permute.xlu0 %1142  ;;  %v1568_v24 = vmul.f32 1.442695, %v4093_v27  ;;  %v1706_v40 = vmul.f32 1.442695, %v4095_v49  ;;  %v2373_v32 = vpop.eup %2372 }
 0x2c2   : > { %v1149_v61 = vadd.f32 %v1143_v28, %v1103_v19  ;;  %v1860_v28 = vsub.f32 %v4094_v29, %v4096_v22  ;;  %v1863_v13 = vmul.f32 1.442695, %v1859_v21 }
 0x2c3   : > { %v1141_v43 = vpop.permute.xlu1 %1140  ;;  %2382 = vpow2.f32 %v1568_v24 }
 0x2c4   : > { %v1148_v42 = vadd.f32 %v1141_v43, %v1102_v31  ;;  %v1274_v31 = vmul.f32 %v2371_v9, %v1149_v61  ;;  %2384 = vpow2.f32 %v1706_v40  ;;  %v4098_v43 = vsub.f32 %v4092_v38, %v4097_v12 }
 0x2c5   : > { %v3801_v30 = vpop.permute.xlu0 %1601  ;;  %2386 = vpow2.f32 %v1861_v51  ;;  %v1865_v59 = vmul.f32 1.442695, %v1860_v28 }
 0x2c6   : > { %v1273_v56 = vmul.f32 %v2367_v62, %v1148_v42  ;;  %v1704_v48 = vmul.f32 1.442695, %v4098_v43 }
 0x2c7   : > { %v1604_v55 = vpop.permute.xlu1 %1603 }
 0x2c8   : > { %2388 = vpow2.f32 %v1704_v48 }
 0x2c9   : > { %v1312_v53 = vpop.permute.xlu0 %1311  ;;  %2390 = vpow2.f32 %v1865_v59 }
 0x2ca   : > { %v1319_v47 = vadd.f32 %v1312_v53, %v1273_v56  ;;  %2392 = vpow2.f32 %v1863_v13 }
 0x2cb   : > { %v1310_v54 = vpop.permute.xlu1 %1309 }
 0x2cc   : > { %v1318_v1 = vadd.f32 %v1310_v54, %v1272_v3  ;;  %v1414_v0 = vmul.f32 %v2369_v14, %v1319_v47  ;;  %v2375_v3 = vpop.eup %2374 }
 0x2cd   : > { %v1442_v8 = vpop.permute.xlu0 %1441  ;;  %v2377_v62 = vpop.eup %2376 }
 0x2ce   : > { %v1413_v60 = vmul.f32 %v2373_v32, %v1318_v1  ;;  %v2379_v19 = vpop.eup %2378 }
 0x2cf   : > { %v1314_v58 = vpop.permute.xlu1 %1313  ;;  %v2381_v61 = vpop.eup %2380 }
 0x2d0   : > { %v1450_v39 = vadd.f32 %v1442_v8, %v1413_v60  ;;  %v1320_v42 = vadd.f32 %v1314_v58, %v1274_v31  ;;  %v2383_v14 = vpop.eup %2382  ;;  %v4100_v8 = vld [vmem:[#allocation21_spill] sm:$0xff] }
 0x2d1   : > { %v1446_v45 = vpop.permute.xlu0 %1445  ;;  %v2385_v40 = vpop.eup %2384  ;;  %vm814_vm7 = vcmp.lt.f32.partialorder %v4100_v8, %v3769_v35  ;;  %v942_v35 = vrot.slane %v3367_v34, 1  ;;  %v3845_v34 = vsel %vm812_vm0, 8, %v3786_v4 }
 0x2d2   : > { %v1572_v56 = vmul.f32 %v2377_v62, %v1450_v39  ;;  %v1415_v6 = vmul.f32 %v2375_v3, %v1320_v42  ;;  %v2387_v51 = vpop.eup %2386  ;;  %v3830_v21 = vsel %vm814_vm7, 8, %v3773_v17  ;;  %v940_v3 = vrot.slane %v3407_v16, 1 }
 0x2d3   : > { %v1895_v36 = vpop.permute.xlu1 %1894  ;;  %v2389_v31 = vpop.eup %2388  ;;  %v939_v42 = vrot.slane %v3354_v46, 1  ;;  %v1981_v17 = vmin.f32 %v3531_v37, 20.0  ;;  %v1982_v16 = vmin.f32 %v3521_v10, 20.0  ;;  %vm935_vm3 = vcmp.eq.s32.totalorder %v3830_v21, 0 }
 0x2d4   : > { %v1452_v26 = vadd.f32 %v1446_v45, %v1415_v6  ;;  %v1608_v53 = vadd.f32 %v1600_v18, %v1572_v56  ;;  %v2391_v48 = vpop.eup %2390  ;;  %v1027_v46 = vrot.slane %v3340_v50, 7  ;;  %v943_v13 = vsel %vm440_vm2, %v940_v3, %v942_v35 }
 0x2d5   : > { %v1897_v47 = vpop.permute.xlu0 %1896  ;;  %v2393_v62 = vpop.eup %2392  ;;  %vm933_vm6 = vcmp.eq.s32.totalorder %v3845_v34, 0  ;;  %v941_v10 = vsel %vm440_vm2, %v939_v42, %v940_v3  ;;  %v949_v37 = vsel %vm935_vm3, %v942_v35, 0.0  ;;  %vm1026_vm8 = vcmp.eq.s32.totalorder %v3830_v21, 1 }
 0x2d6   : > { %v1574_v38 = vmul.f32 %v2379_v19, %v1452_v26  ;;  %v1708_v27 = vmul.f32 %v2381_v61, %v1608_v53  ;;  %v3857_v50 = vmul.f32 0.05, %v1981_v17  ;;  %v3859_v57 = vmul.f32 0.05, %v1982_v16 }
 0x2d7   : > { %v1444_v24 = vpop.permute.xlu1 %1443  ;;  %v948_v19 = vsel %vm934_vm1, %v943_v13, 0.0  ;;  %v1983_v53 = vmin.f32 %v4100_v8, 20.0  ;;  %vm1024_vm15 = vcmp.eq.s32.totalorder %v3845_v34, 1  ;;  %v947_v61 = vsel %vm933_vm6, %v941_v10, 0.0 }
 0x2d8   : > { %v1451_v29 = vadd.f32 %v1444_v24, %v1414_v0  ;;  %v1610_v49 = vadd.f32 %v1604_v55, %v1574_v38  ;;  %vm1155_vm7 = vcmp.eq.s32.totalorder %v3830_v21, 2  ;;  %vm1326_vm0 = vcmp.eq.s32.totalorder %v3830_v21, 3 }
 0x2d9   : > { %v1737_v54 = vpop.permute.xlu0 %1736  ;;  %vm1458_vm3 = vcmp.eq.s32.totalorder %v3830_v21, 4  ;;  %vm1616_vm1 = vcmp.eq.s32.totalorder %v3830_v21, 5  ;;  %vm1153_vm6 = vcmp.eq.s32.totalorder %v3845_v34, 2  ;;  %vm1456_vm9 = vcmp.eq.s32.totalorder %v3845_v34, 4 }
 0x2da   : > { %v1573_v9 = vmul.f32 %v2383_v14, %v1451_v29  ;;  %v1745_v1 = vadd.f32 %v1737_v54, %v1708_v27  ;;  %v1710_v32 = vmul.f32 %v2385_v40, %v1610_v49  ;;  %v1999_v14 = vrot.slane %v3857_v50, 7 }
 0x2db   : > { %v1899_v28 = vpop.permute.xlu1 %1898  ;;  %v2000_v29 = vrot.slane %v3859_v57, 7  ;;  %v1033_v40 = vsel %vm1024_vm15, %v1027_v46, %v947_v61  ;;  %vm1457_vm15 = vcmp.eq.s32.totalorder %v3838_v15, 4  ;;  %vm1751_vm10 = vcmp.eq.s32.totalorder %v3845_v34, 6 }
 0x2dc   : > { %v1867_v18 = vmul.f32 %v2387_v51, %v1745_v1  ;;  %v1609_v60 = vadd.f32 %v3801_v30, %v1573_v9  ;;  %v3869_v1 = vmul.f32 0.05, %v1983_v53  ;;  %v1165_v8 = vsel %vm1153_vm6, %v3742_v20, %v1033_v40 }
 0x2dd   : > { %v1741_v12 = vpop.permute.xlu0 %1740  ;;  %vm1614_vm6 = vcmp.eq.s32.totalorder %v3845_v34, 5 }
 0x2de   : > { %v1903_v0 = vadd.f32 %v1895_v36, %v1867_v18  ;;  %v1747_v55 = vadd.f32 %v1741_v12, %v1710_v32  ;;  %v1709_v43 = vmul.f32 %v2389_v31, %v1609_v60  ;;  %v1029_v36 = vsel %vm646_vm5, %v1027_v46, %v1028_v23 }
 0x2df   : > { %v1739_v58 = vpop.permute.xlu1 %1738  ;;  %v1034_v24 = vsel %vm1025_vm14, %v1029_v36, %v948_v19  ;;  %vm1325_vm14 = vcmp.eq.s32.totalorder %v3838_v15, 3 }
 0x2e0   : > { %2394 = vlog2.f32 %v1903_v0  ;;  %v1869_v39 = vmul.f32 %v2391_v48, %v1747_v55  ;;  %v1746_v30 = vadd.f32 %v1739_v58, %v1709_v43  ;;  %v1166_v51 = vsel %vm1154_vm4, %v3745_v63, %v1034_v24  ;;  %v4101_v43 = vld [vmem:[#allocation4_spill] sm:$0xff] }
 0x2e1   : > { %v3840_v59 = vpop.permute.xlu0 %1462  ;;  %vm1911_vm4 = vcmp.eq.s32.totalorder %v3830_v21, 7  ;;  %v1337_v20 = vsel %vm1325_vm14, %v3760_v2, %v1166_v51  ;;  %vm1910_vm14 = vcmp.eq.s32.totalorder %v3838_v15, 7 }
 0x2e2   : > { %v1905_v45 = vadd.f32 %v1899_v28, %v1869_v39  ;;  %v1868_v56 = vmul.f32 %v2393_v62, %v1746_v30 }
 0x2e3   : > { %v3850_v6 = vpop.permute.xlu1 %1464 }
 0x2e4   : > { %2396 = vlog2.f32 %v1905_v45  ;;  %v1904_v11 = vadd.f32 %v1897_v47, %v1868_v56  ;;  %v1035_v47 = vsel %vm1026_vm8, %v1028_v23, %v949_v37  ;;  %vm1753_vm8 = vcmp.eq.s32.totalorder %v3830_v21, 6  ;;  %v4103_v37 = vld [vmem:[#allocation19_spill] sm:$0xff] }
 0x2e5   : > { %v1467_v4 = vpop.permute.xlu0 %1466  ;;  %v1167_v54 = vsel %vm1155_vm7, %v3752_v25, %v1035_v47  ;;  %vm1324_vm7 = vcmp.eq.s32.totalorder %v3845_v34, 3  ;;  %v1472_v3 = vsel %vm1457_vm15, %v3850_v6, %v1337_v20 }
 0x2e6   : > { %2398 = vlog2.f32 %v1904_v11  ;;  %v1338_v18 = vsel %vm1326_vm0, %v3762_v5, %v1167_v54  ;;  %v1336_v0 = vsel %vm1324_vm7, %v3756_v7, %v1165_v8  ;;  %vm1752_vm0 = vcmp.eq.s32.totalorder %v3838_v15, 6 }
 0x2e7   : > { %v1623_v26 = vpop.permute.xlu1 %1622  ;;  %v1471_v58 = vsel %vm1456_vm9, %v3840_v59, %v1336_v0  ;;  %vm1909_vm9 = vcmp.eq.s32.totalorder %v3845_v34, 7  ;;  %v2001_v54 = vsel %vm646_vm5, %v1999_v14, %v2000_v29 }
 0x2e8   : > { %v1631_v30 = vsel %vm1614_vm6, %v1623_v26, %v1471_v58 }
 0x2e9   : > { %v1625_v38 = vpop.permute.xlu0 %1624 }
 0x2ea   : > { %v2395_v27 = vpop.eup %2394  ;;  %v1632_v7 = vsel %vm1615_vm13, %v1625_v38, %v1472_v3  ;;  %vm1988_vm13 = vcmp.ne.s32.totalorder %v3838_v15, 8 }
 0x2eb   : > { %v1930_v49 = vmul.f32 0.6931472, %v2395_v27  ;;  %v1627_v9 = vpop.permute.xlu1 %1626 }
 0x2ed   : > { %v1935_v32 = vadd.f32 %v1930_v49, %v4091_v52  ;;  %v1758_v28 = vpop.permute.xlu0 %1757 }
 0x2ee   : > { %v2397_v25 = vpop.eup %2396  ;;  %v1766_v23 = vsel %vm1751_vm10, %v1758_v28, %v1631_v30  ;;  %vm1987_vm10 = vcmp.ne.s32.totalorder %v3845_v34, 8 }
 0x2ef   : > { %v1934_v60 = vmul.f32 0.6931472, %v2397_v25  ;;  %v1760_v52 = vpop.permute.xlu1 %1759  ;;  %v1938_v31 = vmul.f32 8.0, %v1935_v32  ;;  %v1950_v59 = vrot.slane %v1935_v32, 1 }
 0x2f0   : > { %v2399_v63 = vpop.eup %2398  ;;  %v1767_v62 = vsel %vm1752_vm0, %v1760_v52, %v1632_v7 }
 0x2f1   : > { %v1937_v5 = vadd.f32 %v1934_v60, %v4096_v22  ;;  %v1932_v12 = vmul.f32 0.6931472, %v2399_v63  ;;  %v1762_v55 = vpop.permute.xlu0 %1761  ;;  %v1941_v48 = vsub.f32 %v4101_v43, %v1938_v31  ;;  %v1473_v22 = vsel %vm1458_vm3, %v1467_v4, %v1338_v18 }
 0x2f2   : > { %v1633_v42 = vsel %vm1616_vm1, %v1627_v9, %v1473_v22  ;;  %v2002_v9 = vrot.slane %v3869_v1, 7  ;;  %v2416_v31 = vmov 0.0   ;;  %vm4104_vm3 = vcmask 122880  }
 0x2f3   : > { %v1940_v2 = vmul.f32 8.0, %v1937_v5  ;;  %v1936_v35 = vadd.f32 %v1932_v12, %v4099_v41  ;;  %v1918_v39 = vpop.permute.xlu1 %1917  ;;  %v1953_v45 = vrot.slane %v1937_v5, 1  ;;  %v4102_v41 = vld [vmem:[#allocation5_spill] sm:$0xff]  ;;  %v1768_v6 = vsel %vm1753_vm8, %v1762_v55, %v1633_v42  ;;  %vm4107_vm8 = vmmov %vm4104_vm3 }
 0x2f4   : > { %v1926_v13 = vsel %vm1909_vm9, %v1918_v39, %v1766_v23  ;;  %v1944_v32 = vmul.f32 0.025, %v1941_v48  ;;  %v2232_v63 = vsel %vm1987_vm10, 1.0, %v2416_v31  ;;  %v2233_v43 = vsel %vm1988_vm13, 1.0, %v2416_v31 }
 0x2f5   : > { %v1939_v17 = vmul.f32 8.0, %v1936_v35  ;;  %v1951_v16 = vrot.slane %v1936_v35, 1  ;;  %v1920_v56 = vpop.permute.xlu0 %1919  ;;  %v1943_v46 = vsub.f32 %v4102_v41, %v1940_v2  ;;  %v2003_v35 = vsel %vm646_vm5, %v2000_v29, %v2002_v9 }
 0x2f6   : > { %v1927_v11 = vsel %vm1910_vm14, %v1920_v56, %v1767_v62  ;;  %vm4105_vm1 = vcmask 130050  }
 0x2f7   : > { %v1952_v10 = vsel %vm440_vm2, %v1950_v59, %v1951_v16  ;;  %v1942_v4 = vsub.f32 %v4103_v37, %v1939_v17  ;;  %v1954_v36 = vsel %vm440_vm2, %v1951_v16, %v1953_v45  ;;  %v1922_v19 = vpop.permute.xlu1 %1921  ;;  %v1946_v18 = vmul.f32 0.025, %v1943_v46 }
 0x2f8   : > { %v1958_v26 = vsub.f32 %v1926_v13, %v1952_v10  ;;  %v1959_v53 = vsub.f32 %v1927_v11, %v1954_v36  ;;  %v1928_v61 = vsel %vm1911_vm4, %v1922_v19, %v1768_v6  ;;  %vm1989_vm2 = vcmp.ne.s32.totalorder %v3830_v21, 8 }
 0x2f9   : > { %v1960_v47 = vsub.f32 %v1928_v61, %v1953_v45  ;;  %v608_v38 = vpop.permute.xlu0 %607  ;;  %v1945_v8 = vmul.f32 0.025, %v1942_v4  ;;  %v2014_v21 = vrot.slane %v2233_v43, 7  ;;  %v2234_v15 = vsel %vm1989_vm2, 1.0, %v2416_v31 }
 0x2fa   : > { %v1961_v27 = vmul.f32 0.775, %v1958_v26  ;;  %v1962_v24 = vmul.f32 0.775, %v1959_v53  ;;  %v613_v25 = vmax.f32 %v4077_v44, %v608_v38  ;;  %v2016_v50 = vrot.slane %v2234_v15, 7 }
 0x2fb   : > { %v1963_v49 = vmul.f32 0.775, %v1960_v47  ;;  %v610_v40 = vpop.permute.xlu1 %609  ;;  %v2257_v16 = vpack.i.bf16 %v2233_v43, %v2232_v63 }
 0x2fc   : > { %v1967_v51 = vrot.slane %v1961_v27, 7  ;;  %v1968_v28 = vrot.slane %v1962_v24, 7  ;;  %v614_v5 = vmax.f32 %v4078_v33, %v610_v40  ;;  %v2013_v33 = vrot.slane %v2232_v63, 7 }
 0x2fd   : > { %v1970_v60 = vrot.slane %v1963_v49, 7  ;;  %v616_v52 = vpop.permute.xlu0 %615 }
 0x2fe   : > { %v1975_v20 = vadd.f32 %v1967_v51, %v1944_v32  ;;  %v1969_v1 = vsel %vm646_vm5, %v1967_v51, %v1968_v28  ;;  %v621_v12 = vmax.f32 %v613_v25, %v616_v52  ;;  %v2015_v57 = vsel %vm646_vm5, %v2013_v33, %v2014_v21 }
 0x2ff   : > { %v1976_v0 = vadd.f32 %v1969_v1, %v1945_v8  ;;  %v1971_v44 = vsel %vm646_vm5, %v1968_v28, %v1970_v60  ;;  %v618_v55 = vpop.permute.xlu1 %617 }
 0x300   : > { %v1978_v34 = vsub.f32 0.0, %v1975_v20  ;;  %v1977_v48 = vadd.f32 %v1971_v44, %v1946_v18  ;;  %623 = vst.msk [vmem:[%s271_s10] sm:$0xff] %vm582_vm12, %v621_v12  ;;  %v622_v58 = vmax.f32 %v614_v5, %v618_v55 }
 0x301   : > { %v1979_v3 = vsub.f32 0.0, %v1976_v0  ;;  %v572_v2 = vpop.permute.xlu0 %571 }
 0x302   : > { %v2007_v22 = vmul.f32 %v1999_v14, %v1978_v34  ;;  %v1980_v7 = vsub.f32 0.0, %v1977_v48  ;;  %624 = vst.msk [vmem:[%s271_s10 + $0x8] sm:$0xff] %vm582_vm12, %v622_v58  ;;  %v2017_v14 = vsel %vm646_vm5, %v2014_v21, %v2016_v50  ;;  %vm4106_vm5 = vcmask 123904  }
 0x303   : > { %581 = vst.msk [vmem:[%s266_s13 - $0x1] sm:$0xfe] %vm580_vm11, %v572_v2  ;;  %v574_v39 = vpop.permute.xlu1 %573  ;;  %v2008_v30 = vmul.f32 %v2001_v54, %v1979_v3 }
 0x304   : > { %583 = vst.msk [vmem:[%s266_s13 + $0x7] sm:$0xff] %vm582_vm12, %v574_v39  ;;  %v2021_v42 = vmul.f32 %v2013_v33, %v2007_v22  ;;  %v2009_v62 = vmul.f32 %v2003_v35, %v1980_v7 }
 0x305   : > { %v576_v29 = vpop.permute.xlu0 %575  ;;  %v2022_v59 = vmul.f32 %v2015_v57, %v2008_v30 }
 0x306   : > { %585 = vst.msk [vmem:[%s266_s13 + $0xf] sm:$0x1] %vm4104_vm3, %v576_v29  ;;  %2027 = vrot.lane.b32.xlu1 %v2021_v42, %s2411_s24  ;;  %v2023_v17 = vmul.f32 %v2017_v14, %v2009_v62 }
 0x307   : > { %2029 = vrot.lane.b32.xlu0 %v2022_v59, %s2411_s24 }
 0x30a   : > { %2031 = vrot.lane.b32.xlu1 %v2023_v17, %s2411_s24 }
 0x30b   : > { %2258 = vrot.lane.b32.xlu0 %v2257_v16, %s2411_s24 }
 0x30e   : > { %2043 = vrot.lane.b32.xlu1 %v2234_v15, %s2411_s24 }
 0x378   : > { %v2028_v45 = vpop.permute.xlu1 %2027 }
 0x379   : > { %2036 = vst.msk [vmem:[%s276_s16 - $0x2] sm:$0xfc] %vm4105_vm1, %v2028_v45  ;;  %v2030_v56 = vpop.permute.xlu0 %2029 }
 0x37a   : > { %2037 = vst.msk [vmem:[%s276_s16 + $0x6] sm:$0xff] %vm582_vm12, %v2030_v56 }
 0x37c   : > { %v2032_v41 = vpop.permute.xlu1 %2031 }
 0x37d   : > { %2038 = vst.msk [vmem:[%s276_s16 + $0xe] sm:$0x3] %vm4106_vm5, %v2032_v41  ;;  %v2259_v46 = vpop.permute.xlu0 %2258 }
 0x37e   : > { %v2261_v23 = vunpack.i.h.bf16 %v2259_v46  ;;  %v2260_v6 = vunpack.i.l.bf16 %v2259_v46 }
 0x380   : > { %v2044_v11 = vpop.permute.xlu1 %2043  ;;  %2048 = vst.msk [vmem:[%s281_s20 - $0x1] sm:$0xfe] %vm580_vm11, %v2260_v6 }
 0x381   : > { %2049 = vst.msk [vmem:[%s281_s20 + $0x7] sm:$0xff] %vm582_vm12, %v2261_v23 }
 0x382   : > { %2050 = vst.msk [vmem:[%s281_s20 + $0xf] sm:$0x1] %vm4107_vm8, %v2044_v11 }
 0x383 PF: > { %s16_s18 = sadd.s32 1, %s2409_s18  }
 0x384   : > { %p13_p4 = scmp.ge.s32.totalorder %s16_s18, 4  }
 0x386   :  { %15 = sbr.rel (!%p13_p4) target bundleno = 1 (0x1), region = 97 }

</bundles_post_ra>
